<compile_context>
chip_gen: v5e
topology: v5e:2x2
jax: 0.10.0
libtpu: 0.0.40
codegen_flags: <defaults>
</compile_context>

<pallas_src>
import functools

import jax
import jax.numpy as jnp
from jax.experimental import pallas as pl
from jax.experimental.pallas import tpu as pltpu


# ----------------------------------------------------------------------------
# Pallas kernel: fused multi-input matmul-conv with epilogue.
# refs = (P_0..P_{n-1}, W_0..W_{n-1}, bias, out)
#   P_i : (K_i, TM)  activation / im2col patch tile
#   W_i : (Cout, K_i) weights
#   out : (Cout, TM) — last dim is the M tile (>=128) -> lane-dense stores.
# ----------------------------------------------------------------------------
def _convmm_kernel(*refs, n_in, n_leaky):
    p_refs = refs[:n_in]
    w_refs = refs[n_in:2 * n_in]
    b_ref = refs[2 * n_in]
    o_ref = refs[2 * n_in + 1]

    acc = None
    for p_ref, w_ref in zip(p_refs, w_refs):
        part = jnp.dot(w_ref[...].astype(jnp.bfloat16),
                       p_ref[...].astype(jnp.bfloat16),
                       preferred_element_type=jnp.float32)
        acc = part if acc is None else acc + part
    acc = acc + b_ref[...]                       # f32 bias, broadcast over lanes
    for _ in range(n_leaky):                     # fused LeakyReLU(0.2) epilogue
        acc = jnp.where(acc >= 0, acc, 0.2 * acc)
    o_ref[...] = acc.astype(o_ref.dtype)


def conv_mm(inputs, weights, bias, *, n_leaky=0, tile_m=512):
    """out(Cout, M) = sum_i W_i @ P_i + bias, then LeakyReLU(0.2) n_leaky times.

    inputs : list of (K_i, M) float32 arrays
    weights: list of (Cout, K_i) float32 arrays
    bias   : (Cout,) float32
    """
    M = inputs[0].shape[1]
    cout = weights[0].shape[0]
    tm = tile_m if M % tile_m == 0 else M
    n_in = len(inputs)

    in_specs = ([pl.BlockSpec((p.shape[0], tm), lambda j: (0, j)) for p in inputs]
                + [pl.BlockSpec(tuple(w.shape), lambda j: (0, 0)) for w in weights]
                + [pl.BlockSpec((cout, 1), lambda j: (0, 0))])

    return pl.pallas_call(
        functools.partial(_convmm_kernel, n_in=n_in, n_leaky=n_leaky),
        out_shape=jax.ShapeDtypeStruct((cout, M), jnp.float32),
        grid=(M // tm,),
        in_specs=in_specs,
        out_specs=pl.BlockSpec((cout, tm), lambda j: (0, j)),
        compiler_params=pltpu.CompilerParams(
            dimension_semantics=("parallel",)),
    )(*inputs, *weights, bias.reshape(cout, 1))


# ----------------------------------------------------------------------------
# Layout glue (plain JAX): im2col, nearest-upsample, pixel-shuffle.
# ----------------------------------------------------------------------------
def im2col(x_flat, N, H, W, ksize, pad, dil=(1, 1)):
    """(C, N*H*W) activation -> (KH*KW*C, N*H*W) patch matrix (stride-1 'same').

    # TODO(synk): at large resolutions handle borders in-kernel (masked loads)
    # instead of this wrapper-side padded-copy pass.
    """
    C = x_flat.shape[0]
    KH, KW = ksize
    ph, pw = pad
    dh, dw = dil
    x4 = x_flat.reshape(C, N, H, W)
    xp = jnp.pad(x4, ((0, 0), (0, 0), (ph, ph), (pw, pw)))
    Ho = H + 2 * ph - dh * (KH - 1)
    Wo = W + 2 * pw - dw * (KW - 1)
    assert (Ho, Wo) == (H, W), "all convs in this model are 'same' convs"
    taps = [xp[:, :, kh * dh:kh * dh + Ho, kw * dw:kw * dw + Wo]
            for kh in range(KH) for kw in range(KW)]
    patches = jnp.stack(taps, axis=0)            # (KH*KW, C, N, H, W)
    return patches.reshape(KH * KW * C, N * H * W)


def upsample_nearest_2x_cnhw(x):                 # (C, N, H, W) -> (C, N, 2H, 2W)
    return jnp.repeat(jnp.repeat(x, 2, axis=2), 2, axis=3)


def pixel_shuffle_cnhw(x, r=2):                  # matches torch.nn.PixelShuffle
    crr, n, h, w = x.shape
    c = crr // (r * r)
    x = x.reshape(c, r, r, n, h, w)
    x = x.transpose(0, 3, 4, 1, 5, 2)            # (c, n, h, r, w, r)
    return x.reshape(c, n, h * r, w * r)


# ----------------------------------------------------------------------------
# Parameter init (kaiming_normal * 0.1, zero bias) in matmul layout (Cout, K).
# ----------------------------------------------------------------------------
def init_conv_mm(key, cin, cout, kh=1, kw=1):
    fan_in = cin * kh * kw
    std = (2.0 / fan_in) ** 0.5
    w = jax.random.normal(key, (cout, kh * kw * cin), jnp.float32) * std * 0.1
    b = jnp.zeros((cout,), jnp.float32)
    return w, b


def make_rfb_params(key, c):
    bc = c // 4
    ks = jax.random.split(key, 14)

    # Fused branch-entry 1x1 convs: rows = [b1 | b2 | b3 | b4] along Cout.
    w_e1, _ = init_conv_mm(ks[0], c, bc)
    w_e2, _ = init_conv_mm(ks[1], c, bc)
    w_e3, _ = init_conv_mm(ks[2], c, bc)
    w_e4, _ = init_conv_mm(ks[3], c, bc // 2)
    entry_w = jnp.concatenate([w_e1, w_e2, w_e3, w_e4], axis=0)
    entry_b = jnp.zeros((entry_w.shape[0],), jnp.float32)

    b1_w, b1_b = init_conv_mm(ks[4], bc, bc, 3, 3)
    b2a_w, b2a_b = init_conv_mm(ks[5], bc, bc, 1, 3)
    b2b_w, b2b_b = init_conv_mm(ks[6], bc, bc, 3, 3)
    b3a_w, b3a_b = init_conv_mm(ks[7], bc, bc, 3, 1)
    b3b_w, b3b_b = init_conv_mm(ks[8], bc, bc, 3, 3)
    b4a_w, b4a_b = init_conv_mm(ks[9], bc // 2, bc // 4 * 3, 1, 3)
    b4b_w, b4b_b = init_conv_mm(ks[10], bc // 4 * 3, bc, 3, 1)
    b4c_w, b4c_b = init_conv_mm(ks[11], bc, bc, 3, 3)

    # conv_linear (1x1, 4*bc -> c) split per branch along Cin, with the 0.1
    # residual-combine scale folded into its weights/bias; shortcut 1x1 conv.
    lin_w, lin_b = init_conv_mm(ks[12], 4 * bc, c)
    lin_w = 0.1 * lin_w
    sc_w, sc_b = init_conv_mm(ks[13], c, c)
    tail_b = 0.1 * lin_b + sc_b                   # zeros, kept for clarity

    return {
        "entry": (entry_w, entry_b),
        "b1": (b1_w, b1_b),
        "b2a": (b2a_w, b2a_b), "b2b": (b2b_w, b2b_b),
        "b3a": (b3a_w, b3a_b), "b3b": (b3b_w, b3b_b),
        "b4a": (b4a_w, b4a_b), "b4b": (b4b_w, b4b_b), "b4c": (b4c_w, b4c_b),
        "lin": (lin_w[:, 0:bc], lin_w[:, bc:2 * bc],
                lin_w[:, 2 * bc:3 * bc], lin_w[:, 3 * bc:4 * bc]),
        "sc": sc_w,
        "tail_b": tail_b,
    }


def make_subpixel_params(key, c):
    k1, k2, k3 = jax.random.split(key, 3)
    return {"rfb1": make_rfb_params(k1, c),
            "conv": init_conv_mm(k2, c, c * 4, 3, 3),
            "rfb2": make_rfb_params(k3, c)}


# ----------------------------------------------------------------------------
# Forward passes (CM-layout glue calling the Pallas kernels)
# ----------------------------------------------------------------------------
def rfb_forward(p, x, N, H, W):
    """x: (C, M) float32, M = N*H*W  ->  (C, M) float32."""
    c, _ = x.shape
    bc = c // 4

    # One fused kernel for the four branch-entry 1x1 convs (+ LeakyReLU).
    entry = conv_mm([x], [p["entry"][0]], p["entry"][1], n_leaky=1)
    b1 = entry[0:bc]
    b2 = entry[bc:2 * bc]
    b3 = entry[2 * bc:3 * bc]
    b4 = entry[3 * bc:3 * bc + bc // 2]

    b1 = conv_mm([im2col(b1, N, H, W, (3, 3), (1, 1))], [p["b1"][0]], p["b1"][1])

    b2 = conv_mm([im2col(b2, N, H, W, (1, 3), (0, 1))], [p["b2a"][0]], p["b2a"][1], n_leaky=1)
    b2 = conv_mm([im2col(b2, N, H, W, (3, 3), (3, 3), (3, 3))], [p["b2b"][0]], p["b2b"][1])

    b3 = conv_mm([im2col(b3, N, H, W, (3, 1), (1, 0))], [p["b3a"][0]], p["b3a"][1], n_leaky=1)
    b3 = conv_mm([im2col(b3, N, H, W, (3, 3), (3, 3), (3, 3))], [p["b3b"][0]], p["b3b"][1])

    b4 = conv_mm([im2col(b4, N, H, W, (1, 3), (0, 1))], [p["b4a"][0]], p["b4a"][1], n_leaky=1)
    b4 = conv_mm([im2col(b4, N, H, W, (3, 1), (1, 0))], [p["b4b"][0]], p["b4b"][1], n_leaky=1)
    b4 = conv_mm([im2col(b4, N, H, W, (3, 3), (5, 5), (5, 5))], [p["b4c"][0]], p["b4c"][1])

    # Fused tail: conv_linear(concat(b1..b4))*0.1 + shortcut(x), then
    # LeakyReLU twice (RFB's own + the SubpixelConvolutionLayer one after it).
    w1, w2, w3, w4 = p["lin"]
    return conv_mm([b1, b2, b3, b4, x],
                   [w1, w2, w3, w4, p["sc"]],
                   p["tail_b"], n_leaky=2)


def subpixel_forward(params, x_nchw):
    N, C, H, W = x_nchw.shape
    x = jnp.transpose(x_nchw, (1, 0, 2, 3))               # NCHW -> CNHW
    x = upsample_nearest_2x_cnhw(x)                        # (C, N, 2H, 2W)
    H2, W2 = 2 * H, 2 * W

    out = rfb_forward(params["rfb1"], x.reshape(C, N * H2 * W2), N, H2, W2)
    # (trailing LeakyReLU already fused into the RFB tail kernel)

    conv_w, conv_b = params["conv"]                        # 3x3, C -> 4C
    out = conv_mm([im2col(out, N, H2, W2, (3, 3), (1, 1))], [conv_w], conv_b)

    out = pixel_shuffle_cnhw(out.reshape(4 * C, N, H2, W2), 2)   # (C, N, 4H, 4W)
    H4, W4 = 4 * H, 4 * W

    out = rfb_forward(params["rfb2"], out.reshape(C, N * H4 * W4), N, H4, W4)
    return jnp.transpose(out.reshape(C, N, H4, W4), (1, 0, 2, 3))  # -> NCHW


# ----------------------------------------------------------------------------
if __name__ == "__main__":
    channels = 16       # branch4 channel splits require channels % 16 == 0
    batch, spatial = 2, 8
    key = jax.random.PRNGKey(0)
    kp, kx = jax.random.split(key)

    params = make_subpixel_params(kp, channels)
    x = jax.random.normal(kx, (batch, channels, spatial, spatial), jnp.float32)

    fwd = jax.jit(subpixel_forward)
    out = jax.block_until_ready(fwd(params, x))

    expected_shape = (batch, channels, spatial * 4, spatial * 4)
    assert out.shape == expected_shape, (out.shape, expected_shape)
    assert bool(jnp.all(jnp.isfinite(out)))
    print("KERNEL_OK")
</pallas_src>

<mosaic_0001>
module attributes {stable_mosaic.version = 11 : i64} {
  func.func @_convmm_kernel(%arg0: i32, %arg1: memref<16x512xf32, #tpu.memory_space<vmem>>, %arg2: memref<14x16xf32, #tpu.memory_space<vmem>>, %arg3: memref<14x1xf32, #tpu.memory_space<vmem>>, %arg4: memref<14x512xf32, #tpu.memory_space<vmem>>) attributes {dimension_semantics = [#tpu.dimension_semantics<parallel>], iteration_bounds = array<i64: 1>, scalar_prefetch = 0 : i64, scratch_operands = 0 : i64, tpu.core_type = #tpu.core_type<tc>, window_params = [{transform_indices = @transform_0, window_bounds = array<i64: 16, 512>}, {pipeline_mode = #tpu.pipeline_mode<synchronous>, transform_indices = @transform_1, window_bounds = array<i64: 14, 16>}, {pipeline_mode = #tpu.pipeline_mode<synchronous>, transform_indices = @transform_2, window_bounds = array<i64: 14, 1>}, {transform_indices = @transform_3, window_bounds = array<i64: 14, 512>}]} {
    %c0 = arith.constant 0 : index
    %c0_0 = arith.constant 0 : index
    %0 = vector.load %arg2[%c0, %c0_0] : memref<14x16xf32, #tpu.memory_space<vmem>>, vector<14x16xf32>
    %1 = arith.truncf %0 : vector<14x16xf32> to vector<14x16xbf16>
    %c0_1 = arith.constant 0 : index
    %c0_2 = arith.constant 0 : index
    %2 = vector.load %arg1[%c0_1, %c0_2] : memref<16x512xf32, #tpu.memory_space<vmem>>, vector<16x512xf32>
    %3 = arith.truncf %2 : vector<16x512xf32> to vector<16x512xbf16>
    %cst = arith.constant dense<0.000000e+00> : vector<14x512xf32>
    %4 = tpu.matmul %1, %3, %cst {dimension_numbers = #tpu.dot_dimension_numbers<[1], [0], [0], [1], [0, 0, 1, 1], [], []>} : vector<14x16xbf16>, vector<16x512xbf16>, vector<14x512xf32> -> vector<14x512xf32>
    %c0_3 = arith.constant 0 : index
    %c0_4 = arith.constant 0 : index
    %5 = vector.load %arg3[%c0_3, %c0_4] : memref<14x1xf32, #tpu.memory_space<vmem>>, vector<14x1xf32>
    %6 = vector.broadcast %5 : vector<14x1xf32> to vector<14x512xf32>
    %7 = arith.addf %4, %6 : vector<14x512xf32>
    %cst_5 = arith.constant 0.000000e+00 : f32
    %8 = vector.broadcast %cst_5 : f32 to vector<14x512xf32>
    %9 = arith.cmpf oge, %7, %8 : vector<14x512xf32>
    %cst_6 = arith.constant 2.000000e-01 : f32
    %10 = vector.broadcast %cst_6 : f32 to vector<14x512xf32>
    %11 = arith.mulf %10, %7 : vector<14x512xf32>
    %12 = arith.select %9, %7, %11 : vector<14x512xi1>, vector<14x512xf32>
    %c0_7 = arith.constant 0 : index
    %c0_8 = arith.constant 0 : index
    %13 = vector.load %arg4[%c0_7, %c0_8] : memref<14x512xf32, #tpu.memory_space<vmem>>, vector<14x512xf32>
    tpu.vector_store %arg4[%c0_7, %c0_8], %12 {strides = array<i32>} : memref<14x512xf32, #tpu.memory_space<vmem>>, vector<14x512xf32>,
    return
  }
  func.func @transform_0(%arg0: i32) -> (i32, i32) {
    %c0_i32 = arith.constant 0 : i32
    %c0_i32_0 = arith.constant 0 : i32
    return %c0_i32, %arg0 : i32, i32
  }
  func.func @transform_1(%arg0: i32) -> (i32, i32) {
    %c0_i32 = arith.constant 0 : i32
    %c0_i32_0 = arith.constant 0 : i32
    %c0_i32_1 = arith.constant 0 : i32
    return %c0_i32, %c0_i32_0 : i32, i32
  }
  func.func @transform_2(%arg0: i32) -> (i32, i32) {
    %c0_i32 = arith.constant 0 : i32
    %c0_i32_0 = arith.constant 0 : i32
    %c0_i32_1 = arith.constant 0 : i32
    return %c0_i32, %c0_i32_0 : i32, i32
  }
  func.func @transform_3(%arg0: i32) -> (i32, i32) {
    %c0_i32 = arith.constant 0 : i32
    %c0_i32_0 = arith.constant 0 : i32
    return %c0_i32, %arg0 : i32, i32
  }
}

module attributes {stable_mosaic.version = 11 : i64} {
  func.func @_convmm_kernel(%arg0: i32, %arg1: memref<6x512xf32, #tpu.memory_space<vmem>>, %arg2: memref<3x6xf32, #tpu.memory_space<vmem>>, %arg3: memref<3x1xf32, #tpu.memory_space<vmem>>, %arg4: memref<3x512xf32, #tpu.memory_space<vmem>>) attributes {dimension_semantics = [#tpu.dimension_semantics<parallel>], iteration_bounds = array<i64: 1>, scalar_prefetch = 0 : i64, scratch_operands = 0 : i64, tpu.core_type = #tpu.core_type<tc>, window_params = [{transform_indices = @transform_0, window_bounds = array<i64: 6, 512>}, {pipeline_mode = #tpu.pipeline_mode<synchronous>, transform_indices = @transform_1, window_bounds = array<i64: 3, 6>}, {pipeline_mode = #tpu.pipeline_mode<synchronous>, transform_indices = @transform_2, window_bounds = array<i64: 3, 1>}, {transform_indices = @transform_3, window_bounds = array<i64: 3, 512>}]} {
    %c0 = arith.constant 0 : index
    %c0_0 = arith.constant 0 : index
    %0 = vector.load %arg2[%c0, %c0_0] : memref<3x6xf32, #tpu.memory_space<vmem>>, vector<3x6xf32>
    %1 = arith.truncf %0 : vector<3x6xf32> to vector<3x6xbf16>
    %c0_1 = arith.constant 0 : index
    %c0_2 = arith.constant 0 : index
    %2 = vector.load %arg1[%c0_1, %c0_2] : memref<6x512xf32, #tpu.memory_space<vmem>>, vector<6x512xf32>
    %3 = arith.truncf %2 : vector<6x512xf32> to vector<6x512xbf16>
    %cst = arith.constant dense<0.000000e+00> : vector<3x512xf32>
    %4 = tpu.matmul %1, %3, %cst {dimension_numbers = #tpu.dot_dimension_numbers<[1], [0], [0], [1], [0, 0, 1, 1], [], []>} : vector<3x6xbf16>, vector<6x512xbf16>, vector<3x512xf32> -> vector<3x512xf32>
    %c0_3 = arith.constant 0 : index
    %c0_4 = arith.constant 0 : index
    %5 = vector.load %arg3[%c0_3, %c0_4] : memref<3x1xf32, #tpu.memory_space<vmem>>, vector<3x1xf32>
    %6 = vector.broadcast %5 : vector<3x1xf32> to vector<3x512xf32>
    %7 = arith.addf %4, %6 : vector<3x512xf32>
    %cst_5 = arith.constant 0.000000e+00 : f32
    %8 = vector.broadcast %cst_5 : f32 to vector<3x512xf32>
    %9 = arith.cmpf oge, %7, %8 : vector<3x512xf32>
    %cst_6 = arith.constant 2.000000e-01 : f32
    %10 = vector.broadcast %cst_6 : f32 to vector<3x512xf32>
    %11 = arith.mulf %10, %7 : vector<3x512xf32>
    %12 = arith.select %9, %7, %11 : vector<3x512xi1>, vector<3x512xf32>
    %c0_7 = arith.constant 0 : index
    %c0_8 = arith.constant 0 : index
    %13 = vector.load %arg4[%c0_7, %c0_8] : memref<3x512xf32, #tpu.memory_space<vmem>>, vector<3x512xf32>
    tpu.vector_store %arg4[%c0_7, %c0_8], %12 {strides = array<i32>} : memref<3x512xf32, #tpu.memory_space<vmem>>, vector<3x512xf32>,
    return
  }
  func.func @transform_0(%arg0: i32) -> (i32, i32) {
    %c0_i32 = arith.constant 0 : i32
    %c0_i32_0 = arith.constant 0 : i32
    return %c0_i32, %arg0 : i32, i32
  }
  func.func @transform_1(%arg0: i32) -> (i32, i32) {
    %c0_i32 = arith.constant 0 : i32
    %c0_i32_0 = arith.constant 0 : i32
    %c0_i32_1 = arith.constant 0 : i32
    return %c0_i32, %c0_i32_0 : i32, i32
  }
  func.func @transform_2(%arg0: i32) -> (i32, i32) {
    %c0_i32 = arith.constant 0 : i32
    %c0_i32_0 = arith.constant 0 : i32
    %c0_i32_1 = arith.constant 0 : i32
    return %c0_i32, %c0_i32_0 : i32, i32
  }
  func.func @transform_3(%arg0: i32) -> (i32, i32) {
    %c0_i32 = arith.constant 0 : i32
    %c0_i32_0 = arith.constant 0 : i32
    return %c0_i32, %arg0 : i32, i32
  }
}

module attributes {stable_mosaic.version = 11 : i64} {
  func.func @_convmm_kernel(%arg0: i32, %arg1: memref<9x512xf32, #tpu.memory_space<vmem>>, %arg2: memref<4x9xf32, #tpu.memory_space<vmem>>, %arg3: memref<4x1xf32, #tpu.memory_space<vmem>>, %arg4: memref<4x512xf32, #tpu.memory_space<vmem>>) attributes {dimension_semantics = [#tpu.dimension_semantics<parallel>], iteration_bounds = array<i64: 1>, scalar_prefetch = 0 : i64, scratch_operands = 0 : i64, tpu.core_type = #tpu.core_type<tc>, window_params = [{transform_indices = @transform_0, window_bounds = array<i64: 9, 512>}, {pipeline_mode = #tpu.pipeline_mode<synchronous>, transform_indices = @transform_1, window_bounds = array<i64: 4, 9>}, {pipeline_mode = #tpu.pipeline_mode<synchronous>, transform_indices = @transform_2, window_bounds = array<i64: 4, 1>}, {transform_indices = @transform_3, window_bounds = array<i64: 4, 512>}]} {
    %c0 = arith.constant 0 : index
    %c0_0 = arith.constant 0 : index
    %0 = vector.load %arg2[%c0, %c0_0] : memref<4x9xf32, #tpu.memory_space<vmem>>, vector<4x9xf32>
    %1 = arith.truncf %0 : vector<4x9xf32> to vector<4x9xbf16>
    %c0_1 = arith.constant 0 : index
    %c0_2 = arith.constant 0 : index
    %2 = vector.load %arg1[%c0_1, %c0_2] : memref<9x512xf32, #tpu.memory_space<vmem>>, vector<9x512xf32>
    %3 = arith.truncf %2 : vector<9x512xf32> to vector<9x512xbf16>
    %cst = arith.constant dense<0.000000e+00> : vector<4x512xf32>
    %4 = tpu.matmul %1, %3, %cst {dimension_numbers = #tpu.dot_dimension_numbers<[1], [0], [0], [1], [0, 0, 1, 1], [], []>} : vector<4x9xbf16>, vector<9x512xbf16>, vector<4x512xf32> -> vector<4x512xf32>
    %c0_3 = arith.constant 0 : index
    %c0_4 = arith.constant 0 : index
    %5 = vector.load %arg3[%c0_3, %c0_4] : memref<4x1xf32, #tpu.memory_space<vmem>>, vector<4x1xf32>
    %6 = vector.broadcast %5 : vector<4x1xf32> to vector<4x512xf32>
    %7 = arith.addf %4, %6 : vector<4x512xf32>
    %cst_5 = arith.constant 0.000000e+00 : f32
    %8 = vector.broadcast %cst_5 : f32 to vector<4x512xf32>
    %9 = arith.cmpf oge, %7, %8 : vector<4x512xf32>
    %cst_6 = arith.constant 2.000000e-01 : f32
    %10 = vector.broadcast %cst_6 : f32 to vector<4x512xf32>
    %11 = arith.mulf %10, %7 : vector<4x512xf32>
    %12 = arith.select %9, %7, %11 : vector<4x512xi1>, vector<4x512xf32>
    %c0_7 = arith.constant 0 : index
    %c0_8 = arith.constant 0 : index
    %13 = vector.load %arg4[%c0_7, %c0_8] : memref<4x512xf32, #tpu.memory_space<vmem>>, vector<4x512xf32>
    tpu.vector_store %arg4[%c0_7, %c0_8], %12 {strides = array<i32>} : memref<4x512xf32, #tpu.memory_space<vmem>>, vector<4x512xf32>,
    return
  }
  func.func @transform_0(%arg0: i32) -> (i32, i32) {
    %c0_i32 = arith.constant 0 : i32
    %c0_i32_0 = arith.constant 0 : i32
    return %c0_i32, %arg0 : i32, i32
  }
  func.func @transform_1(%arg0: i32) -> (i32, i32) {
    %c0_i32 = arith.constant 0 : i32
    %c0_i32_0 = arith.constant 0 : i32
    %c0_i32_1 = arith.constant 0 : i32
    return %c0_i32, %c0_i32_0 : i32, i32
  }
  func.func @transform_2(%arg0: i32) -> (i32, i32) {
    %c0_i32 = arith.constant 0 : i32
    %c0_i32_0 = arith.constant 0 : i32
    %c0_i32_1 = arith.constant 0 : i32
    return %c0_i32, %c0_i32_0 : i32, i32
  }
  func.func @transform_3(%arg0: i32) -> (i32, i32) {
    %c0_i32 = arith.constant 0 : i32
    %c0_i32_0 = arith.constant 0 : i32
    return %c0_i32, %arg0 : i32, i32
  }
}

module attributes {stable_mosaic.version = 11 : i64} {
  func.func @_convmm_kernel(%arg0: i32, %arg1: memref<36x512xf32, #tpu.memory_space<vmem>>, %arg2: memref<4x36xf32, #tpu.memory_space<vmem>>, %arg3: memref<4x1xf32, #tpu.memory_space<vmem>>, %arg4: memref<4x512xf32, #tpu.memory_space<vmem>>) attributes {dimension_semantics = [#tpu.dimension_semantics<parallel>], iteration_bounds = array<i64: 1>, scalar_prefetch = 0 : i64, scratch_operands = 0 : i64, tpu.core_type = #tpu.core_type<tc>, window_params = [{transform_indices = @transform_0, window_bounds = array<i64: 36, 512>}, {pipeline_mode = #tpu.pipeline_mode<synchronous>, transform_indices = @transform_1, window_bounds = array<i64: 4, 36>}, {pipeline_mode = #tpu.pipeline_mode<synchronous>, transform_indices = @transform_2, window_bounds = array<i64: 4, 1>}, {transform_indices = @transform_3, window_bounds = array<i64: 4, 512>}]} {
    %c0 = arith.constant 0 : index
    %c0_0 = arith.constant 0 : index
    %0 = vector.load %arg2[%c0, %c0_0] : memref<4x36xf32, #tpu.memory_space<vmem>>, vector<4x36xf32>
    %1 = arith.truncf %0 : vector<4x36xf32> to vector<4x36xbf16>
    %c0_1 = arith.constant 0 : index
    %c0_2 = arith.constant 0 : index
    %2 = vector.load %arg1[%c0_1, %c0_2] : memref<36x512xf32, #tpu.memory_space<vmem>>, vector<36x512xf32>
    %3 = arith.truncf %2 : vector<36x512xf32> to vector<36x512xbf16>
    %cst = arith.constant dense<0.000000e+00> : vector<4x512xf32>
    %4 = tpu.matmul %1, %3, %cst {dimension_numbers = #tpu.dot_dimension_numbers<[1], [0], [0], [1], [0, 0, 1, 1], [], []>} : vector<4x36xbf16>, vector<36x512xbf16>, vector<4x512xf32> -> vector<4x512xf32>
    %c0_3 = arith.constant 0 : index
    %c0_4 = arith.constant 0 : index
    %5 = vector.load %arg3[%c0_3, %c0_4] : memref<4x1xf32, #tpu.memory_space<vmem>>, vector<4x1xf32>
    %6 = vector.broadcast %5 : vector<4x1xf32> to vector<4x512xf32>
    %7 = arith.addf %4, %6 : vector<4x512xf32>
    %c0_5 = arith.constant 0 : index
    %c0_6 = arith.constant 0 : index
    %8 = vector.load %arg4[%c0_5, %c0_6] : memref<4x512xf32, #tpu.memory_space<vmem>>, vector<4x512xf32>
    tpu.vector_store %arg4[%c0_5, %c0_6], %7 {strides = array<i32>} : memref<4x512xf32, #tpu.memory_space<vmem>>, vector<4x512xf32>,
    return
  }
  func.func @transform_0(%arg0: i32) -> (i32, i32) {
    %c0_i32 = arith.constant 0 : i32
    %c0_i32_0 = arith.constant 0 : i32
    return %c0_i32, %arg0 : i32, i32
  }
  func.func @transform_1(%arg0: i32) -> (i32, i32) {
    %c0_i32 = arith.constant 0 : i32
    %c0_i32_0 = arith.constant 0 : i32
    %c0_i32_1 = arith.constant 0 : i32
    return %c0_i32, %c0_i32_0 : i32, i32
  }
  func.func @transform_2(%arg0: i32) -> (i32, i32) {
    %c0_i32 = arith.constant 0 : i32
    %c0_i32_0 = arith.constant 0 : i32
    %c0_i32_1 = arith.constant 0 : i32
    return %c0_i32, %c0_i32_0 : i32, i32
  }
  func.func @transform_3(%arg0: i32) -> (i32, i32) {
    %c0_i32 = arith.constant 0 : i32
    %c0_i32_0 = arith.constant 0 : i32
    return %c0_i32, %arg0 : i32, i32
  }
}

module attributes {stable_mosaic.version = 11 : i64} {
  func.func @_convmm_kernel(%arg0: i32, %arg1: memref<12x512xf32, #tpu.memory_space<vmem>>, %arg2: memref<4x12xf32, #tpu.memory_space<vmem>>, %arg3: memref<4x1xf32, #tpu.memory_space<vmem>>, %arg4: memref<4x512xf32, #tpu.memory_space<vmem>>) attributes {dimension_semantics = [#tpu.dimension_semantics<parallel>], iteration_bounds = array<i64: 1>, scalar_prefetch = 0 : i64, scratch_operands = 0 : i64, tpu.core_type = #tpu.core_type<tc>, window_params = [{transform_indices = @transform_0, window_bounds = array<i64: 12, 512>}, {pipeline_mode = #tpu.pipeline_mode<synchronous>, transform_indices = @transform_1, window_bounds = array<i64: 4, 12>}, {pipeline_mode = #tpu.pipeline_mode<synchronous>, transform_indices = @transform_2, window_bounds = array<i64: 4, 1>}, {transform_indices = @transform_3, window_bounds = array<i64: 4, 512>}]} {
    %c0 = arith.constant 0 : index
    %c0_0 = arith.constant 0 : index
    %0 = vector.load %arg2[%c0, %c0_0] : memref<4x12xf32, #tpu.memory_space<vmem>>, vector<4x12xf32>
    %1 = arith.truncf %0 : vector<4x12xf32> to vector<4x12xbf16>
    %c0_1 = arith.constant 0 : index
    %c0_2 = arith.constant 0 : index
    %2 = vector.load %arg1[%c0_1, %c0_2] : memref<12x512xf32, #tpu.memory_space<vmem>>, vector<12x512xf32>
    %3 = arith.truncf %2 : vector<12x512xf32> to vector<12x512xbf16>
    %cst = arith.constant dense<0.000000e+00> : vector<4x512xf32>
    %4 = tpu.matmul %1, %3, %cst {dimension_numbers = #tpu.dot_dimension_numbers<[1], [0], [0], [1], [0, 0, 1, 1], [], []>} : vector<4x12xbf16>, vector<12x512xbf16>, vector<4x512xf32> -> vector<4x512xf32>
    %c0_3 = arith.constant 0 : index
    %c0_4 = arith.constant 0 : index
    %5 = vector.load %arg3[%c0_3, %c0_4] : memref<4x1xf32, #tpu.memory_space<vmem>>, vector<4x1xf32>
    %6 = vector.broadcast %5 : vector<4x1xf32> to vector<4x512xf32>
    %7 = arith.addf %4, %6 : vector<4x512xf32>
    %cst_5 = arith.constant 0.000000e+00 : f32
    %8 = vector.broadcast %cst_5 : f32 to vector<4x512xf32>
    %9 = arith.cmpf oge, %7, %8 : vector<4x512xf32>
    %cst_6 = arith.constant 2.000000e-01 : f32
    %10 = vector.broadcast %cst_6 : f32 to vector<4x512xf32>
    %11 = arith.mulf %10, %7 : vector<4x512xf32>
    %12 = arith.select %9, %7, %11 : vector<4x512xi1>, vector<4x512xf32>
    %c0_7 = arith.constant 0 : index
    %c0_8 = arith.constant 0 : index
    %13 = vector.load %arg4[%c0_7, %c0_8] : memref<4x512xf32, #tpu.memory_space<vmem>>, vector<4x512xf32>
    tpu.vector_store %arg4[%c0_7, %c0_8], %12 {strides = array<i32>} : memref<4x512xf32, #tpu.memory_space<vmem>>, vector<4x512xf32>,
    return
  }
  func.func @transform_0(%arg0: i32) -> (i32, i32) {
    %c0_i32 = arith.constant 0 : i32
    %c0_i32_0 = arith.constant 0 : i32
    return %c0_i32, %arg0 : i32, i32
  }
  func.func @transform_1(%arg0: i32) -> (i32, i32) {
    %c0_i32 = arith.constant 0 : i32
    %c0_i32_0 = arith.constant 0 : i32
    %c0_i32_1 = arith.constant 0 : i32
    return %c0_i32, %c0_i32_0 : i32, i32
  }
  func.func @transform_2(%arg0: i32) -> (i32, i32) {
    %c0_i32 = arith.constant 0 : i32
    %c0_i32_0 = arith.constant 0 : i32
    %c0_i32_1 = arith.constant 0 : i32
    return %c0_i32, %c0_i32_0 : i32, i32
  }
  func.func @transform_3(%arg0: i32) -> (i32, i32) {
    %c0_i32 = arith.constant 0 : i32
    %c0_i32_0 = arith.constant 0 : i32
    return %c0_i32, %arg0 : i32, i32
  }
}

module attributes {stable_mosaic.version = 11 : i64} {
  func.func @_convmm_kernel(%arg0: i32, %arg1: memref<4x512xf32, #tpu.memory_space<vmem>>, %arg2: memref<4x512xf32, #tpu.memory_space<vmem>>, %arg3: memref<4x512xf32, #tpu.memory_space<vmem>>, %arg4: memref<4x512xf32, #tpu.memory_space<vmem>>, %arg5: memref<16x512xf32, #tpu.memory_space<vmem>>, %arg6: memref<16x4xf32, #tpu.memory_space<vmem>>, %arg7: memref<16x4xf32, #tpu.memory_space<vmem>>, %arg8: memref<16x4xf32, #tpu.memory_space<vmem>>, %arg9: memref<16x4xf32, #tpu.memory_space<vmem>>, %arg10: memref<16x16xf32, #tpu.memory_space<vmem>>, %arg11: memref<16x1xf32, #tpu.memory_space<vmem>>, %arg12: memref<16x512xf32, #tpu.memory_space<vmem>>) attributes {dimension_semantics = [#tpu.dimension_semantics<parallel>], iteration_bounds = array<i64: 1>, scalar_prefetch = 0 : i64, scratch_operands = 0 : i64, tpu.core_type = #tpu.core_type<tc>, window_params = [{transform_indices = @transform_0, window_bounds = array<i64: 4, 512>}, {transform_indices = @transform_1, window_bounds = array<i64: 4, 512>}, {transform_indices = @transform_2, window_bounds = array<i64: 4, 512>}, {transform_indices = @transform_3, window_bounds = array<i64: 4, 512>}, {transform_indices = @transform_4, window_bounds = array<i64: 16, 512>}, {pipeline_mode = #tpu.pipeline_mode<synchronous>, transform_indices = @transform_5, window_bounds = array<i64: 16, 4>}, {pipeline_mode = #tpu.pipeline_mode<synchronous>, transform_indices = @transform_6, window_bounds = array<i64: 16, 4>}, {pipeline_mode = #tpu.pipeline_mode<synchronous>, transform_indices = @transform_7, window_bounds = array<i64: 16, 4>}, {pipeline_mode = #tpu.pipeline_mode<synchronous>, transform_indices = @transform_8, window_bounds = array<i64: 16, 4>}, {pipeline_mode = #tpu.pipeline_mode<synchronous>, transform_indices = @transform_9, window_bounds = array<i64: 16, 16>}, {pipeline_mode = #tpu.pipeline_mode<synchronous>, transform_indices = @transform_10, window_bounds = array<i64: 16, 1>}, {transform_indices = @transform_11, window_bounds = array<i64: 16, 512>}]} {
    %c0 = arith.constant 0 : index
    %c0_0 = arith.constant 0 : index
    %0 = vector.load %arg6[%c0, %c0_0] : memref<16x4xf32, #tpu.memory_space<vmem>>, vector<16x4xf32>
    %1 = arith.truncf %0 : vector<16x4xf32> to vector<16x4xbf16>
    %c0_1 = arith.constant 0 : index
    %c0_2 = arith.constant 0 : index
    %2 = vector.load %arg1[%c0_1, %c0_2] : memref<4x512xf32, #tpu.memory_space<vmem>>, vector<4x512xf32>
    %3 = arith.truncf %2 : vector<4x512xf32> to vector<4x512xbf16>
    %cst = arith.constant dense<0.000000e+00> : vector<16x512xf32>
    %4 = tpu.matmul %1, %3, %cst {dimension_numbers = #tpu.dot_dimension_numbers<[1], [0], [0], [1], [0, 0, 1, 1], [], []>} : vector<16x4xbf16>, vector<4x512xbf16>, vector<16x512xf32> -> vector<16x512xf32>
    %c0_3 = arith.constant 0 : index
    %c0_4 = arith.constant 0 : index
    %5 = vector.load %arg7[%c0_3, %c0_4] : memref<16x4xf32, #tpu.memory_space<vmem>>, vector<16x4xf32>
    %6 = arith.truncf %5 : vector<16x4xf32> to vector<16x4xbf16>
    %c0_5 = arith.constant 0 : index
    %c0_6 = arith.constant 0 : index
    %7 = vector.load %arg2[%c0_5, %c0_6] : memref<4x512xf32, #tpu.memory_space<vmem>>, vector<4x512xf32>
    %8 = arith.truncf %7 : vector<4x512xf32> to vector<4x512xbf16>
    %cst_7 = arith.constant dense<0.000000e+00> : vector<16x512xf32>
    %9 = tpu.matmul %6, %8, %cst_7 {dimension_numbers = #tpu.dot_dimension_numbers<[1], [0], [0], [1], [0, 0, 1, 1], [], []>} : vector<16x4xbf16>, vector<4x512xbf16>, vector<16x512xf32> -> vector<16x512xf32>
    %10 = arith.addf %4, %9 : vector<16x512xf32>
    %c0_8 = arith.constant 0 : index
    %c0_9 = arith.constant 0 : index
    %11 = vector.load %arg8[%c0_8, %c0_9] : memref<16x4xf32, #tpu.memory_space<vmem>>, vector<16x4xf32>
    %12 = arith.truncf %11 : vector<16x4xf32> to vector<16x4xbf16>
    %c0_10 = arith.constant 0 : index
    %c0_11 = arith.constant 0 : index
    %13 = vector.load %arg3[%c0_10, %c0_11] : memref<4x512xf32, #tpu.memory_space<vmem>>, vector<4x512xf32>
    %14 = arith.truncf %13 : vector<4x512xf32> to vector<4x512xbf16>
    %cst_12 = arith.constant dense<0.000000e+00> : vector<16x512xf32>
    %15 = tpu.matmul %12, %14, %cst_12 {dimension_numbers = #tpu.dot_dimension_numbers<[1], [0], [0], [1], [0, 0, 1, 1], [], []>} : vector<16x4xbf16>, vector<4x512xbf16>, vector<16x512xf32> -> vector<16x512xf32>
    %16 = arith.addf %10, %15 : vector<16x512xf32>
    %c0_13 = arith.constant 0 : index
    %c0_14 = arith.constant 0 : index
    %17 = vector.load %arg9[%c0_13, %c0_14] : memref<16x4xf32, #tpu.memory_space<vmem>>, vector<16x4xf32>
    %18 = arith.truncf %17 : vector<16x4xf32> to vector<16x4xbf16>
    %c0_15 = arith.constant 0 : index
    %c0_16 = arith.constant 0 : index
    %19 = vector.load %arg4[%c0_15, %c0_16] : memref<4x512xf32, #tpu.memory_space<vmem>>, vector<4x512xf32>
    %20 = arith.truncf %19 : vector<4x512xf32> to vector<4x512xbf16>
    %cst_17 = arith.constant dense<0.000000e+00> : vector<16x512xf32>
    %21 = tpu.matmul %18, %20, %cst_17 {dimension_numbers = #tpu.dot_dimension_numbers<[1], [0], [0], [1], [0, 0, 1, 1], [], []>} : vector<16x4xbf16>, vector<4x512xbf16>, vector<16x512xf32> -> vector<16x512xf32>
    %22 = arith.addf %16, %21 : vector<16x512xf32>
    %c0_18 = arith.constant 0 : index
    %c0_19 = arith.constant 0 : index
    %23 = vector.load %arg10[%c0_18, %c0_19] : memref<16x16xf32, #tpu.memory_space<vmem>>, vector<16x16xf32>
    %24 = arith.truncf %23 : vector<16x16xf32> to vector<16x16xbf16>
    %c0_20 = arith.constant 0 : index
    %c0_21 = arith.constant 0 : index
    %25 = vector.load %arg5[%c0_20, %c0_21] : memref<16x512xf32, #tpu.memory_space<vmem>>, vector<16x512xf32>
    %26 = arith.truncf %25 : vector<16x512xf32> to vector<16x512xbf16>
    %cst_22 = arith.constant dense<0.000000e+00> : vector<16x512xf32>
    %27 = tpu.matmul %24, %26, %cst_22 {dimension_numbers = #tpu.dot_dimension_numbers<[1], [0], [0], [1], [0, 0, 1, 1], [], []>} : vector<16x16xbf16>, vector<16x512xbf16>, vector<16x512xf32> -> vector<16x512xf32>
    %28 = arith.addf %22, %27 : vector<16x512xf32>
    %c0_23 = arith.constant 0 : index
    %c0_24 = arith.constant 0 : index
    %29 = vector.load %arg11[%c0_23, %c0_24] : memref<16x1xf32, #tpu.memory_space<vmem>>, vector<16x1xf32>
    %30 = vector.broadcast %29 : vector<16x1xf32> to vector<16x512xf32>
    %31 = arith.addf %28, %30 : vector<16x512xf32>
    %cst_25 = arith.constant 0.000000e+00 : f32
    %32 = vector.broadcast %cst_25 : f32 to vector<16x512xf32>
    %33 = arith.cmpf oge, %31, %32 : vector<16x512xf32>
    %cst_26 = arith.constant 2.000000e-01 : f32
    %34 = vector.broadcast %cst_26 : f32 to vector<16x512xf32>
    %35 = arith.mulf %34, %31 : vector<16x512xf32>
    %36 = arith.select %33, %31, %35 : vector<16x512xi1>, vector<16x512xf32>
    %cst_27 = arith.constant 0.000000e+00 : f32
    %37 = vector.broadcast %cst_27 : f32 to vector<16x512xf32>
    %38 = arith.cmpf oge, %36, %37 : vector<16x512xf32>
    %cst_28 = arith.constant 2.000000e-01 : f32
    %39 = vector.broadcast %cst_28 : f32 to vector<16x512xf32>
    %40 = arith.mulf %39, %36 : vector<16x512xf32>
    %41 = arith.select %38, %36, %40 : vector<16x512xi1>, vector<16x512xf32>
    %c0_29 = arith.constant 0 : index
    %c0_30 = arith.constant 0 : index
    %42 = vector.load %arg12[%c0_29, %c0_30] : memref<16x512xf32, #tpu.memory_space<vmem>>, vector<16x512xf32>
    tpu.vector_store %arg12[%c0_29, %c0_30], %41 {strides = array<i32>} : memref<16x512xf32, #tpu.memory_space<vmem>>, vector<16x512xf32>,
    return
  }
  func.func @transform_0(%arg0: i32) -> (i32, i32) {
    %c0_i32 = arith.constant 0 : i32
    %c0_i32_0 = arith.constant 0 : i32
    return %c0_i32, %arg0 : i32, i32
  }
  func.func @transform_1(%arg0: i32) -> (i32, i32) {
    %c0_i32 = arith.constant 0 : i32
    %c0_i32_0 = arith.constant 0 : i32
    return %c0_i32, %arg0 : i32, i32
  }
  func.func @transform_2(%arg0: i32) -> (i32, i32) {
    %c0_i32 = arith.constant 0 : i32
    %c0_i32_0 = arith.constant 0 : i32
    return %c0_i32, %arg0 : i32, i32
  }
  func.func @transform_3(%arg0: i32) -> (i32, i32) {
    %c0_i32 = arith.constant 0 : i32
    %c0_i32_0 = arith.constant 0 : i32
    return %c0_i32, %arg0 : i32, i32
  }
  func.func @transform_4(%arg0: i32) -> (i32, i32) {
    %c0_i32 = arith.constant 0 : i32
    %c0_i32_0 = arith.constant 0 : i32
    return %c0_i32, %arg0 : i32, i32
  }
  func.func @transform_5(%arg0: i32) -> (i32, i32) {
    %c0_i32 = arith.constant 0 : i32
    %c0_i32_0 = arith.constant 0 : i32
    %c0_i32_1 = arith.constant 0 : i32
    return %c0_i32, %c0_i32_0 : i32, i32
  }
  func.func @transform_6(%arg0: i32) -> (i32, i32) {
    %c0_i32 = arith.constant 0 : i32
    %c0_i32_0 = arith.constant 0 : i32
    %c0_i32_1 = arith.constant 0 : i32
    return %c0_i32, %c0_i32_0 : i32, i32
  }
  func.func @transform_7(%arg0: i32) -> (i32, i32) {
    %c0_i32 = arith.constant 0 : i32
    %c0_i32_0 = arith.constant 0 : i32
    %c0_i32_1 = arith.constant 0 : i32
    return %c0_i32, %c0_i32_0 : i32, i32
  }
  func.func @transform_8(%arg0: i32) -> (i32, i32) {
    %c0_i32 = arith.constant 0 : i32
    %c0_i32_0 = arith.constant 0 : i32
    %c0_i32_1 = arith.constant 0 : i32
    return %c0_i32, %c0_i32_0 : i32, i32
  }
  func.func @transform_9(%arg0: i32) -> (i32, i32) {
    %c0_i32 = arith.constant 0 : i32
    %c0_i32_0 = arith.constant 0 : i32
    %c0_i32_1 = arith.constant 0 : i32
    return %c0_i32, %c0_i32_0 : i32, i32
  }
  func.func @transform_10(%arg0: i32) -> (i32, i32) {
    %c0_i32 = arith.constant 0 : i32
    %c0_i32_0 = arith.constant 0 : i32
    %c0_i32_1 = arith.constant 0 : i32
    return %c0_i32, %c0_i32_0 : i32, i32
  }
  func.func @transform_11(%arg0: i32) -> (i32, i32) {
    %c0_i32 = arith.constant 0 : i32
    %c0_i32_0 = arith.constant 0 : i32
    return %c0_i32, %arg0 : i32, i32
  }
}

module attributes {stable_mosaic.version = 11 : i64} {
  func.func @_convmm_kernel(%arg0: i32, %arg1: memref<144x512xf32, #tpu.memory_space<vmem>>, %arg2: memref<64x144xf32, #tpu.memory_space<vmem>>, %arg3: memref<64x1xf32, #tpu.memory_space<vmem>>, %arg4: memref<64x512xf32, #tpu.memory_space<vmem>>) attributes {dimension_semantics = [#tpu.dimension_semantics<parallel>], iteration_bounds = array<i64: 1>, scalar_prefetch = 0 : i64, scratch_operands = 0 : i64, tpu.core_type = #tpu.core_type<tc>, window_params = [{transform_indices = @transform_0, window_bounds = array<i64: 144, 512>}, {pipeline_mode = #tpu.pipeline_mode<synchronous>, transform_indices = @transform_1, window_bounds = array<i64: 64, 144>}, {pipeline_mode = #tpu.pipeline_mode<synchronous>, transform_indices = @transform_2, window_bounds = array<i64: 64, 1>}, {transform_indices = @transform_3, window_bounds = array<i64: 64, 512>}]} {
    %c0 = arith.constant 0 : index
    %c0_0 = arith.constant 0 : index
    %0 = vector.load %arg2[%c0, %c0_0] : memref<64x144xf32, #tpu.memory_space<vmem>>, vector<64x144xf32>
    %1 = arith.truncf %0 : vector<64x144xf32> to vector<64x144xbf16>
    %c0_1 = arith.constant 0 : index
    %c0_2 = arith.constant 0 : index
    %2 = vector.load %arg1[%c0_1, %c0_2] : memref<144x512xf32, #tpu.memory_space<vmem>>, vector<144x512xf32>
    %3 = arith.truncf %2 : vector<144x512xf32> to vector<144x512xbf16>
    %cst = arith.constant dense<0.000000e+00> : vector<64x512xf32>
    %4 = tpu.matmul %1, %3, %cst {dimension_numbers = #tpu.dot_dimension_numbers<[1], [0], [0], [1], [0, 0, 1, 1], [], []>} : vector<64x144xbf16>, vector<144x512xbf16>, vector<64x512xf32> -> vector<64x512xf32>
    %c0_3 = arith.constant 0 : index
    %c0_4 = arith.constant 0 : index
    %5 = vector.load %arg3[%c0_3, %c0_4] : memref<64x1xf32, #tpu.memory_space<vmem>>, vector<64x1xf32>
    %6 = vector.broadcast %5 : vector<64x1xf32> to vector<64x512xf32>
    %7 = arith.addf %4, %6 : vector<64x512xf32>
    %c0_5 = arith.constant 0 : index
    %c0_6 = arith.constant 0 : index
    %8 = vector.load %arg4[%c0_5, %c0_6] : memref<64x512xf32, #tpu.memory_space<vmem>>, vector<64x512xf32>
    tpu.vector_store %arg4[%c0_5, %c0_6], %7 {strides = array<i32>} : memref<64x512xf32, #tpu.memory_space<vmem>>, vector<64x512xf32>,
    return
  }
  func.func @transform_0(%arg0: i32) -> (i32, i32) {
    %c0_i32 = arith.constant 0 : i32
    %c0_i32_0 = arith.constant 0 : i32
    return %c0_i32, %arg0 : i32, i32
  }
  func.func @transform_1(%arg0: i32) -> (i32, i32) {
    %c0_i32 = arith.constant 0 : i32
    %c0_i32_0 = arith.constant 0 : i32
    %c0_i32_1 = arith.constant 0 : i32
    return %c0_i32, %c0_i32_0 : i32, i32
  }
  func.func @transform_2(%arg0: i32) -> (i32, i32) {
    %c0_i32 = arith.constant 0 : i32
    %c0_i32_0 = arith.constant 0 : i32
    %c0_i32_1 = arith.constant 0 : i32
    return %c0_i32, %c0_i32_0 : i32, i32
  }
  func.func @transform_3(%arg0: i32) -> (i32, i32) {
    %c0_i32 = arith.constant 0 : i32
    %c0_i32_0 = arith.constant 0 : i32
    return %c0_i32, %arg0 : i32, i32
  }
}

module attributes {stable_mosaic.version = 11 : i64} {
  func.func @_convmm_kernel(%arg0: i32, %arg1: memref<16x512xf32, #tpu.memory_space<vmem>>, %arg2: memref<14x16xf32, #tpu.memory_space<vmem>>, %arg3: memref<14x1xf32, #tpu.memory_space<vmem>>, %arg4: memref<14x512xf32, #tpu.memory_space<vmem>>) attributes {dimension_semantics = [#tpu.dimension_semantics<parallel>], iteration_bounds = array<i64: 4>, scalar_prefetch = 0 : i64, scratch_operands = 0 : i64, tpu.core_type = #tpu.core_type<tc>, window_params = [{transform_indices = @transform_0, window_bounds = array<i64: 16, 512>}, {pipeline_mode = #tpu.pipeline_mode<synchronous>, transform_indices = @transform_1, window_bounds = array<i64: 14, 16>}, {pipeline_mode = #tpu.pipeline_mode<synchronous>, transform_indices = @transform_2, window_bounds = array<i64: 14, 1>}, {transform_indices = @transform_3, window_bounds = array<i64: 14, 512>}]} {
    %c0 = arith.constant 0 : index
    %c0_0 = arith.constant 0 : index
    %0 = vector.load %arg2[%c0, %c0_0] : memref<14x16xf32, #tpu.memory_space<vmem>>, vector<14x16xf32>
    %1 = arith.truncf %0 : vector<14x16xf32> to vector<14x16xbf16>
    %c0_1 = arith.constant 0 : index
    %c0_2 = arith.constant 0 : index
    %2 = vector.load %arg1[%c0_1, %c0_2] : memref<16x512xf32, #tpu.memory_space<vmem>>, vector<16x512xf32>
    %3 = arith.truncf %2 : vector<16x512xf32> to vector<16x512xbf16>
    %cst = arith.constant dense<0.000000e+00> : vector<14x512xf32>
    %4 = tpu.matmul %1, %3, %cst {dimension_numbers = #tpu.dot_dimension_numbers<[1], [0], [0], [1], [0, 0, 1, 1], [], []>} : vector<14x16xbf16>, vector<16x512xbf16>, vector<14x512xf32> -> vector<14x512xf32>
    %c0_3 = arith.constant 0 : index
    %c0_4 = arith.constant 0 : index
    %5 = vector.load %arg3[%c0_3, %c0_4] : memref<14x1xf32, #tpu.memory_space<vmem>>, vector<14x1xf32>
    %6 = vector.broadcast %5 : vector<14x1xf32> to vector<14x512xf32>
    %7 = arith.addf %4, %6 : vector<14x512xf32>
    %cst_5 = arith.constant 0.000000e+00 : f32
    %8 = vector.broadcast %cst_5 : f32 to vector<14x512xf32>
    %9 = arith.cmpf oge, %7, %8 : vector<14x512xf32>
    %cst_6 = arith.constant 2.000000e-01 : f32
    %10 = vector.broadcast %cst_6 : f32 to vector<14x512xf32>
    %11 = arith.mulf %10, %7 : vector<14x512xf32>
    %12 = arith.select %9, %7, %11 : vector<14x512xi1>, vector<14x512xf32>
    %c0_7 = arith.constant 0 : index
    %c0_8 = arith.constant 0 : index
    %13 = vector.load %arg4[%c0_7, %c0_8] : memref<14x512xf32, #tpu.memory_space<vmem>>, vector<14x512xf32>
    tpu.vector_store %arg4[%c0_7, %c0_8], %12 {strides = array<i32>} : memref<14x512xf32, #tpu.memory_space<vmem>>, vector<14x512xf32>,
    return
  }
  func.func @transform_0(%arg0: i32) -> (i32, i32) {
    %c0_i32 = arith.constant 0 : i32
    %c0_i32_0 = arith.constant 0 : i32
    return %c0_i32, %arg0 : i32, i32
  }
  func.func @transform_1(%arg0: i32) -> (i32, i32) {
    %c0_i32 = arith.constant 0 : i32
    %c0_i32_0 = arith.constant 0 : i32
    %c0_i32_1 = arith.constant 0 : i32
    return %c0_i32, %c0_i32_0 : i32, i32
  }
  func.func @transform_2(%arg0: i32) -> (i32, i32) {
    %c0_i32 = arith.constant 0 : i32
    %c0_i32_0 = arith.constant 0 : i32
    %c0_i32_1 = arith.constant 0 : i32
    return %c0_i32, %c0_i32_0 : i32, i32
  }
  func.func @transform_3(%arg0: i32) -> (i32, i32) {
    %c0_i32 = arith.constant 0 : i32
    %c0_i32_0 = arith.constant 0 : i32
    return %c0_i32, %arg0 : i32, i32
  }
}

module attributes {stable_mosaic.version = 11 : i64} {
  func.func @_convmm_kernel(%arg0: i32, %arg1: memref<6x512xf32, #tpu.memory_space<vmem>>, %arg2: memref<3x6xf32, #tpu.memory_space<vmem>>, %arg3: memref<3x1xf32, #tpu.memory_space<vmem>>, %arg4: memref<3x512xf32, #tpu.memory_space<vmem>>) attributes {dimension_semantics = [#tpu.dimension_semantics<parallel>], iteration_bounds = array<i64: 4>, scalar_prefetch = 0 : i64, scratch_operands = 0 : i64, tpu.core_type = #tpu.core_type<tc>, window_params = [{transform_indices = @transform_0, window_bounds = array<i64: 6, 512>}, {pipeline_mode = #tpu.pipeline_mode<synchronous>, transform_indices = @transform_1, window_bounds = array<i64: 3, 6>}, {pipeline_mode = #tpu.pipeline_mode<synchronous>, transform_indices = @transform_2, window_bounds = array<i64: 3, 1>}, {transform_indices = @transform_3, window_bounds = array<i64: 3, 512>}]} {
    %c0 = arith.constant 0 : index
    %c0_0 = arith.constant 0 : index
    %0 = vector.load %arg2[%c0, %c0_0] : memref<3x6xf32, #tpu.memory_space<vmem>>, vector<3x6xf32>
    %1 = arith.truncf %0 : vector<3x6xf32> to vector<3x6xbf16>
    %c0_1 = arith.constant 0 : index
    %c0_2 = arith.constant 0 : index
    %2 = vector.load %arg1[%c0_1, %c0_2] : memref<6x512xf32, #tpu.memory_space<vmem>>, vector<6x512xf32>
    %3 = arith.truncf %2 : vector<6x512xf32> to vector<6x512xbf16>
    %cst = arith.constant dense<0.000000e+00> : vector<3x512xf32>
    %4 = tpu.matmul %1, %3, %cst {dimension_numbers = #tpu.dot_dimension_numbers<[1], [0], [0], [1], [0, 0, 1, 1], [], []>} : vector<3x6xbf16>, vector<6x512xbf16>, vector<3x512xf32> -> vector<3x512xf32>
    %c0_3 = arith.constant 0 : index
    %c0_4 = arith.constant 0 : index
    %5 = vector.load %arg3[%c0_3, %c0_4] : memref<3x1xf32, #tpu.memory_space<vmem>>, vector<3x1xf32>
    %6 = vector.broadcast %5 : vector<3x1xf32> to vector<3x512xf32>
    %7 = arith.addf %4, %6 : vector<3x512xf32>
    %cst_5 = arith.constant 0.000000e+00 : f32
    %8 = vector.broadcast %cst_5 : f32 to vector<3x512xf32>
    %9 = arith.cmpf oge, %7, %8 : vector<3x512xf32>
    %cst_6 = arith.constant 2.000000e-01 : f32
    %10 = vector.broadcast %cst_6 : f32 to vector<3x512xf32>
    %11 = arith.mulf %10, %7 : vector<3x512xf32>
    %12 = arith.select %9, %7, %11 : vector<3x512xi1>, vector<3x512xf32>
    %c0_7 = arith.constant 0 : index
    %c0_8 = arith.constant 0 : index
    %13 = vector.load %arg4[%c0_7, %c0_8] : memref<3x512xf32, #tpu.memory_space<vmem>>, vector<3x512xf32>
    tpu.vector_store %arg4[%c0_7, %c0_8], %12 {strides = array<i32>} : memref<3x512xf32, #tpu.memory_space<vmem>>, vector<3x512xf32>,
    return
  }
  func.func @transform_0(%arg0: i32) -> (i32, i32) {
    %c0_i32 = arith.constant 0 : i32
    %c0_i32_0 = arith.constant 0 : i32
    return %c0_i32, %arg0 : i32, i32
  }
  func.func @transform_1(%arg0: i32) -> (i32, i32) {
    %c0_i32 = arith.constant 0 : i32
    %c0_i32_0 = arith.constant 0 : i32
    %c0_i32_1 = arith.constant 0 : i32
    return %c0_i32, %c0_i32_0 : i32, i32
  }
  func.func @transform_2(%arg0: i32) -> (i32, i32) {
    %c0_i32 = arith.constant 0 : i32
    %c0_i32_0 = arith.constant 0 : i32
    %c0_i32_1 = arith.constant 0 : i32
    return %c0_i32, %c0_i32_0 : i32, i32
  }
  func.func @transform_3(%arg0: i32) -> (i32, i32) {
    %c0_i32 = arith.constant 0 : i32
    %c0_i32_0 = arith.constant 0 : i32
    return %c0_i32, %arg0 : i32, i32
  }
}

module attributes {stable_mosaic.version = 11 : i64} {
  func.func @_convmm_kernel(%arg0: i32, %arg1: memref<9x512xf32, #tpu.memory_space<vmem>>, %arg2: memref<4x9xf32, #tpu.memory_space<vmem>>, %arg3: memref<4x1xf32, #tpu.memory_space<vmem>>, %arg4: memref<4x512xf32, #tpu.memory_space<vmem>>) attributes {dimension_semantics = [#tpu.dimension_semantics<parallel>], iteration_bounds = array<i64: 4>, scalar_prefetch = 0 : i64, scratch_operands = 0 : i64, tpu.core_type = #tpu.core_type<tc>, window_params = [{transform_indices = @transform_0, window_bounds = array<i64: 9, 512>}, {pipeline_mode = #tpu.pipeline_mode<synchronous>, transform_indices = @transform_1, window_bounds = array<i64: 4, 9>}, {pipeline_mode = #tpu.pipeline_mode<synchronous>, transform_indices = @transform_2, window_bounds = array<i64: 4, 1>}, {transform_indices = @transform_3, window_bounds = array<i64: 4, 512>}]} {
    %c0 = arith.constant 0 : index
    %c0_0 = arith.constant 0 : index
    %0 = vector.load %arg2[%c0, %c0_0] : memref<4x9xf32, #tpu.memory_space<vmem>>, vector<4x9xf32>
    %1 = arith.truncf %0 : vector<4x9xf32> to vector<4x9xbf16>
    %c0_1 = arith.constant 0 : index
    %c0_2 = arith.constant 0 : index
    %2 = vector.load %arg1[%c0_1, %c0_2] : memref<9x512xf32, #tpu.memory_space<vmem>>, vector<9x512xf32>
    %3 = arith.truncf %2 : vector<9x512xf32> to vector<9x512xbf16>
    %cst = arith.constant dense<0.000000e+00> : vector<4x512xf32>
    %4 = tpu.matmul %1, %3, %cst {dimension_numbers = #tpu.dot_dimension_numbers<[1], [0], [0], [1], [0, 0, 1, 1], [], []>} : vector<4x9xbf16>, vector<9x512xbf16>, vector<4x512xf32> -> vector<4x512xf32>
    %c0_3 = arith.constant 0 : index
    %c0_4 = arith.constant 0 : index
    %5 = vector.load %arg3[%c0_3, %c0_4] : memref<4x1xf32, #tpu.memory_space<vmem>>, vector<4x1xf32>
    %6 = vector.broadcast %5 : vector<4x1xf32> to vector<4x512xf32>
    %7 = arith.addf %4, %6 : vector<4x512xf32>
    %cst_5 = arith.constant 0.000000e+00 : f32
    %8 = vector.broadcast %cst_5 : f32 to vector<4x512xf32>
    %9 = arith.cmpf oge, %7, %8 : vector<4x512xf32>
    %cst_6 = arith.constant 2.000000e-01 : f32
    %10 = vector.broadcast %cst_6 : f32 to vector<4x512xf32>
    %11 = arith.mulf %10, %7 : vector<4x512xf32>
    %12 = arith.select %9, %7, %11 : vector<4x512xi1>, vector<4x512xf32>
    %c0_7 = arith.constant 0 : index
    %c0_8 = arith.constant 0 : index
    %13 = vector.load %arg4[%c0_7, %c0_8] : memref<4x512xf32, #tpu.memory_space<vmem>>, vector<4x512xf32>
    tpu.vector_store %arg4[%c0_7, %c0_8], %12 {strides = array<i32>} : memref<4x512xf32, #tpu.memory_space<vmem>>, vector<4x512xf32>,
    return
  }
  func.func @transform_0(%arg0: i32) -> (i32, i32) {
    %c0_i32 = arith.constant 0 : i32
    %c0_i32_0 = arith.constant 0 : i32
    return %c0_i32, %arg0 : i32, i32
  }
  func.func @transform_1(%arg0: i32) -> (i32, i32) {
    %c0_i32 = arith.constant 0 : i32
    %c0_i32_0 = arith.constant 0 : i32
    %c0_i32_1 = arith.constant 0 : i32
    return %c0_i32, %c0_i32_0 : i32, i32
  }
  func.func @transform_2(%arg0: i32) -> (i32, i32) {
    %c0_i32 = arith.constant 0 : i32
    %c0_i32_0 = arith.constant 0 : i32
    %c0_i32_1 = arith.constant 0 : i32
    return %c0_i32, %c0_i32_0 : i32, i32
  }
  func.func @transform_3(%arg0: i32) -> (i32, i32) {
    %c0_i32 = arith.constant 0 : i32
    %c0_i32_0 = arith.constant 0 : i32
    return %c0_i32, %arg0 : i32, i32
  }
}

module attributes {stable_mosaic.version = 11 : i64} {
  func.func @_convmm_kernel(%arg0: i32, %arg1: memref<36x512xf32, #tpu.memory_space<vmem>>, %arg2: memref<4x36xf32, #tpu.memory_space<vmem>>, %arg3: memref<4x1xf32, #tpu.memory_space<vmem>>, %arg4: memref<4x512xf32, #tpu.memory_space<vmem>>) attributes {dimension_semantics = [#tpu.dimension_semantics<parallel>], iteration_bounds = array<i64: 4>, scalar_prefetch = 0 : i64, scratch_operands = 0 : i64, tpu.core_type = #tpu.core_type<tc>, window_params = [{transform_indices = @transform_0, window_bounds = array<i64: 36, 512>}, {pipeline_mode = #tpu.pipeline_mode<synchronous>, transform_indices = @transform_1, window_bounds = array<i64: 4, 36>}, {pipeline_mode = #tpu.pipeline_mode<synchronous>, transform_indices = @transform_2, window_bounds = array<i64: 4, 1>}, {transform_indices = @transform_3, window_bounds = array<i64: 4, 512>}]} {
    %c0 = arith.constant 0 : index
    %c0_0 = arith.constant 0 : index
    %0 = vector.load %arg2[%c0, %c0_0] : memref<4x36xf32, #tpu.memory_space<vmem>>, vector<4x36xf32>
    %1 = arith.truncf %0 : vector<4x36xf32> to vector<4x36xbf16>
    %c0_1 = arith.constant 0 : index
    %c0_2 = arith.constant 0 : index
    %2 = vector.load %arg1[%c0_1, %c0_2] : memref<36x512xf32, #tpu.memory_space<vmem>>, vector<36x512xf32>
    %3 = arith.truncf %2 : vector<36x512xf32> to vector<36x512xbf16>
    %cst = arith.constant dense<0.000000e+00> : vector<4x512xf32>
    %4 = tpu.matmul %1, %3, %cst {dimension_numbers = #tpu.dot_dimension_numbers<[1], [0], [0], [1], [0, 0, 1, 1], [], []>} : vector<4x36xbf16>, vector<36x512xbf16>, vector<4x512xf32> -> vector<4x512xf32>
    %c0_3 = arith.constant 0 : index
    %c0_4 = arith.constant 0 : index
    %5 = vector.load %arg3[%c0_3, %c0_4] : memref<4x1xf32, #tpu.memory_space<vmem>>, vector<4x1xf32>
    %6 = vector.broadcast %5 : vector<4x1xf32> to vector<4x512xf32>
    %7 = arith.addf %4, %6 : vector<4x512xf32>
    %c0_5 = arith.constant 0 : index
    %c0_6 = arith.constant 0 : index
    %8 = vector.load %arg4[%c0_5, %c0_6] : memref<4x512xf32, #tpu.memory_space<vmem>>, vector<4x512xf32>
    tpu.vector_store %arg4[%c0_5, %c0_6], %7 {strides = array<i32>} : memref<4x512xf32, #tpu.memory_space<vmem>>, vector<4x512xf32>,
    return
  }
  func.func @transform_0(%arg0: i32) -> (i32, i32) {
    %c0_i32 = arith.constant 0 : i32
    %c0_i32_0 = arith.constant 0 : i32
    return %c0_i32, %arg0 : i32, i32
  }
  func.func @transform_1(%arg0: i32) -> (i32, i32) {
    %c0_i32 = arith.constant 0 : i32
    %c0_i32_0 = arith.constant 0 : i32
    %c0_i32_1 = arith.constant 0 : i32
    return %c0_i32, %c0_i32_0 : i32, i32
  }
  func.func @transform_2(%arg0: i32) -> (i32, i32) {
    %c0_i32 = arith.constant 0 : i32
    %c0_i32_0 = arith.constant 0 : i32
    %c0_i32_1 = arith.constant 0 : i32
    return %c0_i32, %c0_i32_0 : i32, i32
  }
  func.func @transform_3(%arg0: i32) -> (i32, i32) {
    %c0_i32 = arith.constant 0 : i32
    %c0_i32_0 = arith.constant 0 : i32
    return %c0_i32, %arg0 : i32, i32
  }
}

module attributes {stable_mosaic.version = 11 : i64} {
  func.func @_convmm_kernel(%arg0: i32, %arg1: memref<12x512xf32, #tpu.memory_space<vmem>>, %arg2: memref<4x12xf32, #tpu.memory_space<vmem>>, %arg3: memref<4x1xf32, #tpu.memory_space<vmem>>, %arg4: memref<4x512xf32, #tpu.memory_space<vmem>>) attributes {dimension_semantics = [#tpu.dimension_semantics<parallel>], iteration_bounds = array<i64: 4>, scalar_prefetch = 0 : i64, scratch_operands = 0 : i64, tpu.core_type = #tpu.core_type<tc>, window_params = [{transform_indices = @transform_0, window_bounds = array<i64: 12, 512>}, {pipeline_mode = #tpu.pipeline_mode<synchronous>, transform_indices = @transform_1, window_bounds = array<i64: 4, 12>}, {pipeline_mode = #tpu.pipeline_mode<synchronous>, transform_indices = @transform_2, window_bounds = array<i64: 4, 1>}, {transform_indices = @transform_3, window_bounds = array<i64: 4, 512>}]} {
    %c0 = arith.constant 0 : index
    %c0_0 = arith.constant 0 : index
    %0 = vector.load %arg2[%c0, %c0_0] : memref<4x12xf32, #tpu.memory_space<vmem>>, vector<4x12xf32>
    %1 = arith.truncf %0 : vector<4x12xf32> to vector<4x12xbf16>
    %c0_1 = arith.constant 0 : index
    %c0_2 = arith.constant 0 : index
    %2 = vector.load %arg1[%c0_1, %c0_2] : memref<12x512xf32, #tpu.memory_space<vmem>>, vector<12x512xf32>
    %3 = arith.truncf %2 : vector<12x512xf32> to vector<12x512xbf16>
    %cst = arith.constant dense<0.000000e+00> : vector<4x512xf32>
    %4 = tpu.matmul %1, %3, %cst {dimension_numbers = #tpu.dot_dimension_numbers<[1], [0], [0], [1], [0, 0, 1, 1], [], []>} : vector<4x12xbf16>, vector<12x512xbf16>, vector<4x512xf32> -> vector<4x512xf32>
    %c0_3 = arith.constant 0 : index
    %c0_4 = arith.constant 0 : index
    %5 = vector.load %arg3[%c0_3, %c0_4] : memref<4x1xf32, #tpu.memory_space<vmem>>, vector<4x1xf32>
    %6 = vector.broadcast %5 : vector<4x1xf32> to vector<4x512xf32>
    %7 = arith.addf %4, %6 : vector<4x512xf32>
    %cst_5 = arith.constant 0.000000e+00 : f32
    %8 = vector.broadcast %cst_5 : f32 to vector<4x512xf32>
    %9 = arith.cmpf oge, %7, %8 : vector<4x512xf32>
    %cst_6 = arith.constant 2.000000e-01 : f32
    %10 = vector.broadcast %cst_6 : f32 to vector<4x512xf32>
    %11 = arith.mulf %10, %7 : vector<4x512xf32>
    %12 = arith.select %9, %7, %11 : vector<4x512xi1>, vector<4x512xf32>
    %c0_7 = arith.constant 0 : index
    %c0_8 = arith.constant 0 : index
    %13 = vector.load %arg4[%c0_7, %c0_8] : memref<4x512xf32, #tpu.memory_space<vmem>>, vector<4x512xf32>
    tpu.vector_store %arg4[%c0_7, %c0_8], %12 {strides = array<i32>} : memref<4x512xf32, #tpu.memory_space<vmem>>, vector<4x512xf32>,
    return
  }
  func.func @transform_0(%arg0: i32) -> (i32, i32) {
    %c0_i32 = arith.constant 0 : i32
    %c0_i32_0 = arith.constant 0 : i32
    return %c0_i32, %arg0 : i32, i32
  }
  func.func @transform_1(%arg0: i32) -> (i32, i32) {
    %c0_i32 = arith.constant 0 : i32
    %c0_i32_0 = arith.constant 0 : i32
    %c0_i32_1 = arith.constant 0 : i32
    return %c0_i32, %c0_i32_0 : i32, i32
  }
  func.func @transform_2(%arg0: i32) -> (i32, i32) {
    %c0_i32 = arith.constant 0 : i32
    %c0_i32_0 = arith.constant 0 : i32
    %c0_i32_1 = arith.constant 0 : i32
    return %c0_i32, %c0_i32_0 : i32, i32
  }
  func.func @transform_3(%arg0: i32) -> (i32, i32) {
    %c0_i32 = arith.constant 0 : i32
    %c0_i32_0 = arith.constant 0 : i32
    return %c0_i32, %arg0 : i32, i32
  }
}

module attributes {stable_mosaic.version = 11 : i64} {
  func.func @_convmm_kernel(%arg0: i32, %arg1: memref<4x512xf32, #tpu.memory_space<vmem>>, %arg2: memref<4x512xf32, #tpu.memory_space<vmem>>, %arg3: memref<4x512xf32, #tpu.memory_space<vmem>>, %arg4: memref<4x512xf32, #tpu.memory_space<vmem>>, %arg5: memref<16x512xf32, #tpu.memory_space<vmem>>, %arg6: memref<16x4xf32, #tpu.memory_space<vmem>>, %arg7: memref<16x4xf32, #tpu.memory_space<vmem>>, %arg8: memref<16x4xf32, #tpu.memory_space<vmem>>, %arg9: memref<16x4xf32, #tpu.memory_space<vmem>>, %arg10: memref<16x16xf32, #tpu.memory_space<vmem>>, %arg11: memref<16x1xf32, #tpu.memory_space<vmem>>, %arg12: memref<16x512xf32, #tpu.memory_space<vmem>>) attributes {dimension_semantics = [#tpu.dimension_semantics<parallel>], iteration_bounds = array<i64: 4>, scalar_prefetch = 0 : i64, scratch_operands = 0 : i64, tpu.core_type = #tpu.core_type<tc>, window_params = [{transform_indices = @transform_0, window_bounds = array<i64: 4, 512>}, {transform_indices = @transform_1, window_bounds = array<i64: 4, 512>}, {transform_indices = @transform_2, window_bounds = array<i64: 4, 512>}, {transform_indices = @transform_3, window_bounds = array<i64: 4, 512>}, {transform_indices = @transform_4, window_bounds = array<i64: 16, 512>}, {pipeline_mode = #tpu.pipeline_mode<synchronous>, transform_indices = @transform_5, window_bounds = array<i64: 16, 4>}, {pipeline_mode = #tpu.pipeline_mode<synchronous>, transform_indices = @transform_6, window_bounds = array<i64: 16, 4>}, {pipeline_mode = #tpu.pipeline_mode<synchronous>, transform_indices = @transform_7, window_bounds = array<i64: 16, 4>}, {pipeline_mode = #tpu.pipeline_mode<synchronous>, transform_indices = @transform_8, window_bounds = array<i64: 16, 4>}, {pipeline_mode = #tpu.pipeline_mode<synchronous>, transform_indices = @transform_9, window_bounds = array<i64: 16, 16>}, {pipeline_mode = #tpu.pipeline_mode<synchronous>, transform_indices = @transform_10, window_bounds = array<i64: 16, 1>}, {transform_indices = @transform_11, window_bounds = array<i64: 16, 512>}]} {
    %c0 = arith.constant 0 : index
    %c0_0 = arith.constant 0 : index
    %0 = vector.load %arg6[%c0, %c0_0] : memref<16x4xf32, #tpu.memory_space<vmem>>, vector<16x4xf32>
    %1 = arith.truncf %0 : vector<16x4xf32> to vector<16x4xbf16>
    %c0_1 = arith.constant 0 : index
    %c0_2 = arith.constant 0 : index
    %2 = vector.load %arg1[%c0_1, %c0_2] : memref<4x512xf32, #tpu.memory_space<vmem>>, vector<4x512xf32>
    %3 = arith.truncf %2 : vector<4x512xf32> to vector<4x512xbf16>
    %cst = arith.constant dense<0.000000e+00> : vector<16x512xf32>
    %4 = tpu.matmul %1, %3, %cst {dimension_numbers = #tpu.dot_dimension_numbers<[1], [0], [0], [1], [0, 0, 1, 1], [], []>} : vector<16x4xbf16>, vector<4x512xbf16>, vector<16x512xf32> -> vector<16x512xf32>
    %c0_3 = arith.constant 0 : index
    %c0_4 = arith.constant 0 : index
    %5 = vector.load %arg7[%c0_3, %c0_4] : memref<16x4xf32, #tpu.memory_space<vmem>>, vector<16x4xf32>
    %6 = arith.truncf %5 : vector<16x4xf32> to vector<16x4xbf16>
    %c0_5 = arith.constant 0 : index
    %c0_6 = arith.constant 0 : index
    %7 = vector.load %arg2[%c0_5, %c0_6] : memref<4x512xf32, #tpu.memory_space<vmem>>, vector<4x512xf32>
    %8 = arith.truncf %7 : vector<4x512xf32> to vector<4x512xbf16>
    %cst_7 = arith.constant dense<0.000000e+00> : vector<16x512xf32>
    %9 = tpu.matmul %6, %8, %cst_7 {dimension_numbers = #tpu.dot_dimension_numbers<[1], [0], [0], [1], [0, 0, 1, 1], [], []>} : vector<16x4xbf16>, vector<4x512xbf16>, vector<16x512xf32> -> vector<16x512xf32>
    %10 = arith.addf %4, %9 : vector<16x512xf32>
    %c0_8 = arith.constant 0 : index
    %c0_9 = arith.constant 0 : index
    %11 = vector.load %arg8[%c0_8, %c0_9] : memref<16x4xf32, #tpu.memory_space<vmem>>, vector<16x4xf32>
    %12 = arith.truncf %11 : vector<16x4xf32> to vector<16x4xbf16>
    %c0_10 = arith.constant 0 : index
    %c0_11 = arith.constant 0 : index
    %13 = vector.load %arg3[%c0_10, %c0_11] : memref<4x512xf32, #tpu.memory_space<vmem>>, vector<4x512xf32>
    %14 = arith.truncf %13 : vector<4x512xf32> to vector<4x512xbf16>
    %cst_12 = arith.constant dense<0.000000e+00> : vector<16x512xf32>
    %15 = tpu.matmul %12, %14, %cst_12 {dimension_numbers = #tpu.dot_dimension_numbers<[1], [0], [0], [1], [0, 0, 1, 1], [], []>} : vector<16x4xbf16>, vector<4x512xbf16>, vector<16x512xf32> -> vector<16x512xf32>
    %16 = arith.addf %10, %15 : vector<16x512xf32>
    %c0_13 = arith.constant 0 : index
    %c0_14 = arith.constant 0 : index
    %17 = vector.load %arg9[%c0_13, %c0_14] : memref<16x4xf32, #tpu.memory_space<vmem>>, vector<16x4xf32>
    %18 = arith.truncf %17 : vector<16x4xf32> to vector<16x4xbf16>
    %c0_15 = arith.constant 0 : index
    %c0_16 = arith.constant 0 : index
    %19 = vector.load %arg4[%c0_15, %c0_16] : memref<4x512xf32, #tpu.memory_space<vmem>>, vector<4x512xf32>
    %20 = arith.truncf %19 : vector<4x512xf32> to vector<4x512xbf16>
    %cst_17 = arith.constant dense<0.000000e+00> : vector<16x512xf32>
    %21 = tpu.matmul %18, %20, %cst_17 {dimension_numbers = #tpu.dot_dimension_numbers<[1], [0], [0], [1], [0, 0, 1, 1], [], []>} : vector<16x4xbf16>, vector<4x512xbf16>, vector<16x512xf32> -> vector<16x512xf32>
    %22 = arith.addf %16, %21 : vector<16x512xf32>
    %c0_18 = arith.constant 0 : index
    %c0_19 = arith.constant 0 : index
    %23 = vector.load %arg10[%c0_18, %c0_19] : memref<16x16xf32, #tpu.memory_space<vmem>>, vector<16x16xf32>
    %24 = arith.truncf %23 : vector<16x16xf32> to vector<16x16xbf16>
    %c0_20 = arith.constant 0 : index
    %c0_21 = arith.constant 0 : index
    %25 = vector.load %arg5[%c0_20, %c0_21] : memref<16x512xf32, #tpu.memory_space<vmem>>, vector<16x512xf32>
    %26 = arith.truncf %25 : vector<16x512xf32> to vector<16x512xbf16>
    %cst_22 = arith.constant dense<0.000000e+00> : vector<16x512xf32>
    %27 = tpu.matmul %24, %26, %cst_22 {dimension_numbers = #tpu.dot_dimension_numbers<[1], [0], [0], [1], [0, 0, 1, 1], [], []>} : vector<16x16xbf16>, vector<16x512xbf16>, vector<16x512xf32> -> vector<16x512xf32>
    %28 = arith.addf %22, %27 : vector<16x512xf32>
    %c0_23 = arith.constant 0 : index
    %c0_24 = arith.constant 0 : index
    %29 = vector.load %arg11[%c0_23, %c0_24] : memref<16x1xf32, #tpu.memory_space<vmem>>, vector<16x1xf32>
    %30 = vector.broadcast %29 : vector<16x1xf32> to vector<16x512xf32>
    %31 = arith.addf %28, %30 : vector<16x512xf32>
    %cst_25 = arith.constant 0.000000e+00 : f32
    %32 = vector.broadcast %cst_25 : f32 to vector<16x512xf32>
    %33 = arith.cmpf oge, %31, %32 : vector<16x512xf32>
    %cst_26 = arith.constant 2.000000e-01 : f32
    %34 = vector.broadcast %cst_26 : f32 to vector<16x512xf32>
    %35 = arith.mulf %34, %31 : vector<16x512xf32>
    %36 = arith.select %33, %31, %35 : vector<16x512xi1>, vector<16x512xf32>
    %cst_27 = arith.constant 0.000000e+00 : f32
    %37 = vector.broadcast %cst_27 : f32 to vector<16x512xf32>
    %38 = arith.cmpf oge, %36, %37 : vector<16x512xf32>
    %cst_28 = arith.constant 2.000000e-01 : f32
    %39 = vector.broadcast %cst_28 : f32 to vector<16x512xf32>
    %40 = arith.mulf %39, %36 : vector<16x512xf32>
    %41 = arith.select %38, %36, %40 : vector<16x512xi1>, vector<16x512xf32>
    %c0_29 = arith.constant 0 : index
    %c0_30 = arith.constant 0 : index
    %42 = vector.load %arg12[%c0_29, %c0_30] : memref<16x512xf32, #tpu.memory_space<vmem>>, vector<16x512xf32>
    tpu.vector_store %arg12[%c0_29, %c0_30], %41 {strides = array<i32>} : memref<16x512xf32, #tpu.memory_space<vmem>>, vector<16x512xf32>,
    return
  }
  func.func @transform_0(%arg0: i32) -> (i32, i32) {
    %c0_i32 = arith.constant 0 : i32
    %c0_i32_0 = arith.constant 0 : i32
    return %c0_i32, %arg0 : i32, i32
  }
  func.func @transform_1(%arg0: i32) -> (i32, i32) {
    %c0_i32 = arith.constant 0 : i32
    %c0_i32_0 = arith.constant 0 : i32
    return %c0_i32, %arg0 : i32, i32
  }
  func.func @transform_2(%arg0: i32) -> (i32, i32) {
    %c0_i32 = arith.constant 0 : i32
    %c0_i32_0 = arith.constant 0 : i32
    return %c0_i32, %arg0 : i32, i32
  }
  func.func @transform_3(%arg0: i32) -> (i32, i32) {
    %c0_i32 = arith.constant 0 : i32
    %c0_i32_0 = arith.constant 0 : i32
    return %c0_i32, %arg0 : i32, i32
  }
  func.func @transform_4(%arg0: i32) -> (i32, i32) {
    %c0_i32 = arith.constant 0 : i32
    %c0_i32_0 = arith.constant 0 : i32
    return %c0_i32, %arg0 : i32, i32
  }
  func.func @transform_5(%arg0: i32) -> (i32, i32) {
    %c0_i32 = arith.constant 0 : i32
    %c0_i32_0 = arith.constant 0 : i32
    %c0_i32_1 = arith.constant 0 : i32
    return %c0_i32, %c0_i32_0 : i32, i32
  }
  func.func @transform_6(%arg0: i32) -> (i32, i32) {
    %c0_i32 = arith.constant 0 : i32
    %c0_i32_0 = arith.constant 0 : i32
    %c0_i32_1 = arith.constant 0 : i32
    return %c0_i32, %c0_i32_0 : i32, i32
  }
  func.func @transform_7(%arg0: i32) -> (i32, i32) {
    %c0_i32 = arith.constant 0 : i32
    %c0_i32_0 = arith.constant 0 : i32
    %c0_i32_1 = arith.constant 0 : i32
    return %c0_i32, %c0_i32_0 : i32, i32
  }
  func.func @transform_8(%arg0: i32) -> (i32, i32) {
    %c0_i32 = arith.constant 0 : i32
    %c0_i32_0 = arith.constant 0 : i32
    %c0_i32_1 = arith.constant 0 : i32
    return %c0_i32, %c0_i32_0 : i32, i32
  }
  func.func @transform_9(%arg0: i32) -> (i32, i32) {
    %c0_i32 = arith.constant 0 : i32
    %c0_i32_0 = arith.constant 0 : i32
    %c0_i32_1 = arith.constant 0 : i32
    return %c0_i32, %c0_i32_0 : i32, i32
  }
  func.func @transform_10(%arg0: i32) -> (i32, i32) {
    %c0_i32 = arith.constant 0 : i32
    %c0_i32_0 = arith.constant 0 : i32
    %c0_i32_1 = arith.constant 0 : i32
    return %c0_i32, %c0_i32_0 : i32, i32
  }
  func.func @transform_11(%arg0: i32) -> (i32, i32) {
    %c0_i32 = arith.constant 0 : i32
    %c0_i32_0 = arith.constant 0 : i32
    return %c0_i32, %arg0 : i32, i32
  }
}

</mosaic_0001>

<bundles_post_ra>
// kernel: subpixel_forward.21
= control target key start
LH: loop header
LB: loop body
LE: loop exit
PB: predicated region body
PF: predicated region fallthrough
CT: control target
= control target key end

     0   :  { %8 = vsyncpa [#allocation3], 0  ;;  %s190_s15 = smov [#allocation2]   ;;  %s191_s17 = smov 128   ;;  %s271_s0 = inlined_call_operand.vmem [shape: f32[16,512], index: 0, kind: input, shape index: {}]   ;;  %s272_s1 = inlined_call_operand.hbm [shape: f32[14,16], index: 1, kind: input, shape index: {}]   ;;  %s273_s2 = inlined_call_operand.vmem [shape: f32[14,1], index: 2, kind: input, shape index: {}]   ;;  %s274_s3 = inlined_call_operand.vmem [shape: f32[14,512], index: 3, kind: output, shape index: {}]  }
   0x1   :  { %s15_s14 = sshll.u32 %s272_s1, 4  ;;  %s17_s16 = sshll.u32 %s190_s15, 4  ;;  %s16_s14 = int_to_ptr.hbm [resolvable:$true] %s15_s14  ;;  %s18_s16 = int_to_ptr.vmem [resolvable:$true] %s17_s16 }
   0x2   :  { %s192_s18 = smov 8  }
   0x3   :  { %23 = dma.hbm_to_vmem [thread:$0]  %s16_s14, 256, %s18_s16, [#allocation3], %s191_s17, %s191_s17, %s192_s18  }
   0x4   :  { %188 = dma.done.wait [#allocation3], 256  }
   0x5   :  { %189 = vsyncadd [#allocation3], 4294967040  ;;  %v193_v0 = vmov 0   ;;  %v34_v1 = vld [vmem:[%s271_s0] sm:$0xff]  ;;  %v35_v3 = vld [vmem:[%s271_s0 + $0x8] sm:$0xff]  ;;  %vm58_vm0 = vcmask 130048  }
   0x6   :  { %163 = vset.pattern.permute.xlu0 %v193_v0  ;;  %v38_v2 = vld [vmem:[%s271_s0 + $0x20] sm:$0xff]  ;;  %v39_v5 = vld [vmem:[%s271_s0 + $0x28] sm:$0xff]  ;;  %v36_v6 = vld [vmem:[%s271_s0 + $0x10] sm:$0xff] }
   0x7   :  { %v42_v4 = vpack.c.bf16 %v38_v2, %v34_v1  ;;  %v40_v7 = vld [vmem:[%s271_s0 + $0x30] sm:$0xff]  ;;  %v43_v8 = vpack.c.bf16 %v39_v5, %v35_v3  ;;  %v37_v10 = vld [vmem:[%s271_s0 + $0x18] sm:$0xff]  ;;  %v31_v12 = vld [vmem:[#allocation2] sm:$0xff] }
   0x8   :  { %v44_v9 = vpack.c.bf16 %v40_v7, %v36_v6  ;;  %v41_v11 = vld [vmem:[%s271_s0 + $0x38] sm:$0xff]  ;;  %v32_v14 = vld [vmem:[#allocation2 + $0x8] sm:$0x3f]  ;;  %v46_v15 = vld [vmem:[%s273_s2] sm:$0xff] }
   0x9   :  { %69 = vmatpush.bf16.msra.mxu0 %v42_v4  ;;  %v45_v13 = vpack.c.bf16 %v41_v11, %v37_v10  ;;  %83 = vmatpush.bf16.msra.mxu1 %v43_v8  ;;  %v33_v16 = vpack.c.bf16 %v32_v14, %v31_v12  ;;  %v47_v17 = vld [vmem:[%s273_s2 + $0x8] sm:$0x3f] }
   0xa   :  { %97 = vmatpush.bf16.msra.mxu2 %v44_v9  ;;  %50 = vperm.xlu0 %163, %v46_v15  }
   0xb   :  { %111 = vmatpush.bf16.msra.mxu3 %v45_v13 }
   0xc   :  { %155 = vmatmul.msk.bf16.vlgmr.msra.gmra.mxu0 %vm58_vm0, %v33_v16  ;;  %156 = vmatmul.msk.bf16.vlgmr.msra.gmra.mxu1 %vm58_vm0, %v33_v16 }
   0xd   :  { %157 = vmatmul.msk.bf16.vlgmr.msra.gmra.mxu2 %vm58_vm0, %v33_v16 }
   0xe   :  { %158 = vmatmul.msk.bf16.vlgmr.msra.gmra.mxu3 %vm58_vm0, %v33_v16 }
  0x12   :  { %55 = vperm.xlu0 %163, %v47_v17  }
  0x7c   :  { %v51_v18 = vpop.permute.xlu0 %50 }
  0x84   :  { %v56_v27 = vpop.permute.xlu0 %55 }
  0x89   :  { %v71_v19 = vpop.f32.mrf.mxu0  ;;  %v85_v21 = vpop.f32.mrf.mxu1 }
  0x8a   :  { %v72_v20 = vadd.f32 %v71_v19, %v51_v18  ;;  %v86_v22 = vadd.f32 %v85_v21, %v51_v18 }
  0x8c   :  { %vm118_vm1 = vcmp.ge.f32.partialorder %v72_v20, 0.0  ;;  %v126_v23 = vmul.f32 0.2, %v72_v20  ;;  %vm119_vm2 = vcmp.ge.f32.partialorder %v86_v22, 0.0  ;;  %v127_v24 = vmul.f32 0.2, %v86_v22 }
  0x8e   :  { %v134_v25 = vsel %vm118_vm1, %v72_v20, %v126_v23  ;;  %v135_v26 = vsel %vm119_vm2, %v86_v22, %v127_v24 }
  0x8f   :  { %142 = vst [vmem:[%s274_s3] sm:$0xff] %v134_v25 }
  0x90   :  { %143 = vst [vmem:[%s274_s3 + $0x8] sm:$0xff] %v135_v26  ;;  %v99_v28 = vpop.f32.mrf.mxu2 }
  0x91   :  { %v100_v29 = vadd.f32 %v99_v28, %v51_v18  ;;  %v113_v30 = vpop.f32.mrf.mxu3  ;;  %v73_v31 = vpop.f32.mrf.mxu0 }
  0x92   :  { %v114_v32 = vadd.f32 %v113_v30, %v51_v18  ;;  %v74_v33 = vadd.f32 %v73_v31, %v56_v27  ;;  %v87_v34 = vpop.f32.mrf.mxu1 }
  0x93   :  { %vm120_vm3 = vcmp.ge.f32.partialorder %v100_v29, 0.0  ;;  %v128_v35 = vmul.f32 0.2, %v100_v29  ;;  %v88_v36 = vadd.f32 %v87_v34, %v56_v27 }
  0x94   :  { %vm121_vm4 = vcmp.ge.f32.partialorder %v114_v32, 0.0  ;;  %v129_v37 = vmul.f32 0.2, %v114_v32  ;;  %vm122_vm5 = vcmp.ge.f32.partialorder %v74_v33, 0.0  ;;  %v130_v38 = vmul.f32 0.2, %v74_v33 }
  0x95   :  { %v136_v39 = vsel %vm120_vm3, %v100_v29, %v128_v35  ;;  %vm123_vm6 = vcmp.ge.f32.partialorder %v88_v36, 0.0  ;;  %v131_v40 = vmul.f32 0.2, %v88_v36 }
  0x96   :  { %144 = vst [vmem:[%s274_s3 + $0x10] sm:$0xff] %v136_v39  ;;  %v137_v41 = vsel %vm121_vm4, %v114_v32, %v129_v37  ;;  %v138_v42 = vsel %vm122_vm5, %v74_v33, %v130_v38 }
  0x97   :  { %145 = vst [vmem:[%s274_s3 + $0x18] sm:$0xff] %v137_v41  ;;  %v139_v43 = vsel %vm123_vm6, %v88_v36, %v131_v40 }
  0x98   :  { %146 = vst [vmem:[%s274_s3 + $0x20] sm:$0x3f] %v138_v42  ;;  %v101_v44 = vpop.f32.mrf.mxu2 }
  0x99   :  { %147 = vst [vmem:[%s274_s3 + $0x28] sm:$0x3f] %v139_v43  ;;  %v102_v45 = vadd.f32 %v101_v44, %v56_v27  ;;  %v115_v46 = vpop.f32.mrf.mxu3 }
  0x9a   :  { %v116_v47 = vadd.f32 %v115_v46, %v56_v27 }
  0x9b   :  { %vm124_vm7 = vcmp.ge.f32.partialorder %v102_v45, 0.0  ;;  %v132_v48 = vmul.f32 0.2, %v102_v45 }
  0x9c   :  { %vm125_vm8 = vcmp.ge.f32.partialorder %v116_v47, 0.0  ;;  %v133_v49 = vmul.f32 0.2, %v116_v47 }
  0x9d   :  { %v140_v50 = vsel %vm124_vm7, %v102_v45, %v132_v48 }
  0x9e   :  { %148 = vst [vmem:[%s274_s3 + $0x30] sm:$0x3f] %v140_v50  ;;  %v141_v51 = vsel %vm125_vm8, %v116_v47, %v133_v49 }
  0x9f   :  { %149 = vst [vmem:[%s274_s3 + $0x38] sm:$0x3f] %v141_v51 }
  0xa0   :  { %154 = vsyncpa [#allocation3], 1 }

// kernel: subpixel_forward.27
= control target key start
LH: loop header
LB: loop body
LE: loop exit
PB: predicated region body
PF: predicated region fallthrough
CT: control target
= control target key end

     0   :  { %vm35_vm0 = vcmask 1042432   ;;  %v135_v3 = vmov 0   ;;  %vm31_vm1 = vcmask 48128   ;;  %vm118_vm4 = vcmask 1043456   ;;  %s186_s0 = inlined_call_operand.vmem [shape: f32[6,512], index: 0, kind: input, shape index: {}]   ;;  %s187_s1 = inlined_call_operand.vmem [shape: f32[3,6], index: 1, kind: input, shape index: {}]   ;;  %s188_s2 = inlined_call_operand.vmem [shape: f32[3,1], index: 2, kind: input, shape index: {}]   ;;  %s189_s3 = inlined_call_operand.vmem [shape: f32[3,512], index: 3, kind: output, shape index: {}]  }
   0x1   :  { %v17_v0 = vld [vmem:[%s186_s0] sm:$0x3f]  ;;  %v18_v1 = vld [vmem:[%s186_s0 + $0x8] sm:$0x3f]  ;;  %v19_v2 = vld [vmem:[%s186_s0 + $0x10] sm:$0x3f]  ;;  %134 = vset.pattern.permute.xlu0 %v135_v3 }
   0x2   :  { %v21_v4 = vpack.c.bf16 %v17_v0, %v17_v0  ;;  %v22_v5 = vpack.c.bf16 %v18_v1, %v18_v1  ;;  %v23_v6 = vpack.c.bf16 %v19_v2, %v19_v2  ;;  %v20_v7 = vld [vmem:[%s186_s0 + $0x18] sm:$0x3f]  ;;  %v15_v8 = vld [vmem:[%s187_s1] sm:$0x7] }
   0x3   :  { %v25_v9 = vld [vmem:[%s188_s2] sm:$0x7]  ;;  %v24_v10 = vpack.c.bf16 %v20_v7, %v20_v7  ;;  %v16_v14 = vpack.c.bf16 %v15_v8, %v15_v8 }
   0x4   :  { %28 = vperm.xlu0 %134, %v25_v9   ;;  %v37_v11 = vsel %vm35_vm0, %v21_v4, 0  ;;  %v40_v12 = vsel %vm35_vm0, %v22_v5, 0  ;;  %v43_v13 = vsel %vm35_vm0, %v23_v6, 0 }
   0x5   :  { %55 = vmatpush.bf16.msra.mxu0 %v37_v11  ;;  %68 = vmatpush.bf16.msra.mxu1 %v40_v12  ;;  %v46_v15 = vsel %vm35_vm0, %v24_v10, 0 }
   0x6   :  { %81 = vmatpush.bf16.msra.mxu2 %v43_v13  ;;  %94 = vmatpush.bf16.msra.mxu3 %v46_v15 }
   0x8   :  { %129 = vmatmul.msk.bf16.vlgmr.msra.gmra.mxu0 %vm31_vm1, %v16_v14  ;;  %130 = vmatmul.msk.bf16.vlgmr.msra.gmra.mxu1 %vm31_vm1, %v16_v14 }
   0x9   :  { %131 = vmatmul.msk.bf16.vlgmr.msra.gmra.mxu2 %vm31_vm1, %v16_v14  ;;  %132 = vmatmul.msk.bf16.vlgmr.msra.gmra.mxu3 %vm31_vm1, %v16_v14 }
  0x76   :  { %v29_v16 = vpop.permute.xlu0 %28 }
  0x85   :  { %v57_v17 = vpop.f32.mrf.mxu0  ;;  %v70_v18 = vpop.f32.mrf.mxu1 }
  0x86   :  { %v58_v19 = vadd.f32 %v57_v17, %v29_v16  ;;  %v71_v20 = vadd.f32 %v70_v18, %v29_v16 }
  0x88   :  { %vm100_vm2 = vcmp.ge.f32.partialorder %v58_v19, 0.0  ;;  %vm101_vm3 = vcmp.ge.f32.partialorder %v71_v20, 0.0  ;;  %v104_v21 = vmul.f32 0.2, %v58_v19  ;;  %v105_v22 = vmul.f32 0.2, %v71_v20 }
  0x8a   :  { %v108_v23 = vsel %vm100_vm2, %v58_v19, %v104_v21  ;;  %v109_v24 = vsel %vm101_vm3, %v71_v20, %v105_v22 }
  0x8b   :  { %v116_v25 = vrot.slane %v109_v24, 4 }
  0x8c   :  { %v83_v26 = vpop.f32.mrf.mxu2  ;;  %v96_v27 = vpop.f32.mrf.mxu3 }
  0x8d   :  { %v119_v28 = vsel %vm118_vm4, %v108_v23, %v116_v25  ;;  %v84_v29 = vadd.f32 %v83_v26, %v29_v16  ;;  %v97_v30 = vadd.f32 %v96_v27, %v29_v16  ;;  %v59_v31 = vpop.f32.mrf.mxu0  ;;  %v72_v32 = vpop.f32.mrf.mxu1 }
  0x8e   :  { %123 = vst [vmem:[%s189_s3] sm:$0x77] %v119_v28 }
  0x8f   :  { %v106_v33 = vmul.f32 0.2, %v84_v29  ;;  %vm103_vm5 = vcmp.ge.f32.partialorder %v97_v30, 0.0  ;;  %v107_v34 = vmul.f32 0.2, %v97_v30  ;;  %vm102_vm6 = vcmp.ge.f32.partialorder %v84_v29, 0.0 }
  0x91   :  { %v111_v35 = vsel %vm103_vm5, %v97_v30, %v107_v34  ;;  %v110_v37 = vsel %vm102_vm6, %v84_v29, %v106_v33 }
  0x92   :  { %v117_v36 = vrot.slane %v111_v35, 4 }
  0x94   :  { %v120_v38 = vsel %vm118_vm4, %v110_v37, %v117_v36  ;;  %v85_v39 = vpop.f32.mrf.mxu2  ;;  %v98_v40 = vpop.f32.mrf.mxu3 }
  0x95   :  { %124 = vst [vmem:[%s189_s3 + $0x8] sm:$0x77] %v120_v38 }

// kernel: subpixel_forward.28
= control target key start
LH: loop header
LB: loop body
LE: loop exit
PB: predicated region body
PF: predicated region fallthrough
CT: control target
= control target key end

     0   :  { %vm39_vm0 = vcmask 1043456   ;;  %vm40_vm1 = vcmask 1044480   ;;  %v142_v2 = vmov 65535   ;;  %v143_v10 = vmov 0   ;;  %s203_s0 = inlined_call_operand.vmem [shape: f32[9,512], index: 0, kind: input, shape index: {}]   ;;  %s204_s1 = inlined_call_operand.vmem [shape: f32[4,9], index: 1, kind: input, shape index: {}]   ;;  %s205_s2 = inlined_call_operand.vmem [shape: f32[4,1], index: 2, kind: input, shape index: {}]   ;;  %s206_s3 = inlined_call_operand.vmem [shape: f32[4,512], index: 3, kind: output, shape index: {}]  }
   0x1   :  { %v17_v0 = vld [vmem:[%s203_s0] sm:$0xff]  ;;  %v41_v3 = vsel %vm39_vm0, 4294967295, %v142_v2  ;;  %v18_v4 = vld [vmem:[%s203_s0 + $0x8] sm:$0xff]  ;;  %v19_v8 = vld [vmem:[%s203_s0 + $0x10] sm:$0xff]  ;;  %141 = vset.pattern.permute.xlu0 %v143_v10  ;;  %vm35_vm2 = vcmask 72704  }
   0x2   :  { %v21_v1 = vld [vmem:[%s203_s0 + $0x20] sm:$0x1]  ;;  %v42_v6 = vsel %vm40_vm1, %v41_v3, 0  ;;  %v22_v7 = vld [vmem:[%s203_s0 + $0x28] sm:$0x1]  ;;  %v20_v13 = vld [vmem:[%s203_s0 + $0x18] sm:$0xff] }
   0x3   :  { %v25_v5 = vpack.c.bf16 %v21_v1, %v17_v0  ;;  %v23_v9 = vld [vmem:[%s203_s0 + $0x30] sm:$0x1]  ;;  %v26_v11 = vpack.c.bf16 %v22_v7, %v18_v4  ;;  %v24_v14 = vld [vmem:[%s203_s0 + $0x38] sm:$0x1]  ;;  %v15_v15 = vld [vmem:[%s204_s1] sm:$0xf] }
   0x4   :  { %v27_v12 = vpack.c.bf16 %v23_v9, %v19_v8  ;;  %v28_v17 = vpack.c.bf16 %v24_v14, %v20_v13  ;;  %v29_v18 = vld [vmem:[%s205_s2] sm:$0xf]  ;;  %v16_v21 = vpack.c.bf16 %v15_v15, %v15_v15 }
   0x5   :  { %v44_v16 = vand.u32 %v42_v6, %v25_v5  ;;  %v47_v19 = vand.u32 %v42_v6, %v26_v11  ;;  %32 = vperm.xlu0 %141, %v29_v18  }
   0x6   :  { %v50_v20 = vand.u32 %v42_v6, %v27_v12  ;;  %v53_v22 = vand.u32 %v42_v6, %v28_v17 }
   0x7   :  { %62 = vmatpush.bf16.msra.mxu0 %v44_v16  ;;  %75 = vmatpush.bf16.msra.mxu1 %v47_v19 }
   0x8   :  { %88 = vmatpush.bf16.msra.mxu2 %v50_v20  ;;  %101 = vmatpush.bf16.msra.mxu3 %v53_v22 }
   0xa   :  { %135 = vmatmul.msk.bf16.vlgmr.msra.gmra.mxu0 %vm35_vm2, %v16_v21  ;;  %136 = vmatmul.msk.bf16.vlgmr.msra.gmra.mxu1 %vm35_vm2, %v16_v21 }
   0xb   :  { %137 = vmatmul.msk.bf16.vlgmr.msra.gmra.mxu2 %vm35_vm2, %v16_v21  ;;  %138 = vmatmul.msk.bf16.vlgmr.msra.gmra.mxu3 %vm35_vm2, %v16_v21 }
  0x77   :  { %v33_v23 = vpop.permute.xlu0 %32 }
  0x87   :  { %v64_v24 = vpop.f32.mrf.mxu0  ;;  %v77_v25 = vpop.f32.mrf.mxu1 }
  0x88   :  { %v65_v26 = vadd.f32 %v64_v24, %v33_v23  ;;  %v78_v27 = vadd.f32 %v77_v25, %v33_v23 }
  0x8a   :  { %vm107_vm3 = vcmp.ge.f32.partialorder %v65_v26, 0.0  ;;  %v111_v28 = vmul.f32 0.2, %v65_v26  ;;  %vm108_vm4 = vcmp.ge.f32.partialorder %v78_v27, 0.0  ;;  %v112_v29 = vmul.f32 0.2, %v78_v27 }
  0x8c   :  { %v115_v30 = vsel %vm107_vm3, %v65_v26, %v111_v28  ;;  %v116_v31 = vsel %vm108_vm4, %v78_v27, %v112_v29 }
  0x8d   :  { %v123_v32 = vrot.slane %v116_v31, 4 }
  0x8e   :  { %v90_v33 = vpop.f32.mrf.mxu2  ;;  %v103_v35 = vpop.f32.mrf.mxu3 }
  0x8f   :  { %v91_v34 = vadd.f32 %v90_v33, %v33_v23  ;;  %v66_v36 = vpop.f32.mrf.mxu0  ;;  %v125_v37 = vsel %vm39_vm0, %v115_v30, %v123_v32  ;;  %v104_v38 = vadd.f32 %v103_v35, %v33_v23  ;;  %v79_v39 = vpop.f32.mrf.mxu1 }
  0x90   :  { %129 = vst [vmem:[%s206_s3] sm:$0xff] %v125_v37 }
  0x91   :  { %v113_v40 = vmul.f32 0.2, %v91_v34  ;;  %vm110_vm5 = vcmp.ge.f32.partialorder %v104_v38, 0.0  ;;  %v114_v41 = vmul.f32 0.2, %v104_v38  ;;  %vm109_vm6 = vcmp.ge.f32.partialorder %v91_v34, 0.0 }
  0x93   :  { %v118_v42 = vsel %vm110_vm5, %v104_v38, %v114_v41  ;;  %v117_v44 = vsel %vm109_vm6, %v91_v34, %v113_v40 }
  0x94   :  { %v124_v43 = vrot.slane %v118_v42, 4 }
  0x96   :  { %v92_v45 = vpop.f32.mrf.mxu2  ;;  %v126_v46 = vsel %vm39_vm0, %v117_v44, %v124_v43  ;;  %v105_v47 = vpop.f32.mrf.mxu3 }
  0x97   :  { %130 = vst [vmem:[%s206_s3 + $0x8] sm:$0xff] %v126_v46 }

// kernel: subpixel_forward.29
= control target key start
LH: loop header
LB: loop body
LE: loop exit
PB: predicated region body
PF: predicated region fallthrough
CT: control target
= control target key end

     0   :  { %vm59_vm0 = vcmask 1041408   ;;  %v147_v3 = vmov 0   ;;  %vm55_vm1 = vcmask 293888   ;;  %vm130_vm2 = vcmask 1043456   ;;  %s244_s0 = inlined_call_operand.vmem [shape: f32[36,512], index: 0, kind: input, shape index: {}]   ;;  %s245_s2 = inlined_call_operand.vmem [shape: f32[4,1], index: 2, kind: input, shape index: {}]   ;;  %s246_s1 = inlined_call_operand.vmem [shape: f32[4,36], index: 1, kind: input, shape index: {}]   ;;  %s247_s3 = inlined_call_operand.vmem [shape: f32[4,512], index: 3, kind: output, shape index: {}]  }
   0x1   :  { %v33_v0 = vld [vmem:[%s244_s0 + $0x80] sm:$0xf]  ;;  %v34_v1 = vld [vmem:[%s244_s0 + $0x88] sm:$0xf]  ;;  %v35_v2 = vld [vmem:[%s244_s0 + $0x90] sm:$0xf]  ;;  %146 = vset.pattern.permute.xlu0 %v147_v3 }
   0x2   :  { %v45_v4 = vpack.c.bf16 %v33_v0, %v33_v0  ;;  %v46_v5 = vpack.c.bf16 %v34_v1, %v34_v1  ;;  %v47_v6 = vpack.c.bf16 %v35_v2, %v35_v2  ;;  %v36_v7 = vld [vmem:[%s244_s0 + $0x98] sm:$0xf]  ;;  %v25_v8 = vld [vmem:[%s244_s0 + $0x40] sm:$0xff]  ;;  %v26_v11 = vld [vmem:[%s244_s0 + $0x48] sm:$0xff] }
   0x3   :  { %v29_v9 = vld [vmem:[%s244_s0 + $0x60] sm:$0xff]  ;;  %v48_v10 = vpack.c.bf16 %v36_v7, %v36_v7  ;;  %v30_v12 = vld [vmem:[%s244_s0 + $0x68] sm:$0xff]  ;;  %v27_v13 = vld [vmem:[%s244_s0 + $0x50] sm:$0xff] }
   0x4   :  { %v61_v14 = vsel %vm59_vm0, %v45_v4, 0  ;;  %v64_v15 = vsel %vm59_vm0, %v46_v5, 0  ;;  %v67_v16 = vsel %vm59_vm0, %v47_v6, 0  ;;  %v31_v17 = vld [vmem:[%s244_s0 + $0x70] sm:$0xff]  ;;  %v28_v18 = vld [vmem:[%s244_s0 + $0x58] sm:$0xff]  ;;  %v41_v21 = vpack.c.bf16 %v29_v9, %v25_v8  ;;  %v17_v23 = vld [vmem:[%s244_s0] sm:$0xff] }
   0x5   :  { %v32_v19 = vld [vmem:[%s244_s0 + $0x78] sm:$0xff]  ;;  %77 = vmatpush.bf16.msra.mxu0 %v61_v14  ;;  %90 = vmatpush.bf16.msra.mxu1 %v64_v15  ;;  %v70_v20 = vsel %vm59_vm0, %v48_v10, 0  ;;  %v42_v22 = vpack.c.bf16 %v30_v12, %v26_v11  ;;  %v21_v24 = vld [vmem:[%s244_s0 + $0x20] sm:$0xff]  ;;  %v43_v25 = vpack.c.bf16 %v31_v17, %v27_v13  ;;  %v18_v27 = vld [vmem:[%s244_s0 + $0x8] sm:$0xff] }
   0x6   :  { %103 = vmatpush.bf16.msra.mxu2 %v67_v16  ;;  %116 = vmatpush.bf16.msra.mxu3 %v70_v20  ;;  %v44_v26 = vpack.c.bf16 %v32_v19, %v28_v18  ;;  %v22_v28 = vld [vmem:[%s244_s0 + $0x28] sm:$0xff]  ;;  %v19_v29 = vld [vmem:[%s244_s0 + $0x10] sm:$0xff]  ;;  %v20_v31 = vld [vmem:[%s244_s0 + $0x18] sm:$0xff]  ;;  %v37_v34 = vpack.c.bf16 %v21_v24, %v17_v23 }
   0x7   :  { %v23_v30 = vld [vmem:[%s244_s0 + $0x30] sm:$0xff]  ;;  %v24_v32 = vld [vmem:[%s244_s0 + $0x38] sm:$0xff]  ;;  %v49_v33 = vld [vmem:[%s245_s2] sm:$0xf]  ;;  %v38_v35 = vpack.c.bf16 %v22_v28, %v18_v27 }
   0x8   :  { %v15_v36 = vld [vmem:[%s246_s1] sm:$0xf]  ;;  %v39_v37 = vpack.c.bf16 %v23_v30, %v19_v29  ;;  %v40_v38 = vpack.c.bf16 %v24_v32, %v20_v31  ;;  %52 = vperm.xlu0 %146, %v49_v33  }
   0x9   :  { %78 = vmatpush.bf16.msra.mxu0 %v41_v21  ;;  %91 = vmatpush.bf16.msra.mxu1 %v42_v22  ;;  %v16_v39 = vpack.c.bf16 %v15_v36, %v15_v36 }
   0xa   :  { %104 = vmatpush.bf16.msra.mxu2 %v43_v25  ;;  %117 = vmatpush.bf16.msra.mxu3 %v44_v26 }
   0xd   :  { %79 = vmatpush.bf16.msra.mxu0 %v37_v34  ;;  %92 = vmatpush.bf16.msra.mxu1 %v38_v35 }
   0xe   :  { %105 = vmatpush.bf16.msra.mxu2 %v39_v37  ;;  %118 = vmatpush.bf16.msra.mxu3 %v40_v38 }
  0x10   :  { %141 = vmatmul.msk.bf16.vlgmr.msra.gmra.mxu0 %vm55_vm1, %v16_v39  ;;  %142 = vmatmul.msk.bf16.vlgmr.msra.gmra.mxu1 %vm55_vm1, %v16_v39 }
  0x11   :  { %143 = vmatmul.msk.bf16.vlgmr.msra.gmra.mxu2 %vm55_vm1, %v16_v39  ;;  %144 = vmatmul.msk.bf16.vlgmr.msra.gmra.mxu3 %vm55_vm1, %v16_v39 }
  0x7a   :  { %v53_v40 = vpop.permute.xlu0 %52 }
  0x8d   :  { %v81_v41 = vpop.f32.mrf.mxu0  ;;  %v94_v42 = vpop.f32.mrf.mxu1 }
  0x8e   :  { %v82_v43 = vadd.f32 %v81_v41, %v53_v40  ;;  %v95_v44 = vadd.f32 %v94_v42, %v53_v40 }
  0x90   :  { %v128_v45 = vrot.slane %v95_v44, 4 }
  0x92   :  { %v131_v46 = vsel %vm130_vm2, %v82_v43, %v128_v45 }
  0x93   :  { %135 = vst [vmem:[%s247_s3] sm:$0xff] %v131_v46 }
  0x94   :  { %v107_v47 = vpop.f32.mrf.mxu2  ;;  %v120_v48 = vpop.f32.mrf.mxu3 }
  0x95   :  { %v121_v49 = vadd.f32 %v120_v48, %v53_v40  ;;  %v83_v50 = vpop.f32.mrf.mxu0  ;;  %v96_v51 = vpop.f32.mrf.mxu1  ;;  %v108_v52 = vadd.f32 %v107_v47, %v53_v40 }
  0x97   :  { %v129_v53 = vrot.slane %v121_v49, 4 }
  0x99   :  { %v132_v54 = vsel %vm130_vm2, %v108_v52, %v129_v53 }
  0x9a   :  { %136 = vst [vmem:[%s247_s3 + $0x8] sm:$0xff] %v132_v54 }
  0x9c   :  { %v109_v55 = vpop.f32.mrf.mxu2  ;;  %v122_v56 = vpop.f32.mrf.mxu3 }

// kernel: subpixel_forward.25
= control target key start
LH: loop header
LB: loop body
LE: loop exit
PB: predicated region body
PF: predicated region fallthrough
CT: control target
= control target key end

     0   :  { %vm39_vm0 = vcmask 1045504   ;;  %v139_v3 = vmov 0   ;;  %vm35_vm1 = vcmask 97280   ;;  %vm122_vm4 = vcmask 1043456   ;;  %s202_s0 = inlined_call_operand.vmem [shape: f32[12,512], index: 0, kind: input, shape index: {}]   ;;  %s203_s1 = inlined_call_operand.vmem [shape: f32[4,12], index: 1, kind: input, shape index: {}]   ;;  %s204_s2 = inlined_call_operand.vmem [shape: f32[4,1], index: 2, kind: input, shape index: {}]   ;;  %s205_s3 = inlined_call_operand.vmem [shape: f32[4,512], index: 3, kind: output, shape index: {}]  }
   0x1   :  { %v17_v0 = vld [vmem:[%s202_s0] sm:$0xff]  ;;  %v18_v2 = vld [vmem:[%s202_s0 + $0x8] sm:$0xff]  ;;  %138 = vset.pattern.permute.xlu0 %v139_v3  ;;  %v19_v6 = vld [vmem:[%s202_s0 + $0x10] sm:$0xff] }
   0x2   :  { %v21_v1 = vld [vmem:[%s202_s0 + $0x20] sm:$0xf]  ;;  %v22_v5 = vld [vmem:[%s202_s0 + $0x28] sm:$0xf]  ;;  %v23_v7 = vld [vmem:[%s202_s0 + $0x30] sm:$0xf] }
   0x3   :  { %v25_v4 = vpack.c.bf16 %v21_v1, %v17_v0  ;;  %v26_v8 = vpack.c.bf16 %v22_v5, %v18_v2  ;;  %v27_v9 = vpack.c.bf16 %v23_v7, %v19_v6  ;;  %v20_v10 = vld [vmem:[%s202_s0 + $0x18] sm:$0xff]  ;;  %v15_v12 = vld [vmem:[%s203_s1] sm:$0xf] }
   0x4   :  { %v24_v11 = vld [vmem:[%s202_s0 + $0x38] sm:$0xf]  ;;  %v16_v15 = vpack.c.bf16 %v15_v12, %v15_v12  ;;  %v29_v16 = vld [vmem:[%s204_s2] sm:$0xf] }
   0x5   :  { %v41_v13 = vsel %vm39_vm0, %v25_v4, 0  ;;  %v28_v14 = vpack.c.bf16 %v24_v11, %v20_v10  ;;  %v44_v17 = vsel %vm39_vm0, %v26_v8, 0  ;;  %v47_v18 = vsel %vm39_vm0, %v27_v9, 0  ;;  %32 = vperm.xlu0 %138, %v29_v16  }
   0x6   :  { %59 = vmatpush.bf16.msra.mxu0 %v41_v13  ;;  %72 = vmatpush.bf16.msra.mxu1 %v44_v17 }
   0x7   :  { %85 = vmatpush.bf16.msra.mxu2 %v47_v18  ;;  %v50_v19 = vsel %vm39_vm0, %v28_v14, 0 }
   0x8   :  { %98 = vmatpush.bf16.msra.mxu3 %v50_v19 }
   0x9   :  { %133 = vmatmul.msk.bf16.vlgmr.msra.gmra.mxu0 %vm35_vm1, %v16_v15  ;;  %134 = vmatmul.msk.bf16.vlgmr.msra.gmra.mxu1 %vm35_vm1, %v16_v15 }
   0xa   :  { %135 = vmatmul.msk.bf16.vlgmr.msra.gmra.mxu2 %vm35_vm1, %v16_v15 }
   0xb   :  { %136 = vmatmul.msk.bf16.vlgmr.msra.gmra.mxu3 %vm35_vm1, %v16_v15 }
  0x77   :  { %v33_v20 = vpop.permute.xlu0 %32 }
  0x86   :  { %v61_v21 = vpop.f32.mrf.mxu0  ;;  %v74_v22 = vpop.f32.mrf.mxu1 }
  0x87   :  { %v62_v23 = vadd.f32 %v61_v21, %v33_v20  ;;  %v75_v24 = vadd.f32 %v74_v22, %v33_v20 }
  0x89   :  { %vm104_vm2 = vcmp.ge.f32.partialorder %v62_v23, 0.0  ;;  %v108_v25 = vmul.f32 0.2, %v62_v23  ;;  %vm105_vm3 = vcmp.ge.f32.partialorder %v75_v24, 0.0  ;;  %v109_v26 = vmul.f32 0.2, %v75_v24 }
  0x8b   :  { %v112_v27 = vsel %vm104_vm2, %v62_v23, %v108_v25  ;;  %v113_v28 = vsel %vm105_vm3, %v75_v24, %v109_v26 }
  0x8c   :  { %v120_v29 = vrot.slane %v113_v28, 4 }
  0x8d   :  { %v87_v30 = vpop.f32.mrf.mxu2 }
  0x8e   :  { %v88_v31 = vadd.f32 %v87_v30, %v33_v20  ;;  %v100_v32 = vpop.f32.mrf.mxu3  ;;  %v63_v33 = vpop.f32.mrf.mxu0  ;;  %v123_v34 = vsel %vm122_vm4, %v112_v27, %v120_v29 }
  0x8f   :  { %v101_v35 = vadd.f32 %v100_v32, %v33_v20  ;;  %v76_v36 = vpop.f32.mrf.mxu1  ;;  %127 = vst [vmem:[%s205_s3] sm:$0xff] %v123_v34 }
  0x90   :  { %v110_v37 = vmul.f32 0.2, %v88_v31  ;;  %vm106_vm6 = vcmp.ge.f32.partialorder %v88_v31, 0.0 }
  0x91   :  { %vm107_vm5 = vcmp.ge.f32.partialorder %v101_v35, 0.0  ;;  %v111_v38 = vmul.f32 0.2, %v101_v35 }
  0x92   :  { %v114_v41 = vsel %vm106_vm6, %v88_v31, %v110_v37 }
  0x93   :  { %v115_v39 = vsel %vm107_vm5, %v101_v35, %v111_v38 }
  0x94   :  { %v121_v40 = vrot.slane %v115_v39, 4 }
  0x95   :  { %v89_v42 = vpop.f32.mrf.mxu2 }
  0x96   :  { %v124_v43 = vsel %vm122_vm4, %v114_v41, %v121_v40  ;;  %v102_v44 = vpop.f32.mrf.mxu3 }
  0x97   :  { %128 = vst [vmem:[%s205_s3 + $0x8] sm:$0xff] %v124_v43 }

// kernel: subpixel_forward.30
= control target key start
LH: loop header
LB: loop body
LE: loop exit
PB: predicated region body
PF: predicated region fallthrough
CT: control target
= control target key end

     0   :  { %vm87_vm0 = vcmask 1041408   ;;  %vm83_vm1 = vcmask 31744   ;;  %vm444_vm2 = vcmask 130048   ;;  %s827_s0 = inlined_call_operand.vmem [shape: f32[4,512], index: 0, kind: input, shape index: {}]   ;;  %s828_s1 = inlined_call_operand.vmem [shape: f32[4,512], index: 1, kind: input, shape index: {}]   ;;  %s829_s2 = inlined_call_operand.vmem [shape: f32[4,512], index: 2, kind: input, shape index: {}]   ;;  %s830_s6 = inlined_call_operand.vmem [shape: f32[16,4], index: 6, kind: input, shape index: {}]   ;;  %s831_s3 = inlined_call_operand.vmem [shape: f32[4,512], index: 3, kind: input, shape index: {}]   ;;  %s832_s5 = inlined_call_operand.vmem [shape: f32[16,4], index: 5, kind: input, shape index: {}]   ;;  %s833_s7 = inlined_call_operand.vmem [shape: f32[16,4], index: 7, kind: input, shape index: {}]   ;;  %s834_s4 = inlined_call_operand.vmem [shape: f32[16,512], index: 4, kind: input, shape index: {}]   ;;  %s835_s10 = inlined_call_operand.vmem [shape: f32[16,1], index: 10, kind: input, shape index: {}]   ;;  %s836_s8 = inlined_call_operand.vmem [shape: f32[16,4], index: 8, kind: input, shape index: {}]   ;;  %s837_s9 = inlined_call_operand.vmem [shape: f32[16,16], index: 9, kind: input, shape index: {}]   ;;  %s838_s11 = inlined_call_operand.vmem [shape: f32[16,512], index: 11, kind: output, shape index: {}]  }
   0x1   :  { %v42_v0 = vld [vmem:[%s827_s0] sm:$0xff]  ;;  %v43_v1 = vld [vmem:[%s827_s0 + $0x8] sm:$0xff] }
   0x2   :  { %46 = vst [vmem:[#allocation1] ss:$2 sm:$0xff] %v42_v0  ;;  %v64_v2 = vld [vmem:[%s828_s1] sm:$0xff]  ;;  %v65_v3 = vld [vmem:[%s828_s1 + $0x8] sm:$0xff] }
   0x3   :  { %48 = vst [vmem:[#allocation1 + $0x10] ss:$2 sm:$0xff] %v43_v1  ;;  %v230_v10 = vld [vmem:[%s829_s2] sm:$0xff]  ;;  %v231_v11 = vld [vmem:[%s829_s2 + $0x8] sm:$0xff] }
   0x4   :  { %v61_v12 = vld [vmem:[%s830_s6] sm:$0xff]  ;;  %v62_v13 = vld [vmem:[%s830_s6 + $0x8] sm:$0xff] }
   0x5   :  { %v63_v24 = vpack.c.bf16 %v62_v13, %v61_v12  ;;  %v331_v33 = vld [vmem:[%s831_s3] sm:$0xff]  ;;  %v332_v34 = vld [vmem:[%s831_s3 + $0x8] sm:$0xff] }
   0x6   :  { %v39_v47 = vld [vmem:[%s832_s5] sm:$0xff]  ;;  %v40_v48 = vld [vmem:[%s832_s5 + $0x8] sm:$0xff] }
   0x7   :  { %v41_v55 = vpack.c.bf16 %v40_v48, %v39_v47  ;;  %v227_v62 = vld [vmem:[%s833_s7] sm:$0xff]  ;;  %v228_v63 = vld [vmem:[%s833_s7 + $0x8] sm:$0xff] }
   0x8   :  { %v432_v0 = vld [vmem:[%s834_s4] sm:$0xff] }
   0x9   :  { %v49_v4 = vld.sshfl [vmem:[#allocation1] sm:$0xff pattern:$0x75316420]  ;;  %v50_v5 = vld.sshfl [vmem:[#allocation1 + $0x8] sm:$0xff pattern:$0x75316420] }
   0xa   :  { %68 = vst [vmem:[#allocation1] ss:$2 sm:$0xff] %v64_v2  ;;  %v51_v6 = vld.sshfl [vmem:[#allocation1 + $0x10] sm:$0xff pattern:$0x75316420]  ;;  %v57_v8 = vpack.c.bf16 %v49_v4, %v49_v4  ;;  %v58_v9 = vpack.c.bf16 %v50_v5, %v50_v5  ;;  %v436_v1 = vld [vmem:[%s834_s4 + $0x20] sm:$0xff]  ;;  %v229_v5 = vpack.c.bf16 %v228_v63, %v227_v62 }
   0xb   :  { %v52_v7 = vld.sshfl [vmem:[#allocation1 + $0x18] sm:$0xff pattern:$0x75316420]  ;;  %v59_v16 = vpack.c.bf16 %v51_v6, %v51_v6  ;;  %v433_v2 = vld [vmem:[%s834_s4 + $0x8] sm:$0xff]  ;;  %v434_v4 = vld [vmem:[%s834_s4 + $0x10] sm:$0xff] }
   0xc   :  { %70 = vst [vmem:[#allocation1 + $0x10] ss:$2 sm:$0xff] %v65_v3  ;;  %v60_v17 = vpack.c.bf16 %v52_v7, %v52_v7  ;;  %v160_v20 = vsel %vm87_vm0, %v57_v8, 0  ;;  %v163_v21 = vsel %vm87_vm0, %v58_v9, 0  ;;  %v437_v3 = vld [vmem:[%s834_s4 + $0x28] sm:$0xff]  ;;  %v438_v6 = vld [vmem:[%s834_s4 + $0x30] sm:$0xff]  ;;  %v440_v9 = vpack.c.bf16 %v436_v1, %v432_v0 }
   0xd   :  { %v166_v31 = vsel %vm87_vm0, %v59_v16, 0  ;;  %v435_v7 = vld [vmem:[%s834_s4 + $0x18] sm:$0xff]  ;;  %v512_v13 = vld [vmem:[%s835_s10] sm:$0xff]  ;;  %v329_v16 = vld [vmem:[%s836_s8 + $0x8] sm:$0xff] }
   0xe   :  { %v169_v32 = vsel %vm87_vm0, %v60_v17, 0  ;;  %v439_v8 = vld [vmem:[%s834_s4 + $0x38] sm:$0xff]  ;;  %v513_v17 = vld [vmem:[%s835_s10 + $0x8] sm:$0xff] }
   0xf   :  { %v443_v12 = vpack.c.bf16 %v439_v8, %v435_v7 }
  0x11   :  { %v71_v14 = vld.sshfl [vmem:[#allocation1] sm:$0xff pattern:$0x75316420]  ;;  %v72_v15 = vld.sshfl [vmem:[#allocation1 + $0x8] sm:$0xff pattern:$0x75316420] }
  0x12   :  { %v79_v18 = vpack.c.bf16 %v71_v14, %v71_v14  ;;  %v80_v19 = vpack.c.bf16 %v72_v15, %v72_v15  ;;  %234 = vst [vmem:[#allocation1] ss:$2 sm:$0xff] %v230_v10  ;;  %v441_v10 = vpack.c.bf16 %v437_v3, %v433_v2  ;;  %v614_v14 = vmov 0   ;;  %v328_v15 = vld [vmem:[%s836_s8] sm:$0xff] }
  0x13   :  { %v73_v22 = vld.sshfl [vmem:[#allocation1 + $0x10] sm:$0xff pattern:$0x75316420]  ;;  %v74_v23 = vld.sshfl [vmem:[#allocation1 + $0x18] sm:$0xff pattern:$0x75316420]  ;;  %613 = vset.pattern.permute.xlu0 %v614_v14 }
  0x14   :  { %v89_v25 = vsel %vm87_vm0, %v79_v18, 0  ;;  %v92_v26 = vsel %vm87_vm0, %v80_v19, 0  ;;  %v81_v27 = vpack.c.bf16 %v73_v22, %v73_v22  ;;  %v82_v28 = vpack.c.bf16 %v74_v23, %v74_v23  ;;  %236 = vst [vmem:[#allocation1 + $0x10] ss:$2 sm:$0xff] %v231_v11  ;;  %516 = vperm.xlu0 %613, %v512_v13   ;;  %v429_v19 = vld [vmem:[%s837_s9] sm:$0xff] }
  0x15   :  { %107 = vmatpush.bf16.msra.mxu0 %v89_v25  ;;  %121 = vmatpush.bf16.msra.mxu1 %v92_v26  ;;  %v442_v11 = vpack.c.bf16 %v438_v6, %v434_v4  ;;  %v330_v18 = vpack.c.bf16 %v329_v16, %v328_v15 }
  0x16   :  { %v95_v29 = vsel %vm87_vm0, %v81_v27, 0  ;;  %v98_v30 = vsel %vm87_vm0, %v82_v28, 0 }
  0x17   :  { %135 = vmatpush.bf16.msra.mxu2 %v95_v29  ;;  %149 = vmatpush.bf16.msra.mxu3 %v98_v30 }
  0x18   :  { %592 = vmatmul.msk.bf16.vlgmr.msra.gmra.mxu0 %vm83_vm1, %v63_v24  ;;  %593 = vmatmul.msk.bf16.vlgmr.msra.gmra.mxu1 %vm83_vm1, %v63_v24 }
  0x19   :  { %178 = vmatpush.bf16.msrb.mxu0 %v160_v20  ;;  %192 = vmatpush.bf16.msrb.mxu1 %v163_v21  ;;  %v237_v35 = vld.sshfl [vmem:[#allocation1] sm:$0xff pattern:$0x75316420]  ;;  %v238_v36 = vld.sshfl [vmem:[#allocation1 + $0x8] sm:$0xff pattern:$0x75316420] }
  0x1a   :  { %594 = vmatmul.msk.bf16.vlgmr.msra.gmra.mxu2 %vm83_vm1, %v63_v24  ;;  %595 = vmatmul.msk.bf16.vlgmr.msra.gmra.mxu3 %vm83_vm1, %v63_v24  ;;  %v245_v37 = vpack.c.bf16 %v237_v35, %v237_v35  ;;  %v246_v38 = vpack.c.bf16 %v238_v36, %v238_v36  ;;  %335 = vst [vmem:[#allocation1] ss:$2 sm:$0xff] %v331_v33  ;;  %v430_v20 = vld [vmem:[%s837_s9 + $0x8] sm:$0xff] }
  0x1b   :  { %206 = vmatpush.bf16.msrb.mxu2 %v166_v31  ;;  %220 = vmatpush.bf16.msrb.mxu3 %v169_v32  ;;  %v239_v39 = vld.sshfl [vmem:[#allocation1 + $0x10] sm:$0xff pattern:$0x75316420]  ;;  %v240_v40 = vld.sshfl [vmem:[#allocation1 + $0x18] sm:$0xff pattern:$0x75316420]  ;;  %v431_v21 = vpack.c.bf16 %v430_v20, %v429_v19 }
  0x1c   :  { %v247_v41 = vpack.c.bf16 %v239_v39, %v239_v39  ;;  %v248_v42 = vpack.c.bf16 %v240_v40, %v240_v40  ;;  %337 = vst [vmem:[#allocation1 + $0x10] ss:$2 sm:$0xff] %v332_v34  ;;  %v253_v43 = vsel %vm87_vm0, %v245_v37, 0  ;;  %v256_v44 = vsel %vm87_vm0, %v246_v38, 0  ;;  %521 = vperm.xlu0 %613, %v513_v17  }
  0x1d   :  { %271 = vmatpush.bf16.msra.mxu0 %v253_v43  ;;  %285 = vmatpush.bf16.msra.mxu1 %v256_v44 }
  0x1e   :  { %v259_v45 = vsel %vm87_vm0, %v247_v41, 0  ;;  %v262_v46 = vsel %vm87_vm0, %v248_v42, 0 }
  0x1f   :  { %299 = vmatpush.bf16.msra.mxu2 %v259_v45  ;;  %313 = vmatpush.bf16.msra.mxu3 %v262_v46 }
  0x21   :  { %v338_v49 = vld.sshfl [vmem:[#allocation1] sm:$0xff pattern:$0x75316420]  ;;  %v339_v50 = vld.sshfl [vmem:[#allocation1 + $0x8] sm:$0xff pattern:$0x75316420] }
  0x22   :  { %v346_v51 = vpack.c.bf16 %v338_v49, %v338_v49  ;;  %v347_v52 = vpack.c.bf16 %v339_v50, %v339_v50 }
  0x23   :  { %v340_v53 = vld.sshfl [vmem:[#allocation1 + $0x10] sm:$0xff pattern:$0x75316420]  ;;  %v341_v54 = vld.sshfl [vmem:[#allocation1 + $0x18] sm:$0xff pattern:$0x75316420] }
  0x24   :  { %v348_v56 = vpack.c.bf16 %v340_v53, %v340_v53  ;;  %v349_v57 = vpack.c.bf16 %v341_v54, %v341_v54  ;;  %v354_v58 = vsel %vm87_vm0, %v346_v51, 0  ;;  %v357_v59 = vsel %vm87_vm0, %v347_v52, 0 }
  0x26   :  { %v360_v60 = vsel %vm87_vm0, %v348_v56, 0  ;;  %v363_v61 = vsel %vm87_vm0, %v349_v57, 0 }
  0x28   :  { %596 = vmatmul.msk.bf16.vlgmr.msrb.gmra.mxu0 %vm83_vm1, %v41_v55  ;;  %597 = vmatmul.msk.bf16.vlgmr.msrb.gmra.mxu1 %vm83_vm1, %v41_v55 }
  0x29   :  { %372 = vmatpush.bf16.msrb.mxu0 %v354_v58  ;;  %386 = vmatpush.bf16.msrb.mxu1 %v357_v59 }
  0x2a   :  { %598 = vmatmul.msk.bf16.vlgmr.msrb.gmra.mxu2 %vm83_vm1, %v41_v55  ;;  %599 = vmatmul.msk.bf16.vlgmr.msrb.gmra.mxu3 %vm83_vm1, %v41_v55 }
  0x2b   :  { %400 = vmatpush.bf16.msrb.mxu2 %v360_v60  ;;  %414 = vmatpush.bf16.msrb.mxu3 %v363_v61 }
  0x38   :  { %600 = vmatmul.msk.bf16.vlgmr.msra.gmra.mxu0 %vm83_vm1, %v229_v5  ;;  %601 = vmatmul.msk.bf16.vlgmr.msra.gmra.mxu1 %vm83_vm1, %v229_v5 }
  0x39   :  { %455 = vmatpush.bf16.msra.mxu0 %v440_v9  ;;  %469 = vmatpush.bf16.msra.mxu1 %v441_v10 }
  0x3a   :  { %602 = vmatmul.msk.bf16.vlgmr.msra.gmra.mxu2 %vm83_vm1, %v229_v5  ;;  %603 = vmatmul.msk.bf16.vlgmr.msra.gmra.mxu3 %vm83_vm1, %v229_v5 }
  0x3b   :  { %483 = vmatpush.bf16.msra.mxu2 %v442_v11  ;;  %497 = vmatpush.bf16.msra.mxu3 %v443_v12 }
  0x48   :  { %604 = vmatmul.msk.bf16.vlgmr.msrb.gmra.mxu0 %vm83_vm1, %v330_v18  ;;  %605 = vmatmul.msk.bf16.vlgmr.msrb.gmra.mxu1 %vm83_vm1, %v330_v18 }
  0x4a   :  { %606 = vmatmul.msk.bf16.vlgmr.msrb.gmra.mxu2 %vm83_vm1, %v330_v18  ;;  %607 = vmatmul.msk.bf16.vlgmr.msrb.gmra.mxu3 %vm83_vm1, %v330_v18 }
  0x58   :  { %608 = vmatmul.msk.bf16.vlgmr.msra.gmra.mxu0 %vm444_vm2, %v431_v21  ;;  %609 = vmatmul.msk.bf16.vlgmr.msra.gmra.mxu1 %vm444_vm2, %v431_v21 }
  0x5a   :  { %610 = vmatmul.msk.bf16.vlgmr.msra.gmra.mxu2 %vm444_vm2, %v431_v21  ;;  %611 = vmatmul.msk.bf16.vlgmr.msra.gmra.mxu3 %vm444_vm2, %v431_v21 }
  0x86   :  { %v517_v56 = vpop.permute.xlu0 %516 }
  0x95   :  { %v109_v22 = vpop.f32.mrf.mxu0  ;;  %v123_v23 = vpop.f32.mrf.mxu1 }
  0x9d   :  { %v137_v24 = vpop.f32.mrf.mxu2  ;;  %v151_v25 = vpop.f32.mrf.mxu3 }
  0x9e   :  { %v111_v26 = vpop.f32.mrf.mxu0  ;;  %v125_v27 = vpop.f32.mrf.mxu1 }
  0xa5   :  { %v791_v28 = vpop.f32.mrf.mxu2  ;;  %v793_v29 = vpop.f32.mrf.mxu3 }
  0xa6   :  { %v180_v30 = vpop.f32.mrf.mxu0  ;;  %v194_v31 = vpop.f32.mrf.mxu1 }
  0xa7   :  { %v181_v52 = vadd.f32 %v180_v30, %v109_v22  ;;  %v195_v53 = vadd.f32 %v194_v31, %v123_v23 }
  0xad   :  { %v208_v32 = vpop.f32.mrf.mxu2  ;;  %v222_v33 = vpop.f32.mrf.mxu3 }
  0xae   :  { %v182_v34 = vpop.f32.mrf.mxu0  ;;  %v196_v35 = vpop.f32.mrf.mxu1  ;;  %v209_v1 = vadd.f32 %v208_v32, %v137_v24  ;;  %v223_v2 = vadd.f32 %v222_v33, %v151_v25 }
  0xaf   :  { %v183_v3 = vadd.f32 %v182_v34, %v111_v26  ;;  %v197_v4 = vadd.f32 %v196_v35, %v125_v27  ;;  %v522_v35 = vpop.permute.xlu0 %521 }
  0xb5   :  { %v210_v36 = vpop.f32.mrf.mxu2  ;;  %v224_v37 = vpop.f32.mrf.mxu3 }
  0xb6   :  { %v273_v38 = vpop.f32.mrf.mxu0  ;;  %v287_v39 = vpop.f32.mrf.mxu1  ;;  %v211_v31 = vadd.f32 %v210_v36, %v791_v28  ;;  %v225_v32 = vadd.f32 %v224_v37, %v793_v29 }
  0xb7   :  { %v320_v54 = vadd.f32 %v273_v38, %v181_v52  ;;  %v321_v55 = vadd.f32 %v287_v39, %v195_v53 }
  0xbd   :  { %v301_v40 = vpop.f32.mrf.mxu2  ;;  %v315_v41 = vpop.f32.mrf.mxu3 }
  0xbe   :  { %v275_v42 = vpop.f32.mrf.mxu0  ;;  %v289_v43 = vpop.f32.mrf.mxu1  ;;  %v322_v7 = vadd.f32 %v301_v40, %v209_v1  ;;  %v323_v8 = vadd.f32 %v315_v41, %v223_v2 }
  0xbf   :  { %v324_v9 = vadd.f32 %v275_v42, %v183_v3  ;;  %v325_v10 = vadd.f32 %v289_v43, %v197_v4 }
  0xc5   :  { %v795_v44 = vpop.f32.mrf.mxu2  ;;  %v797_v45 = vpop.f32.mrf.mxu3 }
  0xc6   :  { %v374_v46 = vpop.f32.mrf.mxu0  ;;  %v388_v47 = vpop.f32.mrf.mxu1  ;;  %v326_v42 = vadd.f32 %v795_v44, %v211_v31  ;;  %v327_v43 = vadd.f32 %v797_v45, %v225_v32 }
  0xc7   :  { %v421_v57 = vadd.f32 %v374_v46, %v320_v54  ;;  %v422_v58 = vadd.f32 %v388_v47, %v321_v55 }
  0xcd   :  { %v402_v48 = vpop.f32.mrf.mxu2  ;;  %v416_v49 = vpop.f32.mrf.mxu3 }
  0xce   :  { %v376_v50 = vpop.f32.mrf.mxu0  ;;  %v390_v51 = vpop.f32.mrf.mxu1  ;;  %v423_v13 = vadd.f32 %v402_v48, %v322_v7  ;;  %v424_v14 = vadd.f32 %v416_v49, %v323_v8 }
  0xcf   :  { %v425_v15 = vadd.f32 %v376_v50, %v324_v9  ;;  %v426_v16 = vadd.f32 %v390_v51, %v325_v10 }
  0xd5   :  { %v404_v59 = vpop.f32.mrf.mxu2  ;;  %v418_v60 = vpop.f32.mrf.mxu3 }
  0xd6   :  { %v457_v61 = vpop.f32.mrf.mxu0  ;;  %v471_v62 = vpop.f32.mrf.mxu1  ;;  %v427_v46 = vadd.f32 %v404_v59, %v326_v42  ;;  %v428_v47 = vadd.f32 %v418_v60, %v327_v43 }
  0xd7   :  { %v504_v63 = vadd.f32 %v457_v61, %v421_v57  ;;  %v505_v0 = vadd.f32 %v471_v62, %v422_v58 }
  0xd9   :  { %v524_v5 = vadd.f32 %v517_v56, %v504_v63  ;;  %v525_v6 = vadd.f32 %v517_v56, %v505_v0 }
  0xdb   :  { %vm532_vm3 = vcmp.ge.f32.partialorder %v524_v5, 0.0  ;;  %v540_v11 = vmul.f32 0.2, %v524_v5  ;;  %vm533_vm4 = vcmp.ge.f32.partialorder %v525_v6, 0.0  ;;  %v541_v12 = vmul.f32 0.2, %v525_v6 }
  0xdd   :  { %v548_v17 = vsel %vm532_vm3, %v524_v5, %v540_v11  ;;  %v549_v18 = vsel %vm533_vm4, %v525_v6, %v541_v12  ;;  %v485_v19 = vpop.f32.mrf.mxu2  ;;  %v499_v20 = vpop.f32.mrf.mxu3 }
  0xde   :  { %vm556_vm5 = vcmp.ge.f32.partialorder %v548_v17, 0.0  ;;  %v564_v21 = vmul.f32 0.2, %v548_v17  ;;  %vm557_vm6 = vcmp.ge.f32.partialorder %v549_v18, 0.0  ;;  %v565_v22 = vmul.f32 0.2, %v549_v18  ;;  %v459_v23 = vpop.f32.mrf.mxu0  ;;  %v473_v24 = vpop.f32.mrf.mxu1 }
  0xdf   :  { %v506_v25 = vadd.f32 %v485_v19, %v423_v13  ;;  %v507_v26 = vadd.f32 %v499_v20, %v424_v14  ;;  %v508_v27 = vadd.f32 %v459_v23, %v425_v15  ;;  %v509_v30 = vadd.f32 %v473_v24, %v426_v16 }
  0xe0   :  { %v572_v33 = vsel %vm556_vm5, %v548_v17, %v564_v21  ;;  %v573_v34 = vsel %vm557_vm6, %v549_v18, %v565_v22 }
  0xe1   :  { %580 = vst [vmem:[%s838_s11] sm:$0xff] %v572_v33  ;;  %v526_v38 = vadd.f32 %v517_v56, %v506_v25  ;;  %v527_v39 = vadd.f32 %v517_v56, %v507_v26  ;;  %v528_v40 = vadd.f32 %v522_v35, %v508_v27  ;;  %v529_v41 = vadd.f32 %v522_v35, %v509_v30 }
  0xe2   :  { %581 = vst [vmem:[%s838_s11 + $0x8] sm:$0xff] %v573_v34 }
  0xe3   :  { %vm534_vm7 = vcmp.ge.f32.partialorder %v526_v38, 0.0  ;;  %v542_v28 = vmul.f32 0.2, %v526_v38  ;;  %vm535_vm8 = vcmp.ge.f32.partialorder %v527_v39, 0.0  ;;  %v543_v29 = vmul.f32 0.2, %v527_v39 }
  0xe4   :  { %vm536_vm9 = vcmp.ge.f32.partialorder %v528_v40, 0.0  ;;  %v544_v36 = vmul.f32 0.2, %v528_v40  ;;  %vm537_vm10 = vcmp.ge.f32.partialorder %v529_v41, 0.0  ;;  %v545_v37 = vmul.f32 0.2, %v529_v41 }
  0xe5   :  { %v550_v48 = vsel %vm534_vm7, %v526_v38, %v542_v28  ;;  %v551_v49 = vsel %vm535_vm8, %v527_v39, %v543_v29  ;;  %v487_v50 = vpop.f32.mrf.mxu2  ;;  %v501_v44 = vpop.f32.mrf.mxu3 }
  0xe6   :  { %vm558_vm11 = vcmp.ge.f32.partialorder %v550_v48, 0.0  ;;  %v566_v45 = vmul.f32 0.2, %v550_v48  ;;  %vm559_vm12 = vcmp.ge.f32.partialorder %v551_v49, 0.0  ;;  %v567_v51 = vmul.f32 0.2, %v551_v49 }
  0xe7   :  { %v552_v52 = vsel %vm536_vm9, %v528_v40, %v544_v36  ;;  %v553_v53 = vsel %vm537_vm10, %v529_v41, %v545_v37  ;;  %v510_v54 = vadd.f32 %v487_v50, %v427_v46  ;;  %v511_v55 = vadd.f32 %v501_v44, %v428_v47 }
  0xe8   :  { %v574_v56 = vsel %vm558_vm11, %v550_v48, %v566_v45  ;;  %v575_v57 = vsel %vm559_vm12, %v551_v49, %v567_v51  ;;  %vm560_vm13 = vcmp.ge.f32.partialorder %v552_v52, 0.0  ;;  %v568_v58 = vmul.f32 0.2, %v552_v52 }
  0xe9   :  { %582 = vst [vmem:[%s838_s11 + $0x10] sm:$0xff] %v574_v56  ;;  %vm561_vm14 = vcmp.ge.f32.partialorder %v553_v53, 0.0  ;;  %v569_v59 = vmul.f32 0.2, %v553_v53  ;;  %v530_v60 = vadd.f32 %v522_v35, %v510_v54  ;;  %v531_v61 = vadd.f32 %v522_v35, %v511_v55 }
  0xea   :  { %583 = vst [vmem:[%s838_s11 + $0x18] sm:$0xff] %v575_v57  ;;  %v576_v62 = vsel %vm560_vm13, %v552_v52, %v568_v58 }
  0xeb   :  { %584 = vst [vmem:[%s838_s11 + $0x20] sm:$0xff] %v576_v62  ;;  %v577_v63 = vsel %vm561_vm14, %v553_v53, %v569_v59  ;;  %vm538_vm15 = vcmp.ge.f32.partialorder %v530_v60, 0.0  ;;  %v546_v0 = vmul.f32 0.2, %v530_v60  ;;  %vm539_vm0 = vcmp.ge.f32.partialorder %v531_v61, 0.0 }
  0xec   :  { %585 = vst [vmem:[%s838_s11 + $0x28] sm:$0xff] %v577_v63  ;;  %v547_v1 = vmul.f32 0.2, %v531_v61 }
  0xed   :  { %v554_v2 = vsel %vm538_vm15, %v530_v60, %v546_v0 }
  0xee   :  { %vm562_vm1 = vcmp.ge.f32.partialorder %v554_v2, 0.0  ;;  %v570_v3 = vmul.f32 0.2, %v554_v2  ;;  %v555_v4 = vsel %vm539_vm0, %v531_v61, %v547_v1 }
  0xef   :  { %vm563_vm2 = vcmp.ge.f32.partialorder %v555_v4, 0.0  ;;  %v571_v5 = vmul.f32 0.2, %v555_v4 }
  0xf0   :  { %v578_v6 = vsel %vm562_vm1, %v554_v2, %v570_v3 }
  0xf1   :  { %586 = vst [vmem:[%s838_s11 + $0x30] sm:$0xff] %v578_v6  ;;  %v579_v7 = vsel %vm563_vm2, %v555_v4, %v571_v5 }
  0xf2   :  { %587 = vst [vmem:[%s838_s11 + $0x38] sm:$0xff] %v579_v7 }

// kernel: subpixel_forward.31
= control target key start
LH: loop header
LB: loop body
LE: loop exit
PB: predicated region body
PF: predicated region fallthrough
CT: control target
= control target key end

     0   :  { %v496_v15 = vmov 0   ;;  %vm195_vm0 = vcmask 130048   ;;  %s989_s0 = inlined_call_operand.vmem [shape: f32[144,512], index: 0, kind: input, shape index: {}]   ;;  %s990_s1 = inlined_call_operand.vmem [shape: f32[64,144], index: 1, kind: input, shape index: {}]   ;;  %s991_s2 = inlined_call_operand.vmem [shape: f32[64,1], index: 2, kind: input, shape index: {}]   ;;  %s992_s3 = inlined_call_operand.vmem [shape: f32[64,512], index: 3, kind: output, shape index: {}]  }
   0x1   :  { %v95_v0 = vld [vmem:[%s989_s0 + $0x1c0] sm:$0xff]  ;;  %v96_v2 = vld [vmem:[%s989_s0 + $0x1c8] sm:$0xff]  ;;  %493 = vset.pattern.permute.xlu0 %v496_v15  ;;  %494 = vset.pattern.permute.xlu1 %v496_v15  ;;  %v18_v21 = vld [vmem:[%s990_s1 + $0x18] sm:$0xff] }
   0x2   :  { %v99_v1 = vld [vmem:[%s989_s0 + $0x1e0] sm:$0xff]  ;;  %v100_v4 = vld [vmem:[%s989_s0 + $0x1e8] sm:$0xff]  ;;  %495 = vset.pattern.permute.xlu2 %v496_v15  ;;  %v105_v38 = vld [vmem:[%s989_s0 + $0x210] sm:$0xff] }
   0x3   :  { %v139_v3 = vpack.c.bf16 %v99_v1, %v95_v0  ;;  %v87_v5 = vld [vmem:[%s989_s0 + $0x180] sm:$0xff]  ;;  %v140_v7 = vpack.c.bf16 %v100_v4, %v96_v2  ;;  %v88_v8 = vld [vmem:[%s989_s0 + $0x188] sm:$0xff]  ;;  %v109_v39 = vld [vmem:[%s989_s0 + $0x230] sm:$0xff] }
   0x4   :  { %v91_v6 = vld [vmem:[%s989_s0 + $0x1a0] sm:$0xff]  ;;  %v92_v9 = vld [vmem:[%s989_s0 + $0x1a8] sm:$0xff]  ;;  %v145_v42 = vpack.c.bf16 %v109_v39, %v105_v38  ;;  %v97_v43 = vld [vmem:[%s989_s0 + $0x1d0] sm:$0xff] }
   0x5   :  { %208 = vmatpush.bf16.msra.mxu0 %v139_v3  ;;  %v135_v10 = vpack.c.bf16 %v91_v6, %v87_v5  ;;  %266 = vmatpush.bf16.msra.mxu2 %v140_v7  ;;  %v136_v11 = vpack.c.bf16 %v92_v9, %v88_v8  ;;  %v79_v12 = vld [vmem:[%s989_s0 + $0x140] sm:$0xff]  ;;  %v80_v14 = vld [vmem:[%s989_s0 + $0x148] sm:$0xff]  ;;  %v101_v44 = vld [vmem:[%s989_s0 + $0x1f0] sm:$0xff] }
   0x6   :  { %v83_v13 = vld [vmem:[%s989_s0 + $0x160] sm:$0xff]  ;;  %v84_v16 = vld [vmem:[%s989_s0 + $0x168] sm:$0xff]  ;;  %v141_v48 = vpack.c.bf16 %v101_v44, %v97_v43  ;;  %v89_v51 = vld [vmem:[%s989_s0 + $0x190] sm:$0xff] }
   0x7   :  { %v104_v17 = vld [vmem:[%s989_s0 + $0x208] sm:$0xff]  ;;  %v131_v22 = vpack.c.bf16 %v83_v13, %v79_v12  ;;  %v103_v24 = vld [vmem:[%s989_s0 + $0x200] sm:$0xff]  ;;  %v132_v26 = vpack.c.bf16 %v84_v16, %v80_v14  ;;  %v93_v52 = vld [vmem:[%s989_s0 + $0x1b0] sm:$0xff] }
   0x8   :  { %v108_v18 = vld [vmem:[%s989_s0 + $0x228] sm:$0xff]  ;;  %v107_v25 = vld [vmem:[%s989_s0 + $0x220] sm:$0xff]  ;;  %v137_v53 = vpack.c.bf16 %v93_v52, %v89_v51  ;;  %v22_v59 = vld [vmem:[%s990_s1 + $0x38] sm:$0xff] }
   0x9   :  { %v144_v19 = vpack.c.bf16 %v108_v18, %v104_v17  ;;  %v16_v20 = vld [vmem:[%s990_s1 + $0x8] sm:$0xff]  ;;  %209 = vmatpush.bf16.msra.mxu0 %v135_v10  ;;  %267 = vmatpush.bf16.msra.mxu2 %v136_v11  ;;  %v71_v27 = vld [vmem:[%s989_s0 + $0x100] sm:$0xff]  ;;  %v143_v29 = vpack.c.bf16 %v107_v25, %v103_v24  ;;  %v81_v60 = vld [vmem:[%s989_s0 + $0x150] sm:$0xff] }
   0xa   :  { %v565_v23 = vpack.c.bf16 %v18_v21, %v16_v20  ;;  %v75_v28 = vld [vmem:[%s989_s0 + $0x120] sm:$0xff]  ;;  %v72_v30 = vld [vmem:[%s989_s0 + $0x108] sm:$0xff]  ;;  %v85_v61 = vld [vmem:[%s989_s0 + $0x170] sm:$0xff] }
   0xb   :  { %302 = vmatpush.bf16.msra.mxu3 %v144_v19  ;;  %v76_v31 = vld [vmem:[%s989_s0 + $0x128] sm:$0xff]  ;;  %244 = vmatpush.bf16.msra.mxu1 %v143_v29  ;;  %v127_v32 = vpack.c.bf16 %v75_v28, %v71_v27  ;;  %v63_v34 = vld [vmem:[%s989_s0 + $0xc0] sm:$0xff]  ;;  %v149_v0 = vld [vmem:[%s991_s2 + $0x10] sm:$0xff]  ;;  %v133_v2 = vpack.c.bf16 %v85_v61, %v81_v60 }
   0xc   :  { %v128_v33 = vpack.c.bf16 %v76_v31, %v72_v30  ;;  %v67_v35 = vld [vmem:[%s989_s0 + $0xe0] sm:$0xff]  ;;  %v64_v36 = vld [vmem:[%s989_s0 + $0xc8] sm:$0xff]  ;;  %167 = vperm.xlu1 %494, %v149_v0   ;;  %v73_v5 = vld [vmem:[%s989_s0 + $0x110] sm:$0xff] }
   0xd   :  { %210 = vmatpush.bf16.msra.mxu0 %v131_v22  ;;  %268 = vmatpush.bf16.msra.mxu2 %v132_v26  ;;  %v68_v37 = vld [vmem:[%s989_s0 + $0xe8] sm:$0xff]  ;;  %v123_v40 = vpack.c.bf16 %v67_v35, %v63_v34  ;;  %v55_v41 = vld [vmem:[%s989_s0 + $0x80] sm:$0xff]  ;;  %v77_v6 = vld [vmem:[%s989_s0 + $0x130] sm:$0xff] }
   0xe   :  { %480 = vmatmul.msk.bf16.vlgmr.msra.gmra.mxu3 %vm195_vm0, %v565_v23  ;;  %476 = vmatmul.msk.bf16.vlgmr.msra.gmra.mxu1 %vm195_vm0, %v565_v23  ;;  %v124_v45 = vpack.c.bf16 %v68_v37, %v64_v36  ;;  %v59_v46 = vld [vmem:[%s989_s0 + $0xa0] sm:$0xff]  ;;  %v56_v47 = vld [vmem:[%s989_s0 + $0x88] sm:$0xff]  ;;  %v98_v12 = vld [vmem:[%s989_s0 + $0x1d8] sm:$0xff]  ;;  %v129_v16 = vpack.c.bf16 %v77_v6, %v73_v5 }
   0xf   :  { %v147_v49 = vld [vmem:[%s991_s2] sm:$0xff]  ;;  %v60_v50 = vld [vmem:[%s989_s0 + $0xa8] sm:$0xff]  ;;  %360 = vmatpush.bf16.msrb.mxu3 %v145_v42  ;;  %324 = vmatpush.bf16.msrb.mxu1 %v141_v48  ;;  %v119_v54 = vpack.c.bf16 %v59_v46, %v55_v41  ;;  %v102_v13 = vld [vmem:[%s989_s0 + $0x1f8] sm:$0xff] }
  0x10   :  { %157 = vperm.xlu0 %493, %v147_v49   ;;  %v47_v55 = vld [vmem:[%s989_s0 + $0x40] sm:$0xff]  ;;  %v20_v57 = vld [vmem:[%s990_s1 + $0x28] sm:$0xff]  ;;  %v120_v58 = vpack.c.bf16 %v60_v50, %v56_v47  ;;  %v106_v14 = vld [vmem:[%s989_s0 + $0x218] sm:$0xff]  ;;  %v142_v21 = vpack.c.bf16 %v102_v13, %v98_v12 }
  0x11   :  { %211 = vmatpush.bf16.msra.mxu0 %v127_v32  ;;  %269 = vmatpush.bf16.msra.mxu2 %v128_v33  ;;  %v51_v56 = vld [vmem:[%s989_s0 + $0x60] sm:$0xff]  ;;  %v48_v62 = vld [vmem:[%s989_s0 + $0x48] sm:$0xff]  ;;  %v664_v4 = vpack.c.bf16 %v22_v59, %v20_v57  ;;  %v110_v15 = vld [vmem:[%s989_s0 + $0x238] sm:$0xff] }
  0x12   :  { %v52_v63 = vld [vmem:[%s989_s0 + $0x68] sm:$0xff]  ;;  %v115_v3 = vpack.c.bf16 %v51_v56, %v47_v55  ;;  %v39_v8 = vld [vmem:[%s989_s0] sm:$0xff]  ;;  %v17_v19 = vld [vmem:[%s990_s1 + $0x10] sm:$0xff]  ;;  %v146_v22 = vpack.c.bf16 %v110_v15, %v106_v14 }
  0x13   :  { %325 = vmatpush.bf16.msrb.mxu1 %v137_v53  ;;  %v148_v1 = vld [vmem:[%s991_s2 + $0x8] sm:$0xff]  ;;  %v116_v7 = vpack.c.bf16 %v52_v63, %v48_v62  ;;  %v43_v9 = vld [vmem:[%s989_s0 + $0x20] sm:$0xff]  ;;  %v90_v24 = vld [vmem:[%s989_s0 + $0x198] sm:$0xff] }
  0x14   :  { %v40_v10 = vld [vmem:[%s989_s0 + $0x8] sm:$0xff]  ;;  %v111_v17 = vpack.c.bf16 %v43_v9, %v39_v8  ;;  %v15_v18 = vld [vmem:[%s990_s1] sm:$0xff]  ;;  %v94_v25 = vld [vmem:[%s989_s0 + $0x1b8] sm:$0xff] }
  0x15   :  { %212 = vmatpush.bf16.msra.mxu0 %v123_v40  ;;  %270 = vmatpush.bf16.msra.mxu2 %v124_v45  ;;  %v44_v11 = vld [vmem:[%s989_s0 + $0x28] sm:$0xff]  ;;  %v712_v26 = vpack.c.bf16 %v17_v19, %v15_v18  ;;  %v138_v27 = vpack.c.bf16 %v94_v25, %v90_v24  ;;  %v82_v28 = vld [vmem:[%s989_s0 + $0x158] sm:$0xff]  ;;  %v65_v31 = vld [vmem:[%s989_s0 + $0xd0] sm:$0xff] }
  0x16   :  { %v112_v20 = vpack.c.bf16 %v44_v11, %v40_v10  ;;  %v86_v29 = vld [vmem:[%s989_s0 + $0x178] sm:$0xff]  ;;  %v69_v32 = vld [vmem:[%s989_s0 + $0xf0] sm:$0xff]  ;;  %v24_v33 = vld [vmem:[%s990_s1 + $0x48] sm:$0xff] }
  0x17   :  { %326 = vmatpush.bf16.msrb.mxu1 %v133_v2  ;;  %v150_v30 = vld [vmem:[%s991_s2 + $0x18] sm:$0xff]  ;;  %v134_v35 = vpack.c.bf16 %v86_v29, %v82_v28  ;;  %v125_v36 = vpack.c.bf16 %v69_v32, %v65_v31  ;;  %v57_v37 = vld [vmem:[%s989_s0 + $0x90] sm:$0xff]  ;;  %v19_v49 = vld [vmem:[%s990_s1 + $0x20] sm:$0xff] }
  0x18   :  { %162 = vperm.xlu0 %493, %v148_v1   ;;  %v26_v34 = vld [vmem:[%s990_s1 + $0x58] sm:$0xff]  ;;  %172 = vperm.xlu1 %494, %v150_v30   ;;  %v61_v40 = vld [vmem:[%s989_s0 + $0xb0] sm:$0xff]  ;;  %v28_v61 = vld [vmem:[%s990_s1 + $0x68] sm:$0xff] }
  0x19   :  { %213 = vmatpush.bf16.msra.mxu0 %v119_v54  ;;  %271 = vmatpush.bf16.msra.mxu2 %v120_v58  ;;  %v74_v38 = vld [vmem:[%s989_s0 + $0x118] sm:$0xff]  ;;  %v121_v41 = vpack.c.bf16 %v61_v40, %v57_v37  ;;  %v749_v42 = vpack.c.bf16 %v26_v34, %v24_v33  ;;  %v49_v43 = vld [vmem:[%s989_s0 + $0x50] sm:$0xff]  ;;  %v23_v6 = vld [vmem:[%s990_s1 + $0x40] sm:$0xff] }
  0x1a   :  { %v78_v39 = vld [vmem:[%s989_s0 + $0x138] sm:$0xff]  ;;  %v53_v44 = vld [vmem:[%s989_s0 + $0x70] sm:$0xff]  ;;  %v151_v9 = vld [vmem:[%s991_s2 + $0x20] sm:$0xff] }
  0x1b   :  { %327 = vmatpush.bf16.msrb.mxu1 %v129_v16  ;;  %v130_v45 = vpack.c.bf16 %v78_v39, %v74_v38  ;;  %v66_v46 = vld [vmem:[%s989_s0 + $0xd8] sm:$0xff]  ;;  %v117_v48 = vpack.c.bf16 %v53_v44, %v49_v43  ;;  %v21_v50 = vld [vmem:[%s990_s1 + $0x30] sm:$0xff]  ;;  %177 = vperm.xlu2 %495, %v151_v9   ;;  %v152_v11 = vld [vmem:[%s991_s2 + $0x28] sm:$0xff] }
  0x1c   :  { %v70_v47 = vld [vmem:[%s989_s0 + $0xf8] sm:$0xff]  ;;  %v33_v54 = vpack.c.bf16 %v21_v50, %v19_v49  ;;  %v41_v56 = vld [vmem:[%s989_s0 + $0x10] sm:$0xff]  ;;  %v27_v12 = vld [vmem:[%s990_s1 + $0x60] sm:$0xff] }
  0x1d   :  { %214 = vmatpush.bf16.msra.mxu0 %v115_v3  ;;  %272 = vmatpush.bf16.msra.mxu2 %v116_v7  ;;  %v126_v51 = vpack.c.bf16 %v70_v47, %v66_v46  ;;  %v58_v52 = vld [vmem:[%s989_s0 + $0x98] sm:$0xff]  ;;  %v45_v57 = vld [vmem:[%s989_s0 + $0x30] sm:$0xff] }
  0x1e   :  { %481 = vmatmul.msk.bf16.gmra.mxu3 %vm195_vm0, %v664_v4  ;;  %477 = vmatmul.msk.bf16.gmra.mxu1 %vm195_vm0, %v664_v4  ;;  %v62_v53 = vld [vmem:[%s989_s0 + $0xb8] sm:$0xff]  ;;  %v113_v58 = vpack.c.bf16 %v45_v57, %v41_v56  ;;  %v153_v0 = vld [vmem:[%s991_s2 + $0x30] sm:$0xff] }
  0x1f   :  { %328 = vmatpush.bf16.msrb.mxu1 %v125_v36  ;;  %v122_v55 = vpack.c.bf16 %v62_v53, %v58_v52  ;;  %v50_v59 = vld [vmem:[%s989_s0 + $0x58] sm:$0xff]  ;;  %v25_v7 = vld [vmem:[%s990_s1 + $0x50] sm:$0xff] }
  0x20   :  { %v54_v60 = vld [vmem:[%s989_s0 + $0x78] sm:$0xff]  ;;  %187 = vperm.xlu0 %493, %v153_v0   ;;  %v35_v8 = vpack.c.bf16 %v25_v7, %v23_v6  ;;  %v29_v13 = vld [vmem:[%s990_s1 + $0x70] sm:$0xff] }
  0x21   :  { %215 = vmatpush.bf16.msra.mxu0 %v111_v17  ;;  %273 = vmatpush.bf16.msra.mxu2 %v112_v20  ;;  %v30_v62 = vld [vmem:[%s990_s1 + $0x78] sm:$0xff]  ;;  %v118_v63 = vpack.c.bf16 %v54_v60, %v50_v59  ;;  %v37_v14 = vpack.c.bf16 %v29_v13, %v27_v12 }
  0x22   :  { %v42_v1 = vld [vmem:[%s989_s0 + $0x18] sm:$0xff]  ;;  %v38_v3 = vpack.c.bf16 %v30_v62, %v28_v61 }
  0x23   :  { %329 = vmatpush.bf16.msrb.mxu1 %v121_v41  ;;  %v46_v2 = vld [vmem:[%s989_s0 + $0x38] sm:$0xff]  ;;  %182 = vperm.xlu2 %495, %v152_v11  }
  0x24   :  { %216 = vmatmul.bf16.vlgmr.msra.gmra.mxu0 %v712_v26  ;;  %274 = vmatmul.bf16.vlgmr.msra.gmra.mxu2 %v712_v26  ;;  %v114_v5 = vpack.c.bf16 %v46_v2, %v42_v1  ;;  %v154_v10 = vld [vmem:[%s991_s2 + $0x38] sm:$0xff] }
  0x25   :  { %382 = vmatpush.bf16.msrb.mxu0 %v142_v21  ;;  %418 = vmatpush.bf16.msrb.mxu2 %v146_v22 }
  0x26   :  { %192 = vperm.xlu1 %494, %v154_v10  }
  0x27   :  { %330 = vmatpush.bf16.msrb.mxu1 %v117_v48 }
  0x29   :  { %383 = vmatpush.bf16.msrb.mxu0 %v138_v27 }
  0x2b   :  { %331 = vmatpush.bf16.msrb.mxu1 %v113_v58 }
  0x2d   :  { %384 = vmatpush.bf16.msrb.mxu0 %v134_v35 }
  0x2e   :  { %482 = vmatmul.msk.bf16.gmra.mxu3 %vm195_vm0, %v749_v42  ;;  %478 = vmatmul.msk.bf16.gmra.mxu1 %vm195_vm0, %v749_v42 }
  0x31   :  { %385 = vmatpush.bf16.msrb.mxu0 %v130_v45 }
  0x34   :  { %221 = vmatmul.bf16.gmra.mxu0 %v33_v54  ;;  %279 = vmatmul.bf16.gmra.mxu2 %v33_v54 }
  0x35   :  { %386 = vmatpush.bf16.msrb.mxu0 %v126_v51 }
  0x39   :  { %387 = vmatpush.bf16.msrb.mxu0 %v122_v55 }
  0x3d   :  { %388 = vmatpush.bf16.msrb.mxu0 %v118_v63 }
  0x3e   :  { %483 = vmatmul.msk.bf16.gmra.mxu3 %vm195_vm0, %v38_v3  ;;  %479 = vmatmul.msk.bf16.gmra.mxu1 %vm195_vm0, %v38_v3 }
  0x41   :  { %389 = vmatpush.bf16.msrb.mxu0 %v114_v5 }
  0x44   :  { %226 = vmatmul.bf16.gmra.mxu0 %v35_v8  ;;  %284 = vmatmul.bf16.gmra.mxu2 %v35_v8 }
  0x4e   :  { %484 = vmatmul.msk.bf16.vlgmr.msrb.gmra.mxu3 %vm195_vm0, %v565_v23  ;;  %332 = vmatmul.bf16.vlgmr.msrb.gmra.mxu1 %v712_v26 }
  0x54   :  { %231 = vmatmul.bf16.gmra.mxu0 %v37_v14  ;;  %289 = vmatmul.bf16.gmra.mxu2 %v37_v14 }
  0x5e   :  { %485 = vmatmul.msk.bf16.gmra.mxu3 %vm195_vm0, %v664_v4  ;;  %337 = vmatmul.bf16.gmra.mxu1 %v33_v54 }
  0x64   :  { %390 = vmatmul.bf16.vlgmr.msrb.gmra.mxu0 %v712_v26  ;;  %488 = vmatmul.msk.bf16.vlgmr.msrb.gmra.mxu2 %vm195_vm0, %v565_v23 }
  0x6e   :  { %486 = vmatmul.msk.bf16.gmra.mxu3 %vm195_vm0, %v749_v42  ;;  %342 = vmatmul.bf16.gmra.mxu1 %v35_v8 }
  0x74   :  { %395 = vmatmul.bf16.gmra.mxu0 %v33_v54  ;;  %489 = vmatmul.msk.bf16.gmra.mxu2 %vm195_vm0, %v664_v4 }
  0x75   :  { %v878_v52 = vpop.permute.xlu2 %177 }
  0x7d   :  { %v891_v61 = vpop.permute.xlu2 %182 }
  0x7e   :  { %487 = vmatmul.msk.bf16.gmra.mxu3 %vm195_vm0, %v38_v3  ;;  %347 = vmatmul.bf16.gmra.mxu1 %v37_v14  ;;  %v858_v34 = vpop.permute.xlu1 %167 }
  0x82   :  { %v845_v19 = vpop.permute.xlu0 %157 }
  0x84   :  { %400 = vmatmul.bf16.gmra.mxu0 %v35_v8  ;;  %490 = vmatmul.msk.bf16.gmra.mxu2 %vm195_vm0, %v749_v42 }
  0x8a   :  { %v851_v25 = vpop.permute.xlu0 %162  ;;  %v871_v43 = vpop.permute.xlu1 %172 }
  0x8b   :  { %v246_v15 = vpop.f32.mrf.mxu1 }
  0x91   :  { %v304_v16 = vpop.f32.mrf.mxu3 }
  0x92   :  { %v902_v8 = vpop.permute.xlu0 %187 }
  0x93   :  { %v248_v17 = vpop.f32.mrf.mxu1 }
  0x94   :  { %405 = vmatmul.bf16.gmra.mxu0 %v37_v14  ;;  %491 = vmatmul.msk.bf16.gmra.mxu2 %vm195_vm0, %v38_v3 }
  0x99   :  { %v306_v23 = vpop.f32.mrf.mxu3 }
  0x9b   :  { %v251_v18 = vpop.f32.mrf.mxu1 }
  0xa1   :  { %v309_v20 = vpop.f32.mrf.mxu3  ;;  %v217_v21 = vpop.f32.mrf.mxu0 }
  0xa2   :  { %v218_v4 = vadd.f32 %v217_v21, %v845_v19 }
  0xa3   :  { %v253_v24 = vpop.f32.mrf.mxu1 }
  0xa4   :  { %v247_v22 = vadd.f32 %v246_v15, %v218_v4 }
  0xa6   :  { %440 = vst [vmem:[%s992_s3] sm:$0xff] %v247_v22 }
  0xa7   :  { %v275_v26 = vpop.f32.mrf.mxu2 }
  0xa8   :  { %v276_v28 = vadd.f32 %v275_v26, %v845_v19 }
  0xa9   :  { %v311_v27 = vpop.f32.mrf.mxu3  ;;  %v219_v29 = vpop.f32.mrf.mxu0 }
  0xaa   :  { %v220_v30 = vadd.f32 %v219_v29, %v851_v25  ;;  %v305_v31 = vadd.f32 %v304_v16, %v276_v28 }
  0xab   :  { %v256_v33 = vpop.f32.mrf.mxu1 }
  0xac   :  { %v249_v32 = vadd.f32 %v248_v17, %v220_v30  ;;  %441 = vst [vmem:[%s992_s3 + $0x8] sm:$0xff] %v305_v31 }
  0xae   :  { %444 = vst [vmem:[%s992_s3 + $0x20] sm:$0xff] %v249_v32 }
  0xaf   :  { %v277_v35 = vpop.f32.mrf.mxu2 }
  0xb0   :  { %v278_v37 = vadd.f32 %v277_v35, %v851_v25 }
  0xb1   :  { %v314_v36 = vpop.f32.mrf.mxu3  ;;  %v222_v38 = vpop.f32.mrf.mxu0 }
  0xb2   :  { %v223_v39 = vadd.f32 %v222_v38, %v858_v34  ;;  %v307_v40 = vadd.f32 %v306_v23, %v278_v37 }
  0xb3   :  { %v258_v42 = vpop.f32.mrf.mxu1 }
  0xb4   :  { %v252_v41 = vadd.f32 %v251_v18, %v223_v39  ;;  %445 = vst [vmem:[%s992_s3 + $0x28] sm:$0xff] %v307_v40  ;;  %v916_v18 = vpop.permute.xlu1 %192 }
  0xb6   :  { %448 = vst [vmem:[%s992_s3 + $0x40] sm:$0xff] %v252_v41 }
  0xb7   :  { %v280_v44 = vpop.f32.mrf.mxu2 }
  0xb8   :  { %v281_v46 = vadd.f32 %v280_v44, %v858_v34 }
  0xb9   :  { %v316_v45 = vpop.f32.mrf.mxu3  ;;  %v224_v47 = vpop.f32.mrf.mxu0 }
  0xba   :  { %v225_v48 = vadd.f32 %v224_v47, %v871_v43  ;;  %v310_v49 = vadd.f32 %v309_v20, %v281_v46 }
  0xbb   :  { %v261_v51 = vpop.f32.mrf.mxu1 }
  0xbc   :  { %v254_v50 = vadd.f32 %v253_v24, %v225_v48  ;;  %449 = vst [vmem:[%s992_s3 + $0x48] sm:$0xff] %v310_v49 }
  0xbe   :  { %452 = vst [vmem:[%s992_s3 + $0x60] sm:$0xff] %v254_v50 }
  0xbf   :  { %v282_v53 = vpop.f32.mrf.mxu2 }
  0xc0   :  { %v283_v55 = vadd.f32 %v282_v53, %v871_v43 }
  0xc1   :  { %v319_v54 = vpop.f32.mrf.mxu3  ;;  %v227_v56 = vpop.f32.mrf.mxu0 }
  0xc2   :  { %v228_v57 = vadd.f32 %v227_v56, %v878_v52  ;;  %v312_v58 = vadd.f32 %v311_v27, %v283_v55 }
  0xc3   :  { %v263_v60 = vpop.f32.mrf.mxu1 }
  0xc4   :  { %v257_v59 = vadd.f32 %v256_v33, %v228_v57  ;;  %453 = vst [vmem:[%s992_s3 + $0x68] sm:$0xff] %v312_v58 }
  0xc6   :  { %456 = vst [vmem:[%s992_s3 + $0x80] sm:$0xff] %v257_v59 }
  0xc7   :  { %v285_v62 = vpop.f32.mrf.mxu2 }
  0xc8   :  { %v286_v0 = vadd.f32 %v285_v62, %v878_v52 }
  0xc9   :  { %v321_v63 = vpop.f32.mrf.mxu3  ;;  %v229_v1 = vpop.f32.mrf.mxu0 }
  0xca   :  { %v230_v2 = vadd.f32 %v229_v1, %v891_v61  ;;  %v315_v3 = vadd.f32 %v314_v36, %v286_v0 }
  0xcb   :  { %v333_v6 = vpop.f32.mrf.mxu1 }
  0xcc   :  { %v259_v5 = vadd.f32 %v258_v42, %v230_v2  ;;  %457 = vst [vmem:[%s992_s3 + $0x88] sm:$0xff] %v315_v3  ;;  %v334_v7 = vadd.f32 %v333_v6, %v845_v19 }
  0xce   :  { %460 = vst [vmem:[%s992_s3 + $0xa0] sm:$0xff] %v259_v5 }
  0xcf   :  { %v287_v9 = vpop.f32.mrf.mxu2 }
  0xd0   :  { %v288_v11 = vadd.f32 %v287_v9, %v891_v61 }
  0xd1   :  { %v362_v10 = vpop.f32.mrf.mxu3  ;;  %v232_v12 = vpop.f32.mrf.mxu0 }
  0xd2   :  { %v363_v13 = vadd.f32 %v362_v10, %v334_v7  ;;  %v233_v14 = vadd.f32 %v232_v12, %v902_v8  ;;  %v317_v15 = vadd.f32 %v316_v45, %v288_v11 }
  0xd3   :  { %v335_v17 = vpop.f32.mrf.mxu1 }
  0xd4   :  { %442 = vst [vmem:[%s992_s3 + $0x10] sm:$0xff] %v363_v13  ;;  %v262_v16 = vadd.f32 %v261_v51, %v233_v14  ;;  %v336_v23 = vadd.f32 %v335_v17, %v851_v25 }
  0xd5   :  { %461 = vst [vmem:[%s992_s3 + $0xa8] sm:$0xff] %v317_v15 }
  0xd6   :  { %464 = vst [vmem:[%s992_s3 + $0xc0] sm:$0xff] %v262_v16 }
  0xd7   :  { %v290_v20 = vpop.f32.mrf.mxu2 }
  0xd8   :  { %v291_v4 = vadd.f32 %v290_v20, %v902_v8 }
  0xd9   :  { %v364_v21 = vpop.f32.mrf.mxu3  ;;  %v234_v22 = vpop.f32.mrf.mxu0 }
  0xda   :  { %v365_v24 = vadd.f32 %v364_v21, %v336_v23  ;;  %v235_v26 = vadd.f32 %v234_v22, %v916_v18  ;;  %v320_v27 = vadd.f32 %v319_v54, %v291_v4 }
  0xdb   :  { %v338_v29 = vpop.f32.mrf.mxu1 }
  0xdc   :  { %446 = vst [vmem:[%s992_s3 + $0x30] sm:$0xff] %v365_v24  ;;  %v264_v28 = vadd.f32 %v263_v60, %v235_v26  ;;  %v339_v30 = vadd.f32 %v338_v29, %v858_v34 }
  0xdd   :  { %465 = vst [vmem:[%s992_s3 + $0xc8] sm:$0xff] %v320_v27 }
  0xde   :  { %468 = vst [vmem:[%s992_s3 + $0xe0] sm:$0xff] %v264_v28 }
  0xdf   :  { %v292_v31 = vpop.f32.mrf.mxu2 }
  0xe0   :  { %v293_v33 = vadd.f32 %v292_v31, %v916_v18 }
  0xe1   :  { %v367_v32 = vpop.f32.mrf.mxu3  ;;  %v391_v35 = vpop.f32.mrf.mxu0 }
  0xe2   :  { %v368_v36 = vadd.f32 %v367_v32, %v339_v30  ;;  %v322_v37 = vadd.f32 %v321_v63, %v293_v33  ;;  %v392_v39 = vadd.f32 %v391_v35, %v845_v19 }
  0xe3   :  { %v340_v38 = vpop.f32.mrf.mxu1 }
  0xe4   :  { %450 = vst [vmem:[%s992_s3 + $0x50] sm:$0xff] %v368_v36  ;;  %v341_v40 = vadd.f32 %v340_v38, %v871_v43 }
  0xe5   :  { %469 = vst [vmem:[%s992_s3 + $0xe8] sm:$0xff] %v322_v37 }
  0xe7   :  { %v420_v41 = vpop.f32.mrf.mxu2 }
  0xe8   :  { %v421_v44 = vadd.f32 %v420_v41, %v392_v39 }
  0xe9   :  { %v369_v42 = vpop.f32.mrf.mxu3  ;;  %v393_v45 = vpop.f32.mrf.mxu0 }
  0xea   :  { %v370_v46 = vadd.f32 %v369_v42, %v341_v40  ;;  %443 = vst [vmem:[%s992_s3 + $0x18] sm:$0xff] %v421_v44  ;;  %v394_v19 = vadd.f32 %v393_v45, %v851_v25 }
  0xeb   :  { %v343_v47 = vpop.f32.mrf.mxu1 }
  0xec   :  { %454 = vst [vmem:[%s992_s3 + $0x70] sm:$0xff] %v370_v46  ;;  %v344_v48 = vadd.f32 %v343_v47, %v878_v52 }
  0xef   :  { %v422_v49 = vpop.f32.mrf.mxu2 }
  0xf0   :  { %v423_v51 = vadd.f32 %v422_v49, %v394_v19 }
  0xf1   :  { %v372_v50 = vpop.f32.mrf.mxu3  ;;  %v396_v53 = vpop.f32.mrf.mxu0 }
  0xf2   :  { %v373_v54 = vadd.f32 %v372_v50, %v344_v48  ;;  %447 = vst [vmem:[%s992_s3 + $0x38] sm:$0xff] %v423_v51  ;;  %v397_v56 = vadd.f32 %v396_v53, %v858_v34 }
  0xf3   :  { %v345_v55 = vpop.f32.mrf.mxu1 }
  0xf4   :  { %458 = vst [vmem:[%s992_s3 + $0x90] sm:$0xff] %v373_v54  ;;  %v346_v57 = vadd.f32 %v345_v55, %v891_v61 }
  0xf7   :  { %v425_v58 = vpop.f32.mrf.mxu2 }
  0xf8   :  { %v426_v59 = vadd.f32 %v425_v58, %v397_v56 }
  0xf9   :  { %v374_v25 = vpop.f32.mrf.mxu3  ;;  %v398_v60 = vpop.f32.mrf.mxu0 }
  0xfa   :  { %v375_v62 = vadd.f32 %v374_v25, %v346_v57  ;;  %451 = vst [vmem:[%s992_s3 + $0x58] sm:$0xff] %v426_v59  ;;  %v399_v34 = vadd.f32 %v398_v60, %v871_v43 }
  0xfb   :  { %v348_v63 = vpop.f32.mrf.mxu1 }
  0xfc   :  { %462 = vst [vmem:[%s992_s3 + $0xb0] sm:$0xff] %v375_v62  ;;  %v349_v0 = vadd.f32 %v348_v63, %v902_v8 }
  0xff   :  { %v427_v1 = vpop.f32.mrf.mxu2 }
 0x100   :  { %v428_v3 = vadd.f32 %v427_v1, %v399_v34 }
 0x101   :  { %v377_v2 = vpop.f32.mrf.mxu3  ;;  %v401_v5 = vpop.f32.mrf.mxu0 }
 0x102   :  { %v378_v6 = vadd.f32 %v377_v2, %v349_v0  ;;  %455 = vst [vmem:[%s992_s3 + $0x78] sm:$0xff] %v428_v3  ;;  %v402_v9 = vadd.f32 %v401_v5, %v878_v52 }
 0x103   :  { %v350_v7 = vpop.f32.mrf.mxu1 }
 0x104   :  { %466 = vst [vmem:[%s992_s3 + $0xd0] sm:$0xff] %v378_v6  ;;  %v351_v10 = vadd.f32 %v350_v7, %v916_v18 }
 0x107   :  { %v430_v11 = vpop.f32.mrf.mxu2 }
 0x108   :  { %v431_v12 = vadd.f32 %v430_v11, %v402_v9 }
 0x109   :  { %v379_v43 = vpop.f32.mrf.mxu3  ;;  %v403_v13 = vpop.f32.mrf.mxu0 }
 0x10a   :  { %v380_v14 = vadd.f32 %v379_v43, %v351_v10  ;;  %459 = vst [vmem:[%s992_s3 + $0x98] sm:$0xff] %v431_v12  ;;  %v404_v15 = vadd.f32 %v403_v13, %v891_v61 }
 0x10c   :  { %470 = vst [vmem:[%s992_s3 + $0xf0] sm:$0xff] %v380_v14 }
 0x10f   :  { %v432_v16 = vpop.f32.mrf.mxu2 }
 0x110   :  { %v433_v17 = vadd.f32 %v432_v16, %v404_v15 }
 0x111   :  { %v406_v52 = vpop.f32.mrf.mxu0 }
 0x112   :  { %463 = vst [vmem:[%s992_s3 + $0xb8] sm:$0xff] %v433_v17  ;;  %v407_v23 = vadd.f32 %v406_v52, %v902_v8 }
 0x117   :  { %v435_v20 = vpop.f32.mrf.mxu2 }
 0x118   :  { %v436_v21 = vadd.f32 %v435_v20, %v407_v23 }
 0x119   :  { %v408_v4 = vpop.f32.mrf.mxu0 }
 0x11a   :  { %467 = vst [vmem:[%s992_s3 + $0xd8] sm:$0xff] %v436_v21  ;;  %v409_v22 = vadd.f32 %v408_v4, %v916_v18 }
 0x11f   :  { %v437_v24 = vpop.f32.mrf.mxu2 }
 0x120   :  { %v438_v61 = vadd.f32 %v437_v24, %v409_v22 }
 0x122   :  { %471 = vst [vmem:[%s992_s3 + $0xf8] sm:$0xff] %v438_v61 }

// kernel: subpixel_forward.32
= control target key start
LH: loop header
LB: loop body
LE: loop exit
PB: predicated region body
PF: predicated region fallthrough
CT: control target
= control target key end

     0   :  { %s510_s12 = smov 0   ;;  %s512_s13 = smov 0   ;;  %s604_s0 = inlined_call_operand.vmem [shape: f32[16,2048], index: 0, kind: input, shape index: {}]   ;;  %s605_s1 = inlined_call_operand.vmem [shape: f32[14,16], index: 1, kind: input, shape index: {}]   ;;  %s606_s2 = inlined_call_operand.vmem [shape: f32[14,1], index: 2, kind: input, shape index: {}]   ;;  %s607_s3 = inlined_call_operand.vmem [shape: f32[14,2048], index: 3, kind: output, shape index: {}]  }
   0x1   :  { %s514_s14 = smov 0  }
   0x2 LB: > { %s418_s15 = sadd.s32 4294967295, %s487_s14   ;;  %s527_s16 = sadd.s32 1, %s487_s14   ;;  %s487_s14 = sphi %s514_s14, %s611_s14   ;;  %s483_s13 = sphi %s512_s13, %s610_s13   ;;  %s479_s12 = sphi %s510_s12, %s609_s12  }
   0x3   : > { %s17_s17 = ssub.s32 %s487_s14, %s527_s16  ;;  %s20_s18 = sadd.s32 1, %s483_s13 }
   0x4   : > { %p18_p0 = scmp.eq.s32.totalorder %s17_s17, 0  ;;  %p27_p1 = scmp.ne.s32.totalorder %s483_s13, %s479_s12 }
   0x5   : > { %p28_p2 = scmp.eq.s32.totalorder %s487_s14, 0  ;;  %p99_p3 = scmp.eq.s32.totalorder %s418_s15, 3 }
   0x6   : > { %s538_s19 = scalar_select %p18_p0, %s483_s13, %s20_s18  }
   0x7   : > { %p29_p4 = por %p28_p2, %p27_p1  ;;  %p540_p5 = por %p99_p3, %p27_p1 }
   0x8   : > { %p421_p6 = scmp.ge.s32.totalorder %s487_s14, 4 }
   0xa   : > { %127 = sbr.rel (%p421_p6) target bundleno = 27 (0x1b), region = 24 }
   0xf   : > { %130 = sbr.rel (!%p29_p4) target bundleno = 27 (0x1b), region = 28  ;;  %s132_s21 = sand.u32 (%p29_p4), 1, %s483_s13  }
  0x10   : > { %s437_s22 = sshll.u32 (%p29_p4), %s487_s14, 5  ;;  %s422_s23 = sshll.u32 (%p29_p4), %s132_s21, 6 }
  0x11   : > { %s137_s26 = scalar_lea.vmem (%p29_p4), %s604_s0, %s437_s22  ;;  %s134_s27 = scalar_lea.vmem (%p29_p4), [#allocation2], %s422_s23 }
  0x12   : > { %v150_v0 = vld [vmem:[%s137_s26] sm:$0xff] (%p29_p4)  ;;  %v152_v1 = vld [vmem:[%s137_s26 + $0x8] sm:$0xff] (%p29_p4)  ;;  %v154_v2 = vld [vmem:[%s137_s26 + $0x10] sm:$0xff] (%p29_p4) }
  0x13   : > { %151 = vst [vmem:[%s134_s27] sm:$0xff] (%p29_p4), %v150_v0  ;;  %v156_v3 = vld [vmem:[%s137_s26 + $0x18] sm:$0xff] (%p29_p4)  ;;  %v158_v4 = vld [vmem:[%s137_s26 + $0x80] sm:$0xff] (%p29_p4)  ;;  %v160_v5 = vld [vmem:[%s137_s26 + $0x88] sm:$0xff] (%p29_p4) }
  0x14   : > { %153 = vst [vmem:[%s134_s27 + $0x8] sm:$0xff] %v152_v1  ;;  %v162_v6 = vld [vmem:[%s137_s26 + $0x90] sm:$0xff]  ;;  %v164_v7 = vld [vmem:[%s137_s26 + $0x98] sm:$0xff] }
  0x15   : > { %155 = vst [vmem:[%s134_s27 + $0x10] sm:$0xff] %v154_v2 }
  0x16   : > { %157 = vst [vmem:[%s134_s27 + $0x18] sm:$0xff] %v156_v3 }
  0x17   : > { %159 = vst [vmem:[%s134_s27 + $0x20] sm:$0xff] %v158_v4 }
  0x18   : > { %161 = vst [vmem:[%s134_s27 + $0x28] sm:$0xff] %v160_v5 }
  0x19   : > { %163 = vst [vmem:[%s134_s27 + $0x30] sm:$0xff] %v162_v6 }
  0x1a   : > { %165 = vst [vmem:[%s134_s27 + $0x38] sm:$0xff] %v164_v7 }
  0x1b PF: > { %p425_p7 = scmp.ge.s32.totalorder %s487_s14, 1  ;;  %p170_p8 = scmp.lt.s32.totalorder %s487_s14, 5 }
  0x1d   : > { %p171_p9 = pnand %p425_p7, %p170_p8 }
  0x1e   : > { %s177_s28 = sand.u32 (!%p171_p9), 1, %s479_s12  }
  0x1f   : > { %174 = sbr.rel (%p171_p9) target bundleno = 199 (0xc7), region = 51  ;;  %s553_s29 = sshll.u32 (!%p171_p9), %s177_s28, 6 }
  0x20   : > { %s179_s9 = scalar_lea.vmem (!%p171_p9), [#allocation2], %s553_s29  ;;  %s569_s12 = scalar_lea.vmem (!%p171_p9), [#allocation3], %s553_s29 }
  0x24   : > { %v489_v8 = vmov 0   ;;  %v217_v9 = vld [vmem:[%s606_s2] sm:$0xff]  ;;  %v203_v11 = vld [vmem:[%s605_s1 + $0x8] sm:$0x3f]  ;;  %v207_v17 = vld [vmem:[%s179_s9 + $0x10] sm:$0xff]  ;;  %vm229_vm0 = vcmask 130048  }
  0x25   : > { %464 = vset.pattern.permute.xlu0 %v489_v8  ;;  %v202_v10 = vld [vmem:[%s605_s1] sm:$0xff]  ;;  %v206_v14 = vld [vmem:[%s179_s9 + $0x8] sm:$0xff]  ;;  %v211_v18 = vld [vmem:[%s179_s9 + $0x30] sm:$0xff]  ;;  %s438_s17 = sshll.u32 (%p540_p5), %s418_s15, 5 }
  0x26   : > { %221 = vperm.xlu0 %464, %v217_v9   ;;  %v205_v12 = vld [vmem:[%s179_s9] sm:$0xff]  ;;  %v210_v16 = vld [vmem:[%s179_s9 + $0x28] sm:$0xff]  ;;  %v215_v20 = vpack.c.bf16 %v211_v18, %v207_v17  ;;  %v208_v21 = vld [vmem:[%s179_s9 + $0x18] sm:$0xff]  ;;  %v204_v23 = vpack.c.bf16 %v203_v11, %v202_v10  ;;  %s330_s22 = scalar_lea.vmem (%p540_p5), %s607_s3, %s438_s17 }
  0x27   : > { %v209_v13 = vld [vmem:[%s179_s9 + $0x20] sm:$0xff]  ;;  %v214_v19 = vpack.c.bf16 %v210_v16, %v206_v14  ;;  %v212_v22 = vld [vmem:[%s179_s9 + $0x38] sm:$0xff]  ;;  %v218_v25 = vld [vmem:[%s606_s2 + $0x8] sm:$0x3f] }
  0x28   : > { %v213_v15 = vpack.c.bf16 %v209_v13, %v205_v12  ;;  %v216_v24 = vpack.c.bf16 %v212_v22, %v208_v21  ;;  %268 = vmatpush.bf16.msra.mxu2 %v215_v20 }
  0x29   : > { %254 = vmatpush.bf16.msra.mxu1 %v214_v19 }
  0x2a   : > { %240 = vmatpush.bf16.msra.mxu0 %v213_v15  ;;  %282 = vmatpush.bf16.msra.mxu3 %v216_v24 }
  0x2b   : > { %430 = vmatmul.msk.bf16.vlgmr.msra.gmra.mxu2 %vm229_vm0, %v204_v23 }
  0x2c   : > { %429 = vmatmul.msk.bf16.vlgmr.msra.gmra.mxu1 %vm229_vm0, %v204_v23 }
  0x2d   : > { %428 = vmatmul.msk.bf16.vlgmr.msra.gmra.mxu0 %vm229_vm0, %v204_v23  ;;  %431 = vmatmul.msk.bf16.vlgmr.msra.gmra.mxu3 %vm229_vm0, %v204_v23 }
  0x2e   : > { %226 = vperm.xlu0 %464, %v218_v25  }
  0x98   : > { %v222_v26 = vpop.permute.xlu0 %221 }
  0xa0   : > { %v227_v35 = vpop.permute.xlu0 %226 }
  0xa9   : > { %v256_v29 = vpop.f32.mrf.mxu1 }
  0xaa   : > { %v242_v27 = vpop.f32.mrf.mxu0  ;;  %v257_v30 = vadd.f32 %v256_v29, %v222_v26 }
  0xab   : > { %v243_v28 = vadd.f32 %v242_v27, %v222_v26 }
  0xac   : > { %vm290_vm2 = vcmp.ge.f32.partialorder %v257_v30, 0.0  ;;  %v298_v32 = vmul.f32 0.2, %v257_v30 }
  0xad   : > { %vm289_vm1 = vcmp.ge.f32.partialorder %v243_v28, 0.0  ;;  %v297_v31 = vmul.f32 0.2, %v243_v28 }
  0xae   : > { %v306_v34 = vsel %vm290_vm2, %v257_v30, %v298_v32  ;;  %v270_v36 = vpop.f32.mrf.mxu2 }
  0xaf   : > { %v305_v33 = vsel %vm289_vm1, %v243_v28, %v297_v31  ;;  %314 = vst [vmem:[%s569_s12 + $0x8] sm:$0xff] %v306_v34  ;;  %v271_v37 = vadd.f32 %v270_v36, %v222_v26 }
  0xb0   : > { %313 = vst [vmem:[%s569_s12] sm:$0xff] %v305_v33  ;;  %v284_v38 = vpop.f32.mrf.mxu3 }
  0xb1   : > { %v285_v40 = vadd.f32 %v284_v38, %v222_v26  ;;  %v258_v42 = vpop.f32.mrf.mxu1  ;;  %vm291_vm3 = vcmp.ge.f32.partialorder %v271_v37, 0.0  ;;  %v299_v43 = vmul.f32 0.2, %v271_v37 }
  0xb2   : > { %v244_v39 = vpop.f32.mrf.mxu0  ;;  %v259_v44 = vadd.f32 %v258_v42, %v227_v35 }
  0xb3   : > { %v245_v41 = vadd.f32 %v244_v39, %v227_v35  ;;  %vm292_vm4 = vcmp.ge.f32.partialorder %v285_v40, 0.0  ;;  %v300_v45 = vmul.f32 0.2, %v285_v40  ;;  %v307_v47 = vsel %vm291_vm3, %v271_v37, %v299_v43 }
  0xb4   : > { %vm294_vm6 = vcmp.ge.f32.partialorder %v259_v44, 0.0  ;;  %v302_v48 = vmul.f32 0.2, %v259_v44  ;;  %315 = vst [vmem:[%s569_s12 + $0x10] sm:$0xff] %v307_v47 }
  0xb5   : > { %vm293_vm5 = vcmp.ge.f32.partialorder %v245_v41, 0.0  ;;  %v301_v46 = vmul.f32 0.2, %v245_v41  ;;  %v308_v49 = vsel %vm292_vm4, %v285_v40, %v300_v45 }
  0xb6   : > { %316 = vst [vmem:[%s569_s12 + $0x18] sm:$0xff] %v308_v49  ;;  %v310_v51 = vsel %vm294_vm6, %v259_v44, %v302_v48  ;;  %v272_v52 = vpop.f32.mrf.mxu2  ;;  %v345_v61 = vld [vmem:[%s569_s12 + $0x8] sm:$0xff] (%p540_p5) }
  0xb7   : > { %v309_v50 = vsel %vm293_vm5, %v245_v41, %v301_v46  ;;  %318 = vst [vmem:[%s569_s12 + $0x28] sm:$0x3f] %v310_v51  ;;  %v273_v53 = vadd.f32 %v272_v52, %v227_v35  ;;  %v343_v60 = vld [vmem:[%s569_s12] sm:$0xff] (%p540_p5) }
  0xb8   : > { %317 = vst [vmem:[%s569_s12 + $0x20] sm:$0x3f] %v309_v50  ;;  %v286_v54 = vpop.f32.mrf.mxu3 }
  0xb9   : > { %v287_v55 = vadd.f32 %v286_v54, %v227_v35  ;;  %vm295_vm7 = vcmp.ge.f32.partialorder %v273_v53, 0.0  ;;  %v303_v56 = vmul.f32 0.2, %v273_v53  ;;  %344 = vst [vmem:[%s330_s22] sm:$0xff] (%p540_p5), %v343_v60 }
  0xba   : > { %327 = sbr.rel (!%p540_p5) target bundleno = 199 (0xc7), region = 59  ;;  %346 = vst [vmem:[%s330_s22 + $0x8] sm:$0xff] (%p540_p5), %v345_v61 }
  0xbb   : > { %vm296_vm8 = vcmp.ge.f32.partialorder %v287_v55, 0.0  ;;  %v304_v57 = vmul.f32 0.2, %v287_v55  ;;  %v311_v58 = vsel %vm295_vm7, %v273_v53, %v303_v56  ;;  %v347_v62 = vld [vmem:[%s569_s12 + $0x10] sm:$0xff] (%p540_p5) }
  0xbc   : > { %319 = vst [vmem:[%s569_s12 + $0x30] sm:$0x3f] %v311_v58 }
  0xbd   : > { %v312_v59 = vsel %vm296_vm8, %v287_v55, %v304_v57  ;;  %v349_v63 = vld [vmem:[%s569_s12 + $0x18] sm:$0xff] (%p540_p5)  ;;  %348 = vst [vmem:[%s330_s22 + $0x10] sm:$0xff] (%p540_p5), %v347_v62 }
  0xbe   : > { %320 = vst [vmem:[%s569_s12 + $0x38] sm:$0x3f] %v312_v59  ;;  %v353_v1 = vld [vmem:[%s569_s12 + $0x28] sm:$0xff] (%p540_p5) }
  0xbf   : > { %v351_v0 = vld [vmem:[%s569_s12 + $0x20] sm:$0xff]  ;;  %350 = vst [vmem:[%s330_s22 + $0x18] sm:$0xff] %v349_v63 }
  0xc0   : > { %352 = vst [vmem:[%s330_s22 + $0x80] sm:$0xff] %v351_v0 }
  0xc1   : > { %354 = vst [vmem:[%s330_s22 + $0x88] sm:$0xff] %v353_v1 }
  0xc3   : > { %v355_v2 = vld [vmem:[%s569_s12 + $0x30] sm:$0xff] }
  0xc4   : > { %356 = vst [vmem:[%s330_s22 + $0x90] sm:$0xff] %v355_v2 }
  0xc5   : > { %v357_v3 = vld [vmem:[%s569_s12 + $0x38] sm:$0xff] }
  0xc6   : > { %358 = vst [vmem:[%s330_s22 + $0x98] sm:$0xff] %v357_v3 }
  0xc7 PF: > { %p10_p10 = scmp.ge.s32.totalorder %s527_s16, 6   ;;  %s609_s12 = smov %s483_s13 }
  0xc8   : > { %s610_s13 = smov %s538_s19  ;;  %s611_s14 = smov %s527_s16 }
  0xc9   :  { %12 = sbr.rel (!%p10_p10) target bundleno = 2 (0x2), region = 113 }

// kernel: subpixel_forward.38
= control target key start
LH: loop header
LB: loop body
LE: loop exit
PB: predicated region body
PF: predicated region fallthrough
CT: control target
= control target key end

     0   :  { %s395_s12 = smov 0   ;;  %s428_s0 = inlined_call_operand.vmem [shape: f32[6,2048], index: 0, kind: input, shape index: {}]   ;;  %s429_s1 = inlined_call_operand.vmem [shape: f32[3,6], index: 1, kind: input, shape index: {}]   ;;  %s430_s2 = inlined_call_operand.vmem [shape: f32[3,1], index: 2, kind: input, shape index: {}]   ;;  %s431_s3 = inlined_call_operand.vmem [shape: f32[3,2048], index: 3, kind: output, shape index: {}]  }
   0x1 LB: > { %s341_s13 = sadd.s32 4294967295, %s372_s12   ;;  %p345_p0 = scmp.ge.s32.totalorder %s372_s12, 1  ;;  %s372_s12 = sphi %s395_s12, %s13_s12  }
   0x2   : > { %p138_p1 = scmp.lt.s32.totalorder %s372_s12, 5 }
   0x4   : > { %p139_p2 = pnand %p345_p0, %p138_p1 }
   0x5   : > { %s346_s14 = sshll.u32 (!%p139_p2), %s341_s13, 2 }
   0x6   : > { %142 = sbr.rel (%p139_p2) target bundleno = 163 (0xa3), region = 32  ;;  %p163_p3 = scmp.lt.s32.totalorder (!%p139_p2), %s346_s14, 15 }
   0xb   : > { %v374_v0 = vmov 0   ;;  %v185_v1 = vld [vmem:[%s430_s2] sm:$0x7]  ;;  %s433_s14 = smov (!%p163_p3, %s346_s14), 15  ;;  %vm195_vm0 = vcmask 1042432   ;;  %vm191_vm1 = vcmask 48128  }
   0xc   : > { %365 = vset.pattern.permute.xlu0 %v374_v0  ;;  %s347_s17 = sshll.u32 %s433_s14, 3  ;;  %v175_v2 = vld [vmem:[%s429_s1] sm:$0x7]  ;;  %s349_s23 = sshll.u32 %s433_s14, 2  ;;  %vm278_vm4 = vcmask 1043456  }
   0xd   : > { %188 = vperm.xlu0 %365, %v185_v1   ;;  %s166_s20 = scalar_lea.vmem %s428_s0, %s347_s17  ;;  %v176_v14 = vpack.c.bf16 %v175_v2, %v175_v2  ;;  %s172_s26 = scalar_lea.vmem %s431_s3, %s349_s23 }
   0xe   : > { %v177_v3 = vld [vmem:[%s166_s20] sm:$0x3f]  ;;  %v178_v4 = vld [vmem:[%s166_s20 + $0x8] sm:$0x3f]  ;;  %v179_v5 = vld [vmem:[%s166_s20 + $0x10] sm:$0x3f] }
   0xf   : > { %v181_v6 = vpack.c.bf16 %v177_v3, %v177_v3  ;;  %v182_v7 = vpack.c.bf16 %v178_v4, %v178_v4  ;;  %v183_v8 = vpack.c.bf16 %v179_v5, %v179_v5  ;;  %v180_v9 = vld [vmem:[%s166_s20 + $0x18] sm:$0x3f] }
  0x10   : > { %v184_v10 = vpack.c.bf16 %v180_v9, %v180_v9 }
  0x11   : > { %v197_v11 = vsel %vm195_vm0, %v181_v6, 0  ;;  %v200_v12 = vsel %vm195_vm0, %v182_v7, 0  ;;  %v203_v13 = vsel %vm195_vm0, %v183_v8, 0 }
  0x12   : > { %215 = vmatpush.bf16.msra.mxu0 %v197_v11  ;;  %228 = vmatpush.bf16.msra.mxu1 %v200_v12  ;;  %v206_v15 = vsel %vm195_vm0, %v184_v10, 0 }
  0x13   : > { %241 = vmatpush.bf16.msra.mxu2 %v203_v13  ;;  %254 = vmatpush.bf16.msra.mxu3 %v206_v15 }
  0x15   : > { %350 = vmatmul.msk.bf16.vlgmr.msra.gmra.mxu0 %vm191_vm1, %v176_v14  ;;  %351 = vmatmul.msk.bf16.vlgmr.msra.gmra.mxu1 %vm191_vm1, %v176_v14 }
  0x16   : > { %352 = vmatmul.msk.bf16.vlgmr.msra.gmra.mxu2 %vm191_vm1, %v176_v14  ;;  %353 = vmatmul.msk.bf16.vlgmr.msra.gmra.mxu3 %vm191_vm1, %v176_v14 }
  0x7f   : > { %v189_v16 = vpop.permute.xlu0 %188 }
  0x92   : > { %v217_v17 = vpop.f32.mrf.mxu0  ;;  %v230_v18 = vpop.f32.mrf.mxu1 }
  0x93   : > { %v218_v19 = vadd.f32 %v217_v17, %v189_v16  ;;  %v231_v20 = vadd.f32 %v230_v18, %v189_v16 }
  0x95   : > { %vm260_vm2 = vcmp.ge.f32.partialorder %v218_v19, 0.0  ;;  %vm261_vm3 = vcmp.ge.f32.partialorder %v231_v20, 0.0  ;;  %v264_v21 = vmul.f32 0.2, %v218_v19  ;;  %v265_v22 = vmul.f32 0.2, %v231_v20 }
  0x97   : > { %v268_v23 = vsel %vm260_vm2, %v218_v19, %v264_v21  ;;  %v269_v24 = vsel %vm261_vm3, %v231_v20, %v265_v22 }
  0x98   : > { %v276_v25 = vrot.slane %v269_v24, 4 }
  0x99   : > { %v243_v26 = vpop.f32.mrf.mxu2  ;;  %v256_v27 = vpop.f32.mrf.mxu3 }
  0x9a   : > { %v279_v28 = vsel %vm278_vm4, %v268_v23, %v276_v25  ;;  %v244_v29 = vadd.f32 %v243_v26, %v189_v16  ;;  %v257_v30 = vadd.f32 %v256_v27, %v189_v16  ;;  %v219_v31 = vpop.f32.mrf.mxu0  ;;  %v232_v32 = vpop.f32.mrf.mxu1 }
  0x9b   : > { %283 = vst [vmem:[%s172_s26] sm:$0x77] %v279_v28 }
  0x9c   : > { %v266_v33 = vmul.f32 0.2, %v244_v29  ;;  %vm263_vm5 = vcmp.ge.f32.partialorder %v257_v30, 0.0  ;;  %v267_v34 = vmul.f32 0.2, %v257_v30  ;;  %vm262_vm6 = vcmp.ge.f32.partialorder %v244_v29, 0.0 }
  0x9e   : > { %v271_v35 = vsel %vm263_vm5, %v257_v30, %v267_v34  ;;  %v270_v37 = vsel %vm262_vm6, %v244_v29, %v266_v33 }
  0x9f   : > { %v277_v36 = vrot.slane %v271_v35, 4 }
  0xa1   : > { %v280_v38 = vsel %vm278_vm4, %v270_v37, %v277_v36  ;;  %v245_v39 = vpop.f32.mrf.mxu2  ;;  %v258_v40 = vpop.f32.mrf.mxu3 }
  0xa2   : > { %284 = vst [vmem:[%s172_s26 + $0x8] sm:$0x77] %v280_v38 }
  0xa3 PF: > { %s13_s12 = sadd.s32 1, %s372_s12  }
  0xa4   : > { %p10_p4 = scmp.ge.s32.totalorder %s13_s12, 6  }
  0xa6   :  { %12 = sbr.rel (!%p10_p4) target bundleno = 1 (0x1), region = 62 }

// kernel: subpixel_forward.39
= control target key start
LH: loop header
LB: loop body
LE: loop exit
PB: predicated region body
PF: predicated region fallthrough
CT: control target
= control target key end

     0   :  { %s477_s12 = smov 0   ;;  %s479_s13 = smov 0   ;;  %s538_s0 = inlined_call_operand.vmem [shape: f32[9,2048], index: 0, kind: input, shape index: {}]   ;;  %s539_s1 = inlined_call_operand.vmem [shape: f32[4,9], index: 1, kind: input, shape index: {}]   ;;  %s540_s2 = inlined_call_operand.vmem [shape: f32[4,1], index: 2, kind: input, shape index: {}]   ;;  %s541_s3 = inlined_call_operand.vmem [shape: f32[4,2048], index: 3, kind: output, shape index: {}]  }
   0x1   :  { %s481_s14 = smov 0  }
   0x2 LB: > { %s386_s15 = sadd.s32 4294967295, %s453_s14   ;;  %s494_s16 = sadd.s32 1, %s453_s14   ;;  %s453_s14 = sphi %s481_s14, %s544_s14   ;;  %s449_s13 = sphi %s479_s13, %s543_s13   ;;  %s445_s12 = sphi %s477_s12, %s542_s12  }
   0x3   : > { %s17_s17 = ssub.s32 %s453_s14, %s494_s16  ;;  %s20_s18 = sadd.s32 1, %s449_s13 }
   0x4   : > { %p18_p0 = scmp.eq.s32.totalorder %s17_s17, 0  ;;  %p27_p1 = scmp.ne.s32.totalorder %s449_s13, %s445_s12 }
   0x5   : > { %p28_p2 = scmp.eq.s32.totalorder %s453_s14, 0  ;;  %p389_p4 = scmp.ge.s32.totalorder %s453_s14, 4 }
   0x6   : > { %s503_s19 = scalar_select %p18_p0, %s449_s13, %s20_s18  }
   0x7   : > { %p29_p3 = por %p28_p2, %p27_p1  ;;  %127 = sbr.rel (%p389_p4) target bundleno = 24 (0x18), region = 24 }
   0xc   : > { %130 = sbr.rel (!%p29_p3) target bundleno = 24 (0x18), region = 28  ;;  %s132_s20 = sand.u32 (%p29_p3), 1, %s449_s13  }
   0xd   : > { %s403_s21 = sshll.u32 (%p29_p3), %s453_s14, 5  ;;  %s390_s22 = sshll.u32 (%p29_p3), %s132_s20, 6 }
   0xe   : > { %s137_s25 = scalar_lea.vmem (%p29_p3), %s538_s0, %s403_s21  ;;  %s134_s26 = scalar_lea.vmem (%p29_p3), [#allocation2], %s390_s22 }
   0xf   : > { %v150_v0 = vld [vmem:[%s137_s25] sm:$0xff] (%p29_p3)  ;;  %v152_v1 = vld [vmem:[%s137_s25 + $0x8] sm:$0xff] (%p29_p3)  ;;  %v154_v2 = vld [vmem:[%s137_s25 + $0x10] sm:$0xff] (%p29_p3) }
  0x10   : > { %151 = vst [vmem:[%s134_s26] sm:$0xff] (%p29_p3), %v150_v0  ;;  %v156_v3 = vld [vmem:[%s137_s25 + $0x18] sm:$0xff] (%p29_p3)  ;;  %v158_v4 = vld [vmem:[%s137_s25 + $0x80] sm:$0xff] (%p29_p3)  ;;  %v160_v5 = vld [vmem:[%s137_s25 + $0x88] sm:$0xff] (%p29_p3) }
  0x11   : > { %153 = vst [vmem:[%s134_s26 + $0x8] sm:$0xff] %v152_v1  ;;  %v162_v6 = vld [vmem:[%s137_s25 + $0x90] sm:$0xff]  ;;  %v164_v7 = vld [vmem:[%s137_s25 + $0x98] sm:$0xff] }
  0x12   : > { %155 = vst [vmem:[%s134_s26 + $0x10] sm:$0xff] %v154_v2 }
  0x13   : > { %157 = vst [vmem:[%s134_s26 + $0x18] sm:$0xff] %v156_v3 }
  0x14   : > { %159 = vst [vmem:[%s134_s26 + $0x20] sm:$0xff] %v158_v4 }
  0x15   : > { %161 = vst [vmem:[%s134_s26 + $0x28] sm:$0xff] %v160_v5 }
  0x16   : > { %163 = vst [vmem:[%s134_s26 + $0x30] sm:$0xff] %v162_v6 }
  0x17   : > { %165 = vst [vmem:[%s134_s26 + $0x38] sm:$0xff] %v164_v7 }
  0x18 PF: > { %p393_p5 = scmp.ge.s32.totalorder %s453_s14, 1  ;;  %p170_p6 = scmp.lt.s32.totalorder %s453_s14, 5 }
  0x1a   : > { %p171_p7 = pnand %p393_p5, %p170_p6 }
  0x1b   : > { %s177_s27 = sand.u32 (!%p171_p7), 1, %s445_s12   ;;  %s395_s7 = sshll.u32 (!%p171_p7), %s386_s15, 2 }
  0x1c   : > { %174 = sbr.rel (%p171_p7) target bundleno = 186 (0xba), region = 51  ;;  %s394_s28 = sshll.u32 (!%p171_p7), %s177_s27, 6 }
  0x1d   : > { %s179_s6 = scalar_lea.vmem (!%p171_p7), [#allocation2], %s394_s28  ;;  %p202_p8 = scmp.lt.s32.totalorder (!%p171_p7), %s395_s7, 15 }
  0x21   : > { %vm232_vm0 = vcmask 1043456   ;;  %vm233_vm1 = vcmask 1044480   ;;  %v455_v8 = vmov 65535   ;;  %v222_v10 = vld [vmem:[%s540_s2] sm:$0xf]  ;;  %v456_v12 = vmov 0  }
  0x22   : > { %v234_v9 = vsel %vm232_vm0, 4294967295, %v455_v8  ;;  %v208_v11 = vld [vmem:[%s539_s1] sm:$0xf]  ;;  %430 = vset.pattern.permute.xlu0 %v456_v12  ;;  %v211_v16 = vld [vmem:[%s179_s6 + $0x8] sm:$0xff]  ;;  %v212_v19 = vld [vmem:[%s179_s6 + $0x10] sm:$0xff]  ;;  %vm228_vm2 = vcmask 72704  }
  0x23   : > { %v210_v13 = vld [vmem:[%s179_s6] sm:$0xff]  ;;  %v235_v15 = vsel %vm233_vm1, %v234_v9, 0  ;;  %225 = vperm.xlu0 %430, %v222_v10   ;;  %v215_v18 = vld [vmem:[%s179_s6 + $0x28] sm:$0x1]  ;;  %v216_v20 = vld [vmem:[%s179_s6 + $0x30] sm:$0x1]  ;;  %v209_v29 = vpack.c.bf16 %v208_v11, %v208_v11 }
  0x24   : > { %v214_v14 = vld [vmem:[%s179_s6 + $0x20] sm:$0x1]  ;;  %v219_v21 = vpack.c.bf16 %v215_v18, %v211_v16  ;;  %v220_v22 = vpack.c.bf16 %v216_v20, %v212_v19  ;;  %v213_v23 = vld [vmem:[%s179_s6 + $0x18] sm:$0xff]  ;;  %s546_s7 = smov (!%p202_p8, %s395_s7), 15 }
  0x25   : > { %v218_v17 = vpack.c.bf16 %v214_v14, %v210_v13  ;;  %v217_v24 = vld [vmem:[%s179_s6 + $0x38] sm:$0x1]  ;;  %s396_s8 = sshll.u32 %s546_s7, 2 }
  0x26   : > { %v221_v26 = vpack.c.bf16 %v217_v24, %v213_v23  ;;  %v240_v27 = vand.u32 %v235_v15, %v219_v21  ;;  %v243_v28 = vand.u32 %v235_v15, %v220_v22  ;;  %s205_s11 = scalar_lea.vmem %s541_s3, %s396_s8 }
  0x27   : > { %v237_v25 = vand.u32 %v235_v15, %v218_v17 }
  0x28   : > { %v246_v30 = vand.u32 %v235_v15, %v221_v26  ;;  %268 = vmatpush.bf16.msra.mxu1 %v240_v27  ;;  %281 = vmatpush.bf16.msra.mxu2 %v243_v28 }
  0x29   : > { %255 = vmatpush.bf16.msra.mxu0 %v237_v25 }
  0x2a   : > { %294 = vmatpush.bf16.msra.mxu3 %v246_v30 }
  0x2b   : > { %398 = vmatmul.msk.bf16.vlgmr.msra.gmra.mxu1 %vm228_vm2, %v209_v29  ;;  %399 = vmatmul.msk.bf16.vlgmr.msra.gmra.mxu2 %vm228_vm2, %v209_v29 }
  0x2c   : > { %397 = vmatmul.msk.bf16.vlgmr.msra.gmra.mxu0 %vm228_vm2, %v209_v29 }
  0x2d   : > { %400 = vmatmul.msk.bf16.vlgmr.msra.gmra.mxu3 %vm228_vm2, %v209_v29 }
  0x95   : > { %v226_v31 = vpop.permute.xlu0 %225 }
  0xa8   : > { %v270_v33 = vpop.f32.mrf.mxu1 }
  0xa9   : > { %v257_v32 = vpop.f32.mrf.mxu0  ;;  %v271_v35 = vadd.f32 %v270_v33, %v226_v31 }
  0xaa   : > { %v258_v34 = vadd.f32 %v257_v32, %v226_v31 }
  0xab   : > { %vm301_vm4 = vcmp.ge.f32.partialorder %v271_v35, 0.0  ;;  %v305_v37 = vmul.f32 0.2, %v271_v35 }
  0xac   : > { %vm300_vm3 = vcmp.ge.f32.partialorder %v258_v34, 0.0  ;;  %v304_v36 = vmul.f32 0.2, %v258_v34 }
  0xad   : > { %v309_v39 = vsel %vm301_vm4, %v271_v35, %v305_v37 }
  0xae   : > { %v308_v38 = vsel %vm300_vm3, %v258_v34, %v304_v36  ;;  %v316_v40 = vrot.slane %v309_v39, 4  ;;  %v283_v41 = vpop.f32.mrf.mxu2 }
  0xaf   : > { %v284_v42 = vadd.f32 %v283_v41, %v226_v31 }
  0xb0   : > { %v296_v43 = vpop.f32.mrf.mxu3  ;;  %v318_v45 = vsel %vm232_vm0, %v308_v38, %v316_v40  ;;  %v272_v47 = vpop.f32.mrf.mxu1 }
  0xb1   : > { %v259_v44 = vpop.f32.mrf.mxu0  ;;  %v297_v46 = vadd.f32 %v296_v43, %v226_v31  ;;  %322 = vst [vmem:[%s205_s11] sm:$0xff] %v318_v45  ;;  %v306_v48 = vmul.f32 0.2, %v284_v42  ;;  %vm302_vm6 = vcmp.ge.f32.partialorder %v284_v42, 0.0 }
  0xb3   : > { %vm303_vm5 = vcmp.ge.f32.partialorder %v297_v46, 0.0  ;;  %v307_v49 = vmul.f32 0.2, %v297_v46  ;;  %v310_v52 = vsel %vm302_vm6, %v284_v42, %v306_v48 }
  0xb5   : > { %v311_v50 = vsel %vm303_vm5, %v297_v46, %v307_v49 }
  0xb6   : > { %v317_v51 = vrot.slane %v311_v50, 4  ;;  %v285_v53 = vpop.f32.mrf.mxu2 }
  0xb8   : > { %v319_v54 = vsel %vm232_vm0, %v310_v52, %v317_v51  ;;  %v298_v55 = vpop.f32.mrf.mxu3 }
  0xb9   : > { %323 = vst [vmem:[%s205_s11 + $0x8] sm:$0xff] %v319_v54 }
  0xba PF: > { %p10_p9 = scmp.ge.s32.totalorder %s494_s16, 6   ;;  %s542_s12 = smov %s449_s13 }
  0xbb   : > { %s543_s13 = smov %s503_s19  ;;  %s544_s14 = smov %s494_s16 }
  0xbc   :  { %12 = sbr.rel (!%p10_p9) target bundleno = 2 (0x2), region = 90 }

// kernel: subpixel_forward.40
= control target key start
LH: loop header
LB: loop body
LE: loop exit
PB: predicated region body
PF: predicated region fallthrough
CT: control target
= control target key end

     0   :  { %s505_s12 = smov 0   ;;  %s507_s13 = smov 0   ;;  %s633_s0 = inlined_call_operand.vmem [shape: f32[36,2048], index: 0, kind: input, shape index: {}]   ;;  %s634_s1 = inlined_call_operand.vmem [shape: f32[4,36], index: 1, kind: input, shape index: {}]   ;;  %s635_s2 = inlined_call_operand.vmem [shape: f32[4,1], index: 2, kind: input, shape index: {}]   ;;  %s636_s3 = inlined_call_operand.vmem [shape: f32[4,2048], index: 3, kind: output, shape index: {}]  }
   0x1   :  { %s509_s14 = smov 0  }
   0x2 LB: > { %s416_s15 = sadd.s32 4294967295, %s482_s14   ;;  %s522_s16 = sadd.s32 1, %s482_s14   ;;  %s482_s14 = sphi %s509_s14, %s639_s14   ;;  %s478_s13 = sphi %s507_s13, %s638_s13   ;;  %s474_s12 = sphi %s505_s12, %s637_s12  }
   0x3   : > { %s17_s17 = ssub.s32 %s482_s14, %s522_s16  ;;  %s20_s18 = sadd.s32 1, %s478_s13 }
   0x4   : > { %p18_p0 = scmp.eq.s32.totalorder %s17_s17, 0  ;;  %p27_p1 = scmp.ne.s32.totalorder %s478_s13, %s474_s12 }
   0x5   : > { %p28_p2 = scmp.eq.s32.totalorder %s482_s14, 0  ;;  %p419_p4 = scmp.ge.s32.totalorder %s482_s14, 4 }
   0x6   : > { %s531_s19 = scalar_select %p18_p0, %s478_s13, %s20_s18  }
   0x7   : > { %p29_p3 = por %p28_p2, %p27_p1  ;;  %127 = sbr.rel (%p419_p4) target bundleno = 36 (0x24), region = 24 }
   0xc   : > { %130 = sbr.rel (!%p29_p3) target bundleno = 36 (0x24), region = 28  ;;  %s132_s20 = sand.u32 (%p29_p3), 1, %s478_s13  }
   0xd   : > { %s431_s21 = sshll.u32 (%p29_p3), %s482_s14, 5  ;;  %s432_s22 = smul.u32 (%p29_p3), 160, %s132_s20 }
   0xe   : > { %s539_s25 = scalar_lea.vmem (%p29_p3), %s633_s0, %s431_s21 }
   0xf   : > { %v150_v0 = vld [vmem:[%s539_s25] sm:$0xff] (%p29_p3)  ;;  %v152_v1 = vld [vmem:[%s539_s25 + $0x8] sm:$0xff] (%p29_p3)  ;;  %v154_v2 = vld [vmem:[%s539_s25 + $0x10] sm:$0xff] (%p29_p3)  ;;  %s544_s26 = scalar_lea.vmem (%p29_p3), [#allocation2], %s432_s22 }
  0x10   : > { %151 = vst [vmem:[%s544_s26] sm:$0xff] (%p29_p3), %v150_v0  ;;  %v156_v3 = vld [vmem:[%s539_s25 + $0x18] sm:$0xff] (%p29_p3)  ;;  %v158_v4 = vld [vmem:[%s539_s25 + $0x80] sm:$0xff] (%p29_p3)  ;;  %v160_v5 = vld [vmem:[%s539_s25 + $0x88] sm:$0xff] (%p29_p3) }
  0x11   : > { %153 = vst [vmem:[%s544_s26 + $0x8] sm:$0xff] %v152_v1  ;;  %v162_v6 = vld [vmem:[%s539_s25 + $0x90] sm:$0xff]  ;;  %v164_v7 = vld [vmem:[%s539_s25 + $0x98] sm:$0xff]  ;;  %v166_v8 = vld [vmem:[%s539_s25 + $0x100] sm:$0xff] }
  0x12   : > { %155 = vst [vmem:[%s544_s26 + $0x10] sm:$0xff] %v154_v2  ;;  %v168_v9 = vld [vmem:[%s539_s25 + $0x108] sm:$0xff]  ;;  %v170_v10 = vld [vmem:[%s539_s25 + $0x110] sm:$0xff]  ;;  %v172_v11 = vld [vmem:[%s539_s25 + $0x118] sm:$0xff] }
  0x13   : > { %157 = vst [vmem:[%s544_s26 + $0x18] sm:$0xff] %v156_v3  ;;  %v174_v12 = vld [vmem:[%s539_s25 + $0x180] sm:$0xff]  ;;  %v176_v13 = vld [vmem:[%s539_s25 + $0x188] sm:$0xff]  ;;  %v178_v14 = vld [vmem:[%s539_s25 + $0x190] sm:$0xff] }
  0x14   : > { %159 = vst [vmem:[%s544_s26 + $0x20] sm:$0xff] %v158_v4  ;;  %v180_v15 = vld [vmem:[%s539_s25 + $0x198] sm:$0xff]  ;;  %v182_v16 = vld [vmem:[%s539_s25 + $0x200] sm:$0xff]  ;;  %v184_v17 = vld [vmem:[%s539_s25 + $0x208] sm:$0xff] }
  0x15   : > { %161 = vst [vmem:[%s544_s26 + $0x28] sm:$0xff] %v160_v5  ;;  %v186_v18 = vld [vmem:[%s539_s25 + $0x210] sm:$0xff]  ;;  %v188_v19 = vld [vmem:[%s539_s25 + $0x218] sm:$0xff] }
  0x16   : > { %163 = vst [vmem:[%s544_s26 + $0x30] sm:$0xff] %v162_v6 }
  0x17   : > { %165 = vst [vmem:[%s544_s26 + $0x38] sm:$0xff] %v164_v7 }
  0x18   : > { %167 = vst [vmem:[%s544_s26 + $0x40] sm:$0xff] %v166_v8 }
  0x19   : > { %169 = vst [vmem:[%s544_s26 + $0x48] sm:$0xff] %v168_v9 }
  0x1a   : > { %171 = vst [vmem:[%s544_s26 + $0x50] sm:$0xff] %v170_v10 }
  0x1b   : > { %173 = vst [vmem:[%s544_s26 + $0x58] sm:$0xff] %v172_v11 }
  0x1c   : > { %175 = vst [vmem:[%s544_s26 + $0x60] sm:$0xff] %v174_v12 }
  0x1d   : > { %177 = vst [vmem:[%s544_s26 + $0x68] sm:$0xff] %v176_v13 }
  0x1e   : > { %179 = vst [vmem:[%s544_s26 + $0x70] sm:$0xff] %v178_v14 }
  0x1f   : > { %181 = vst [vmem:[%s544_s26 + $0x78] sm:$0xff] %v180_v15 }
  0x20   : > { %183 = vst [vmem:[%s544_s26 + $0x80] sm:$0xff] %v182_v16 }
  0x21   : > { %185 = vst [vmem:[%s544_s26 + $0x88] sm:$0xff] %v184_v17 }
  0x22   : > { %187 = vst [vmem:[%s544_s26 + $0x90] sm:$0xff] %v186_v18 }
  0x23   : > { %189 = vst [vmem:[%s544_s26 + $0x98] sm:$0xff] %v188_v19 }
  0x24 PF: > { %p422_p5 = scmp.ge.s32.totalorder %s482_s14, 1  ;;  %p194_p6 = scmp.lt.s32.totalorder %s482_s14, 5 }
  0x26   : > { %p195_p7 = pnand %p422_p5, %p194_p6 }
  0x27   : > { %s201_s27 = sand.u32 (!%p195_p7), 1, %s474_s12   ;;  %s423_s7 = sshll.u32 (!%p195_p7), %s416_s15, 2 }
  0x28   : > { %198 = sbr.rel (%p195_p7) target bundleno = 202 (0xca), region = 51  ;;  %p226_p8 = scmp.lt.s32.totalorder (!%p195_p7), %s423_s7, 15 }
  0x29   : > { %s433_s28 = smul.u32 (!%p195_p7), 160, %s201_s27 }
  0x2b   : > { %s589_s4 = scalar_lea.vmem (!%p195_p7), [#allocation2], %s433_s28 }
  0x2d   : > { %v484_v20 = vmov 0   ;;  %v266_v21 = vld [vmem:[%s635_s2] sm:$0xf]  ;;  %vm276_vm0 = vcmask 1041408   ;;  %v251_v23 = vld [vmem:[%s589_s4 + $0x88] sm:$0xf] }
  0x2e   : > { %459 = vset.pattern.permute.xlu0 %v484_v20  ;;  %v250_v22 = vld [vmem:[%s589_s4 + $0x80] sm:$0xf]  ;;  %v252_v24 = vld [vmem:[%s589_s4 + $0x90] sm:$0xf]  ;;  %v263_v26 = vpack.c.bf16 %v251_v23, %v251_v23  ;;  %v253_v28 = vld [vmem:[%s589_s4 + $0x98] sm:$0xf] }
  0x2f   : > { %269 = vperm.xlu0 %459, %v266_v21   ;;  %v262_v25 = vpack.c.bf16 %v250_v22, %v250_v22  ;;  %v264_v27 = vpack.c.bf16 %v252_v24, %v252_v24  ;;  %v242_v29 = vld [vmem:[%s589_s4 + $0x40] sm:$0xff]  ;;  %v265_v31 = vpack.c.bf16 %v253_v28, %v253_v28  ;;  %v243_v32 = vld [vmem:[%s589_s4 + $0x48] sm:$0xff]  ;;  %v244_v34 = vld [vmem:[%s589_s4 + $0x50] sm:$0xff]  ;;  %vm272_vm1 = vcmask 293888   ;;  %s641_s7 = smov (!%p226_p8, %s423_s7), 15 }
  0x30   : > { %v246_v30 = vld [vmem:[%s589_s4 + $0x60] sm:$0xff]  ;;  %v247_v33 = vld [vmem:[%s589_s4 + $0x68] sm:$0xff]  ;;  %v281_v36 = vsel %vm276_vm0, %v263_v26, 0  ;;  %v248_v38 = vld [vmem:[%s589_s4 + $0x70] sm:$0xff]  ;;  %s424_s8 = sshll.u32 %s641_s7, 2  ;;  %vm347_vm2 = vcmask 1043456  }
  0x31   : > { %v278_v35 = vsel %vm276_vm0, %v262_v25, 0  ;;  %v284_v37 = vsel %vm276_vm0, %v264_v27, 0  ;;  %v245_v39 = vld [vmem:[%s589_s4 + $0x58] sm:$0xff]  ;;  %307 = vmatpush.bf16.msra.mxu1 %v281_v36  ;;  %v287_v41 = vsel %vm276_vm0, %v265_v31, 0  ;;  %v258_v42 = vpack.c.bf16 %v246_v30, %v242_v29  ;;  %v234_v44 = vld [vmem:[%s589_s4] sm:$0xff]  ;;  %v235_v48 = vld [vmem:[%s589_s4 + $0x8] sm:$0xff]  ;;  %s229_s11 = scalar_lea.vmem %s636_s3, %s424_s8 }
  0x32   : > { %v249_v40 = vld [vmem:[%s589_s4 + $0x78] sm:$0xff]  ;;  %294 = vmatpush.bf16.msra.mxu0 %v278_v35  ;;  %v259_v43 = vpack.c.bf16 %v247_v33, %v243_v32  ;;  %v238_v45 = vld [vmem:[%s589_s4 + $0x20] sm:$0xff]  ;;  %320 = vmatpush.bf16.msra.mxu2 %v284_v37  ;;  %v260_v46 = vpack.c.bf16 %v248_v38, %v244_v34  ;;  %v239_v49 = vld [vmem:[%s589_s4 + $0x28] sm:$0xff] }
  0x33   : > { %333 = vmatpush.bf16.msra.mxu3 %v287_v41  ;;  %v261_v47 = vpack.c.bf16 %v249_v40, %v245_v39  ;;  %v236_v50 = vld [vmem:[%s589_s4 + $0x10] sm:$0xff]  ;;  %v237_v52 = vld [vmem:[%s589_s4 + $0x18] sm:$0xff]  ;;  %v254_v54 = vpack.c.bf16 %v238_v45, %v234_v44  ;;  %v255_v55 = vpack.c.bf16 %v239_v49, %v235_v48  ;;  %v232_v56 = vld [vmem:[%s634_s1] sm:$0xf] }
  0x34   : > { %v240_v51 = vld [vmem:[%s589_s4 + $0x30] sm:$0xff]  ;;  %v241_v53 = vld [vmem:[%s589_s4 + $0x38] sm:$0xff]  ;;  %v233_v59 = vpack.c.bf16 %v232_v56, %v232_v56 }
  0x35   : > { %308 = vmatpush.bf16.msra.mxu1 %v259_v43  ;;  %v256_v57 = vpack.c.bf16 %v240_v51, %v236_v50  ;;  %v257_v58 = vpack.c.bf16 %v241_v53, %v237_v52 }
  0x36   : > { %295 = vmatpush.bf16.msra.mxu0 %v258_v42  ;;  %321 = vmatpush.bf16.msra.mxu2 %v260_v46 }
  0x37   : > { %334 = vmatpush.bf16.msra.mxu3 %v261_v47 }
  0x39   : > { %309 = vmatpush.bf16.msra.mxu1 %v255_v55 }
  0x3a   : > { %296 = vmatpush.bf16.msra.mxu0 %v254_v54  ;;  %322 = vmatpush.bf16.msra.mxu2 %v256_v57 }
  0x3b   : > { %335 = vmatpush.bf16.msra.mxu3 %v257_v58 }
  0x3c   : > { %426 = vmatmul.msk.bf16.vlgmr.msra.gmra.mxu1 %vm272_vm1, %v233_v59 }
  0x3d   : > { %425 = vmatmul.msk.bf16.vlgmr.msra.gmra.mxu0 %vm272_vm1, %v233_v59  ;;  %427 = vmatmul.msk.bf16.vlgmr.msra.gmra.mxu2 %vm272_vm1, %v233_v59 }
  0x3e   : > { %428 = vmatmul.msk.bf16.vlgmr.msra.gmra.mxu3 %vm272_vm1, %v233_v59 }
  0xa1   : > { %v270_v60 = vpop.permute.xlu0 %269 }
  0xb9   : > { %v311_v62 = vpop.f32.mrf.mxu1 }
  0xba   : > { %v298_v61 = vpop.f32.mrf.mxu0  ;;  %v312_v0 = vadd.f32 %v311_v62, %v270_v60 }
  0xbb   : > { %v299_v63 = vadd.f32 %v298_v61, %v270_v60 }
  0xbc   : > { %v345_v1 = vrot.slane %v312_v0, 4 }
  0xbe   : > { %v348_v2 = vsel %vm347_vm2, %v299_v63, %v345_v1 }
  0xbf   : > { %352 = vst [vmem:[%s229_s11] sm:$0xff] %v348_v2 }
  0xc0   : > { %v324_v3 = vpop.f32.mrf.mxu2 }
  0xc1   : > { %v337_v4 = vpop.f32.mrf.mxu3  ;;  %v313_v7 = vpop.f32.mrf.mxu1  ;;  %v325_v8 = vadd.f32 %v324_v3, %v270_v60 }
  0xc2   : > { %v338_v5 = vadd.f32 %v337_v4, %v270_v60  ;;  %v300_v6 = vpop.f32.mrf.mxu0 }
  0xc4   : > { %v346_v9 = vrot.slane %v338_v5, 4 }
  0xc6   : > { %v349_v10 = vsel %vm347_vm2, %v325_v8, %v346_v9 }
  0xc7   : > { %353 = vst [vmem:[%s229_s11 + $0x8] sm:$0xff] %v349_v10 }
  0xc8   : > { %v326_v11 = vpop.f32.mrf.mxu2 }
  0xc9   : > { %v339_v12 = vpop.f32.mrf.mxu3 }
  0xca PF: > { %p10_p9 = scmp.ge.s32.totalorder %s522_s16, 6   ;;  %s637_s12 = smov %s478_s13 }
  0xcb   : > { %s638_s13 = smov %s531_s19  ;;  %s639_s14 = smov %s522_s16 }
  0xcc   :  { %12 = sbr.rel (!%p10_p9) target bundleno = 2 (0x2), region = 90 }

// kernel: subpixel_forward.36
= control target key start
LH: loop header
LB: loop body
LE: loop exit
PB: predicated region body
PF: predicated region fallthrough
CT: control target
= control target key end

     0   :  { %s473_s12 = smov 0   ;;  %s475_s13 = smov 0   ;;  %s537_s0 = inlined_call_operand.vmem [shape: f32[12,2048], index: 0, kind: input, shape index: {}]   ;;  %s538_s1 = inlined_call_operand.vmem [shape: f32[4,12], index: 1, kind: input, shape index: {}]   ;;  %s539_s2 = inlined_call_operand.vmem [shape: f32[4,1], index: 2, kind: input, shape index: {}]   ;;  %s540_s3 = inlined_call_operand.vmem [shape: f32[4,2048], index: 3, kind: output, shape index: {}]  }
   0x1   :  { %s477_s14 = smov 0  }
   0x2 LB: > { %s384_s15 = sadd.s32 4294967295, %s450_s14   ;;  %s490_s16 = sadd.s32 1, %s450_s14   ;;  %s450_s14 = sphi %s477_s14, %s543_s14   ;;  %s446_s13 = sphi %s475_s13, %s542_s13   ;;  %s442_s12 = sphi %s473_s12, %s541_s12  }
   0x3   : > { %s17_s17 = ssub.s32 %s450_s14, %s490_s16  ;;  %s20_s18 = sadd.s32 1, %s446_s13 }
   0x4   : > { %p18_p0 = scmp.eq.s32.totalorder %s17_s17, 0  ;;  %p27_p1 = scmp.ne.s32.totalorder %s446_s13, %s442_s12 }
   0x5   : > { %p28_p2 = scmp.eq.s32.totalorder %s450_s14, 0  ;;  %p387_p4 = scmp.ge.s32.totalorder %s450_s14, 4 }
   0x6   : > { %s499_s19 = scalar_select %p18_p0, %s446_s13, %s20_s18  }
   0x7   : > { %p29_p3 = por %p28_p2, %p27_p1  ;;  %127 = sbr.rel (%p387_p4) target bundleno = 24 (0x18), region = 24 }
   0xc   : > { %130 = sbr.rel (!%p29_p3) target bundleno = 24 (0x18), region = 28  ;;  %s132_s20 = sand.u32 (%p29_p3), 1, %s446_s13  }
   0xd   : > { %s401_s21 = sshll.u32 (%p29_p3), %s450_s14, 5  ;;  %s388_s22 = sshll.u32 (%p29_p3), %s132_s20, 6 }
   0xe   : > { %s137_s25 = scalar_lea.vmem (%p29_p3), %s537_s0, %s401_s21  ;;  %s134_s26 = scalar_lea.vmem (%p29_p3), [#allocation2], %s388_s22 }
   0xf   : > { %v150_v0 = vld [vmem:[%s137_s25] sm:$0xff] (%p29_p3)  ;;  %v152_v1 = vld [vmem:[%s137_s25 + $0x8] sm:$0xff] (%p29_p3)  ;;  %v154_v2 = vld [vmem:[%s137_s25 + $0x10] sm:$0xff] (%p29_p3) }
  0x10   : > { %151 = vst [vmem:[%s134_s26] sm:$0xff] (%p29_p3), %v150_v0  ;;  %v156_v3 = vld [vmem:[%s137_s25 + $0x18] sm:$0xff] (%p29_p3)  ;;  %v158_v4 = vld [vmem:[%s137_s25 + $0x80] sm:$0xff] (%p29_p3)  ;;  %v160_v5 = vld [vmem:[%s137_s25 + $0x88] sm:$0xff] (%p29_p3) }
  0x11   : > { %153 = vst [vmem:[%s134_s26 + $0x8] sm:$0xff] %v152_v1  ;;  %v162_v6 = vld [vmem:[%s137_s25 + $0x90] sm:$0xff]  ;;  %v164_v7 = vld [vmem:[%s137_s25 + $0x98] sm:$0xff] }
  0x12   : > { %155 = vst [vmem:[%s134_s26 + $0x10] sm:$0xff] %v154_v2 }
  0x13   : > { %157 = vst [vmem:[%s134_s26 + $0x18] sm:$0xff] %v156_v3 }
  0x14   : > { %159 = vst [vmem:[%s134_s26 + $0x20] sm:$0xff] %v158_v4 }
  0x15   : > { %161 = vst [vmem:[%s134_s26 + $0x28] sm:$0xff] %v160_v5 }
  0x16   : > { %163 = vst [vmem:[%s134_s26 + $0x30] sm:$0xff] %v162_v6 }
  0x17   : > { %165 = vst [vmem:[%s134_s26 + $0x38] sm:$0xff] %v164_v7 }
  0x18 PF: > { %p391_p5 = scmp.ge.s32.totalorder %s450_s14, 1  ;;  %p170_p6 = scmp.lt.s32.totalorder %s450_s14, 5 }
  0x1a   : > { %p171_p7 = pnand %p391_p5, %p170_p6 }
  0x1b   : > { %s177_s27 = sand.u32 (!%p171_p7), 1, %s442_s12   ;;  %s393_s7 = sshll.u32 (!%p171_p7), %s384_s15, 2 }
  0x1c   : > { %174 = sbr.rel (%p171_p7) target bundleno = 184 (0xb8), region = 51  ;;  %s392_s28 = sshll.u32 (!%p171_p7), %s177_s27, 6 }
  0x1d   : > { %s179_s6 = scalar_lea.vmem (!%p171_p7), [#allocation2], %s392_s28  ;;  %p202_p8 = scmp.lt.s32.totalorder (!%p171_p7), %s393_s7, 15 }
  0x21   : > { %v452_v8 = vmov 0   ;;  %v222_v9 = vld [vmem:[%s539_s2] sm:$0xf]  ;;  %vm232_vm0 = vcmask 1045504   ;;  %v211_v13 = vld [vmem:[%s179_s6 + $0x8] sm:$0xff]  ;;  %v212_v16 = vld [vmem:[%s179_s6 + $0x10] sm:$0xff] }
  0x22   : > { %427 = vset.pattern.permute.xlu0 %v452_v8  ;;  %v208_v10 = vld [vmem:[%s538_s1] sm:$0xf]  ;;  %v215_v15 = vld [vmem:[%s179_s6 + $0x28] sm:$0xf]  ;;  %v216_v17 = vld [vmem:[%s179_s6 + $0x30] sm:$0xf] }
  0x23   : > { %225 = vperm.xlu0 %427, %v222_v9   ;;  %v210_v11 = vld [vmem:[%s179_s6] sm:$0xff]  ;;  %v219_v18 = vpack.c.bf16 %v215_v15, %v211_v13  ;;  %v220_v19 = vpack.c.bf16 %v216_v17, %v212_v16  ;;  %v213_v20 = vld [vmem:[%s179_s6 + $0x18] sm:$0xff]  ;;  %v209_v24 = vpack.c.bf16 %v208_v10, %v208_v10  ;;  %vm228_vm1 = vcmask 97280   ;;  %s545_s7 = smov (!%p202_p8, %s393_s7), 15 }
  0x24   : > { %v214_v12 = vld [vmem:[%s179_s6 + $0x20] sm:$0xf]  ;;  %v217_v21 = vld [vmem:[%s179_s6 + $0x38] sm:$0xf]  ;;  %s394_s8 = sshll.u32 %s545_s7, 2  ;;  %vm315_vm4 = vcmask 1043456  }
  0x25   : > { %v218_v14 = vpack.c.bf16 %v214_v12, %v210_v11  ;;  %v221_v23 = vpack.c.bf16 %v217_v21, %v213_v20  ;;  %v237_v25 = vsel %vm232_vm0, %v219_v18, 0  ;;  %v240_v26 = vsel %vm232_vm0, %v220_v19, 0  ;;  %s205_s11 = scalar_lea.vmem %s540_s3, %s394_s8 }
  0x26   : > { %265 = vmatpush.bf16.msra.mxu1 %v237_v25  ;;  %278 = vmatpush.bf16.msra.mxu2 %v240_v26 }
  0x27   : > { %v234_v22 = vsel %vm232_vm0, %v218_v14, 0  ;;  %v243_v27 = vsel %vm232_vm0, %v221_v23, 0 }
  0x28   : > { %252 = vmatpush.bf16.msra.mxu0 %v234_v22  ;;  %291 = vmatpush.bf16.msra.mxu3 %v243_v27 }
  0x29   : > { %396 = vmatmul.msk.bf16.vlgmr.msra.gmra.mxu1 %vm228_vm1, %v209_v24  ;;  %397 = vmatmul.msk.bf16.vlgmr.msra.gmra.mxu2 %vm228_vm1, %v209_v24 }
  0x2b   : > { %395 = vmatmul.msk.bf16.vlgmr.msra.gmra.mxu0 %vm228_vm1, %v209_v24  ;;  %398 = vmatmul.msk.bf16.vlgmr.msra.gmra.mxu3 %vm228_vm1, %v209_v24 }
  0x95   : > { %v226_v28 = vpop.permute.xlu0 %225 }
  0xa6   : > { %v267_v30 = vpop.f32.mrf.mxu1 }
  0xa7   : > { %v268_v32 = vadd.f32 %v267_v30, %v226_v28 }
  0xa8   : > { %v254_v29 = vpop.f32.mrf.mxu0 }
  0xa9   : > { %v255_v31 = vadd.f32 %v254_v29, %v226_v28  ;;  %vm298_vm3 = vcmp.ge.f32.partialorder %v268_v32, 0.0  ;;  %v302_v34 = vmul.f32 0.2, %v268_v32 }
  0xab   : > { %vm297_vm2 = vcmp.ge.f32.partialorder %v255_v31, 0.0  ;;  %v301_v33 = vmul.f32 0.2, %v255_v31  ;;  %v306_v36 = vsel %vm298_vm3, %v268_v32, %v302_v34 }
  0xac   : > { %v313_v37 = vrot.slane %v306_v36, 4  ;;  %v280_v38 = vpop.f32.mrf.mxu2 }
  0xad   : > { %v305_v35 = vsel %vm297_vm2, %v255_v31, %v301_v33  ;;  %v281_v39 = vadd.f32 %v280_v38, %v226_v28 }
  0xae   : > { %v293_v40 = vpop.f32.mrf.mxu3  ;;  %v316_v42 = vsel %vm315_vm4, %v305_v35, %v313_v37  ;;  %v269_v44 = vpop.f32.mrf.mxu1 }
  0xaf   : > { %v294_v43 = vadd.f32 %v293_v40, %v226_v28  ;;  %320 = vst [vmem:[%s205_s11] sm:$0xff] %v316_v42  ;;  %v303_v45 = vmul.f32 0.2, %v281_v39  ;;  %vm299_vm6 = vcmp.ge.f32.partialorder %v281_v39, 0.0 }
  0xb0   : > { %v256_v41 = vpop.f32.mrf.mxu0 }
  0xb1   : > { %vm300_vm5 = vcmp.ge.f32.partialorder %v294_v43, 0.0  ;;  %v304_v46 = vmul.f32 0.2, %v294_v43  ;;  %v307_v49 = vsel %vm299_vm6, %v281_v39, %v303_v45 }
  0xb3   : > { %v308_v47 = vsel %vm300_vm5, %v294_v43, %v304_v46 }
  0xb4   : > { %v314_v48 = vrot.slane %v308_v47, 4  ;;  %v282_v50 = vpop.f32.mrf.mxu2 }
  0xb6   : > { %v317_v51 = vsel %vm315_vm4, %v307_v49, %v314_v48  ;;  %v295_v52 = vpop.f32.mrf.mxu3 }
  0xb7   : > { %321 = vst [vmem:[%s205_s11 + $0x8] sm:$0xff] %v317_v51 }
  0xb8 PF: > { %p10_p9 = scmp.ge.s32.totalorder %s490_s16, 6   ;;  %s541_s12 = smov %s446_s13 }
  0xb9   : > { %s542_s13 = smov %s499_s19  ;;  %s543_s14 = smov %s490_s16 }
  0xba   :  { %12 = sbr.rel (!%p10_p9) target bundleno = 2 (0x2), region = 90 }

// kernel: subpixel_forward.41
= control target key start
LH: loop header
LB: loop body
LE: loop exit
PB: predicated region body
PF: predicated region fallthrough
CT: control target
= control target key end

     0   :  { %s1356_s17 = smov 0   ;;  %s1358_s18 = smov 0   ;;  %s1537_s0 = inlined_call_operand.vmem [shape: f32[4,2048], index: 0, kind: input, shape index: {}]   ;;  %s1538_s1 = inlined_call_operand.vmem [shape: f32[4,2048], index: 1, kind: input, shape index: {}]   ;;  %s1539_s2 = inlined_call_operand.vmem [shape: f32[4,2048], index: 2, kind: input, shape index: {}]   ;;  %s1540_s3 = inlined_call_operand.vmem [shape: f32[4,2048], index: 3, kind: input, shape index: {}]   ;;  %s1541_s4 = inlined_call_operand.vmem [shape: f32[16,2048], index: 4, kind: input, shape index: {}]   ;;  %s1542_s5 = inlined_call_operand.vmem [shape: f32[16,4], index: 5, kind: input, shape index: {}]   ;;  %s1543_s6 = inlined_call_operand.vmem [shape: f32[16,4], index: 6, kind: input, shape index: {}]   ;;  %s1544_s7 = inlined_call_operand.vmem [shape: f32[16,4], index: 7, kind: input, shape index: {}]   ;;  %s1545_s8 = inlined_call_operand.vmem [shape: f32[16,4], index: 8, kind: input, shape index: {}]   ;;  %s1546_s9 = inlined_call_operand.vmem [shape: f32[16,16], index: 9, kind: input, shape index: {}]   ;;  %s1547_s10 = inlined_call_operand.vmem [shape: f32[16,1], index: 10, kind: input, shape index: {}]   ;;  %s1548_s11 = inlined_call_operand.vmem [shape: f32[16,2048], index: 11, kind: output, shape index: {}]  }
   0x1   :  { %s1360_s19 = smov 0  }
   0x2 LB: > { %s1372_s20 = sadd.s32 4294967295, %s1293_s19   ;;  %s1375_s21 = sadd.s32 1, %s1293_s19   ;;  %s1293_s19 = sphi %s1360_s19, %s1552_s19   ;;  %s1289_s18 = sphi %s1358_s18, %s1551_s18   ;;  %s1285_s17 = sphi %s1356_s17, %s1550_s17  }
   0x3   : > { %s129_s22 = ssub.s32 %s1293_s19, %s1375_s21  ;;  %s132_s23 = sadd.s32 1, %s1289_s18 }
   0x4   : > { %p130_p0 = scmp.eq.s32.totalorder %s129_s22, 0  ;;  %p139_p1 = scmp.ne.s32.totalorder %s1289_s18, %s1285_s17 }
   0x5   : > { %p140_p2 = scmp.eq.s32.totalorder %s1293_s19, 0  ;;  %p295_p3 = scmp.eq.s32.totalorder %s1372_s20, 3 }
   0x6   : > { %s1385_s24 = scalar_select %p130_p0, %s1289_s18, %s132_s23  }
   0x7   : > { %p141_p4 = por %p140_p2, %p139_p1  ;;  %p1387_p5 = por %p295_p3, %p139_p1 }
   0x8   : > { %p1203_p6 = scmp.ge.s32.totalorder %s1293_s19, 4 }
   0xa   : > { %335 = sbr.rel (%p1203_p6) target bundleno = 27 (0x1b), region = 40 }
   0xf   : > { %374 = sbr.rel (!%p141_p4) target bundleno = 27 (0x1b), region = 60  ;;  %s376_s26 = sand.u32 (%p141_p4), 1, %s1289_s18  }
  0x10   : > { %s1243_s27 = sshll.u32 (%p141_p4), %s1293_s19, 5  ;;  %s1204_s28 = sshll.u32 (%p141_p4), %s376_s26, 6 }
  0x11   : > { %s381_s12 = scalar_lea.vmem (%p141_p4), %s1541_s4, %s1243_s27  ;;  %s378_s13 = scalar_lea.vmem (%p141_p4), [#allocation2], %s1204_s28 }
  0x12   : > { %v394_v0 = vld [vmem:[%s381_s12] sm:$0xff] (%p141_p4)  ;;  %v396_v1 = vld [vmem:[%s381_s12 + $0x8] sm:$0xff] (%p141_p4)  ;;  %v398_v2 = vld [vmem:[%s381_s12 + $0x10] sm:$0xff] (%p141_p4) }
  0x13   : > { %395 = vst [vmem:[%s378_s13] sm:$0xff] (%p141_p4), %v394_v0  ;;  %v400_v3 = vld [vmem:[%s381_s12 + $0x18] sm:$0xff] (%p141_p4)  ;;  %v402_v4 = vld [vmem:[%s381_s12 + $0x80] sm:$0xff] (%p141_p4)  ;;  %v404_v5 = vld [vmem:[%s381_s12 + $0x88] sm:$0xff] (%p141_p4) }
  0x14   : > { %397 = vst [vmem:[%s378_s13 + $0x8] sm:$0xff] %v396_v1  ;;  %v406_v6 = vld [vmem:[%s381_s12 + $0x90] sm:$0xff]  ;;  %v408_v7 = vld [vmem:[%s381_s12 + $0x98] sm:$0xff] }
  0x15   : > { %399 = vst [vmem:[%s378_s13 + $0x10] sm:$0xff] %v398_v2 }
  0x16   : > { %401 = vst [vmem:[%s378_s13 + $0x18] sm:$0xff] %v400_v3 }
  0x17   : > { %403 = vst [vmem:[%s378_s13 + $0x20] sm:$0xff] %v402_v4 }
  0x18   : > { %405 = vst [vmem:[%s378_s13 + $0x28] sm:$0xff] %v404_v5 }
  0x19   : > { %407 = vst [vmem:[%s378_s13 + $0x30] sm:$0xff] %v406_v6 }
  0x1a   : > { %409 = vst [vmem:[%s378_s13 + $0x38] sm:$0xff] %v408_v7 }
  0x1b PF: > { %p1207_p7 = scmp.ge.s32.totalorder %s1293_s19, 1  ;;  %p414_p8 = scmp.lt.s32.totalorder %s1293_s19, 5 }
  0x1d   : > { %p415_p9 = pnand %p1207_p7, %p414_p8 }
  0x1e   : > { %s1210_s14 = sshll.u32 (!%p415_p9), %s1372_s20, 2  ;;  %s421_s29 = sand.u32 (!%p415_p9), 1, %s1285_s17  }
  0x1f   : > { %418 = sbr.rel (%p415_p9) target bundleno = 289 (0x121), region = 83  ;;  %p480_p10 = scmp.lt.s32.totalorder (!%p415_p9), %s1210_s14, 15 }
  0x24   : > { %s1554_s14 = smov (!%p480_p10, %s1210_s14), 15  ;;  %vm554_vm0 = vcmask 1041408   ;;  %v528_v20 = vld [vmem:[%s1543_s6] sm:$0xff]  ;;  %v529_v21 = vld [vmem:[%s1543_s6 + $0x8] sm:$0xff]  ;;  %vm550_vm1 = vcmask 31744   ;;  %vm911_vm2 = vcmask 130048  }
  0x25   : > { %s1400_s15 = sshll.u32 %s1554_s14, 2  ;;  %v530_v32 = vpack.c.bf16 %v529_v21, %v528_v20  ;;  %v506_v55 = vld [vmem:[%s1542_s5] sm:$0xff]  ;;  %v507_v56 = vld [vmem:[%s1542_s5 + $0x8] sm:$0xff] }
  0x26   : > { %s483_s23 = scalar_lea.vmem %s1537_s0, %s1400_s15  ;;  %s489_s27 = scalar_lea.vmem %s1538_s1, %s1400_s15  ;;  %v508_v63 = vpack.c.bf16 %v507_v56, %v506_v55  ;;  %v694_v6 = vld [vmem:[%s1544_s7] sm:$0xff]  ;;  %v695_v7 = vld [vmem:[%s1544_s7 + $0x8] sm:$0xff] }
  0x27   : > { %v509_v8 = vld [vmem:[%s483_s23] sm:$0xff]  ;;  %v510_v9 = vld [vmem:[%s483_s23 + $0x8] sm:$0xff]  ;;  %s495_s30 = scalar_lea.vmem %s1539_s2, %s1400_s15  ;;  %s501_s19 = scalar_lea.vmem %s1540_s3, %s1400_s15 }
  0x28   : > { %513 = vst [vmem:[#allocation1] ss:$2 sm:$0xff] %v509_v8  ;;  %v531_v10 = vld [vmem:[%s489_s27] sm:$0xff]  ;;  %v532_v11 = vld [vmem:[%s489_s27 + $0x8] sm:$0xff] }
  0x29   : > { %515 = vst [vmem:[#allocation1 + $0x10] ss:$2 sm:$0xff] %v510_v9  ;;  %v697_v18 = vld [vmem:[%s495_s30] sm:$0xff]  ;;  %v698_v19 = vld [vmem:[%s495_s30 + $0x8] sm:$0xff]  ;;  %s1455_s30 = sshll.u32 %s421_s29, 6 }
  0x2a   : > { %v798_v41 = vld [vmem:[%s501_s19] sm:$0xff]  ;;  %v799_v42 = vld [vmem:[%s501_s19 + $0x8] sm:$0xff]  ;;  %s423_s17 = scalar_lea.vmem [#allocation2], %s1455_s30 }
  0x2b   : > { %v899_v8 = vld [vmem:[%s423_s17] sm:$0xff]  ;;  %v979_v21 = vld [vmem:[%s1547_s10] sm:$0xff] }
  0x2c   : > { %v903_v9 = vld [vmem:[%s423_s17 + $0x20] sm:$0xff] }
  0x2f   : > { %v516_v12 = vld.sshfl [vmem:[#allocation1] sm:$0xff pattern:$0x75316420]  ;;  %v517_v13 = vld.sshfl [vmem:[#allocation1 + $0x8] sm:$0xff pattern:$0x75316420] }
  0x30   : > { %535 = vst [vmem:[#allocation1] ss:$2 sm:$0xff] %v531_v10  ;;  %v518_v14 = vld.sshfl [vmem:[#allocation1 + $0x10] sm:$0xff pattern:$0x75316420]  ;;  %v524_v16 = vpack.c.bf16 %v516_v12, %v516_v12  ;;  %v525_v17 = vpack.c.bf16 %v517_v13, %v517_v13  ;;  %v901_v12 = vld [vmem:[%s423_s17 + $0x10] sm:$0xff]  ;;  %v696_v13 = vpack.c.bf16 %v695_v7, %v694_v6 }
  0x31   : > { %v519_v15 = vld.sshfl [vmem:[#allocation1 + $0x18] sm:$0xff pattern:$0x75316420]  ;;  %v526_v24 = vpack.c.bf16 %v518_v14, %v518_v14  ;;  %v900_v10 = vld [vmem:[%s423_s17 + $0x8] sm:$0xff] }
  0x32   : > { %537 = vst [vmem:[#allocation1 + $0x10] ss:$2 sm:$0xff] %v532_v11  ;;  %v527_v25 = vpack.c.bf16 %v519_v15, %v519_v15  ;;  %v627_v28 = vsel %vm554_vm0, %v524_v16, 0  ;;  %v630_v29 = vsel %vm554_vm0, %v525_v17, 0  ;;  %v904_v11 = vld [vmem:[%s423_s17 + $0x28] sm:$0xff]  ;;  %v905_v14 = vld [vmem:[%s423_s17 + $0x30] sm:$0xff]  ;;  %v907_v17 = vpack.c.bf16 %v903_v9, %v899_v8 }
  0x33   : > { %v633_v39 = vsel %vm554_vm0, %v526_v24, 0  ;;  %v902_v15 = vld [vmem:[%s423_s17 + $0x18] sm:$0xff]  ;;  %v796_v24 = vld [vmem:[%s1545_s8 + $0x8] sm:$0xff] }
  0x34   : > { %v636_v40 = vsel %vm554_vm0, %v527_v25, 0  ;;  %v906_v16 = vld [vmem:[%s423_s17 + $0x38] sm:$0xff]  ;;  %v980_v25 = vld [vmem:[%s1547_s10 + $0x8] sm:$0xff]  ;;  %s1501_s17 = scalar_lea.vmem [#allocation3], %s1455_s30  ;;  %s1244_s30 = sshll.u32 (%p1387_p5), %s1372_s20, 5 }
  0x35   : > { %v910_v20 = vpack.c.bf16 %v906_v16, %v902_v15  ;;  %s1064_s19 = scalar_lea.vmem (%p1387_p5), %s1548_s11, %s1244_s30 }
  0x37   : > { %v538_v22 = vld.sshfl [vmem:[#allocation1] sm:$0xff pattern:$0x75316420]  ;;  %v539_v23 = vld.sshfl [vmem:[#allocation1 + $0x8] sm:$0xff pattern:$0x75316420] }
  0x38   : > { %v546_v26 = vpack.c.bf16 %v538_v22, %v538_v22  ;;  %v547_v27 = vpack.c.bf16 %v539_v23, %v539_v23  ;;  %701 = vst [vmem:[#allocation1] ss:$2 sm:$0xff] %v697_v18  ;;  %v908_v18 = vpack.c.bf16 %v904_v11, %v900_v10  ;;  %v1295_v22 = vmov 0   ;;  %v795_v23 = vld [vmem:[%s1545_s8] sm:$0xff] }
  0x39   : > { %v540_v30 = vld.sshfl [vmem:[#allocation1 + $0x10] sm:$0xff pattern:$0x75316420]  ;;  %v541_v31 = vld.sshfl [vmem:[#allocation1 + $0x18] sm:$0xff pattern:$0x75316420]  ;;  %1270 = vset.pattern.permute.xlu0 %v1295_v22 }
  0x3a   : > { %v556_v33 = vsel %vm554_vm0, %v546_v26, 0  ;;  %v559_v34 = vsel %vm554_vm0, %v547_v27, 0  ;;  %v548_v35 = vpack.c.bf16 %v540_v30, %v540_v30  ;;  %v549_v36 = vpack.c.bf16 %v541_v31, %v541_v31  ;;  %703 = vst [vmem:[#allocation1 + $0x10] ss:$2 sm:$0xff] %v698_v19  ;;  %983 = vperm.xlu0 %1270, %v979_v21   ;;  %v896_v27 = vld [vmem:[%s1546_s9] sm:$0xff] }
  0x3b   : > { %574 = vmatpush.bf16.msra.mxu0 %v556_v33  ;;  %588 = vmatpush.bf16.msra.mxu1 %v559_v34  ;;  %v909_v19 = vpack.c.bf16 %v905_v14, %v901_v12  ;;  %v797_v26 = vpack.c.bf16 %v796_v24, %v795_v23 }
  0x3c   : > { %v562_v37 = vsel %vm554_vm0, %v548_v35, 0  ;;  %v565_v38 = vsel %vm554_vm0, %v549_v36, 0 }
  0x3d   : > { %602 = vmatpush.bf16.msra.mxu2 %v562_v37  ;;  %616 = vmatpush.bf16.msra.mxu3 %v565_v38 }
  0x3e   : > { %1218 = vmatmul.msk.bf16.vlgmr.msra.gmra.mxu0 %vm550_vm1, %v530_v32  ;;  %1219 = vmatmul.msk.bf16.vlgmr.msra.gmra.mxu1 %vm550_vm1, %v530_v32 }
  0x3f   : > { %645 = vmatpush.bf16.msrb.mxu0 %v627_v28  ;;  %659 = vmatpush.bf16.msrb.mxu1 %v630_v29  ;;  %v704_v43 = vld.sshfl [vmem:[#allocation1] sm:$0xff pattern:$0x75316420]  ;;  %v705_v44 = vld.sshfl [vmem:[#allocation1 + $0x8] sm:$0xff pattern:$0x75316420] }
  0x40   : > { %1220 = vmatmul.msk.bf16.vlgmr.msra.gmra.mxu2 %vm550_vm1, %v530_v32  ;;  %1221 = vmatmul.msk.bf16.vlgmr.msra.gmra.mxu3 %vm550_vm1, %v530_v32  ;;  %v712_v45 = vpack.c.bf16 %v704_v43, %v704_v43  ;;  %v713_v46 = vpack.c.bf16 %v705_v44, %v705_v44  ;;  %802 = vst [vmem:[#allocation1] ss:$2 sm:$0xff] %v798_v41  ;;  %v897_v28 = vld [vmem:[%s1546_s9 + $0x8] sm:$0xff] }
  0x41   : > { %673 = vmatpush.bf16.msrb.mxu2 %v633_v39  ;;  %687 = vmatpush.bf16.msrb.mxu3 %v636_v40  ;;  %v706_v47 = vld.sshfl [vmem:[#allocation1 + $0x10] sm:$0xff pattern:$0x75316420]  ;;  %v707_v48 = vld.sshfl [vmem:[#allocation1 + $0x18] sm:$0xff pattern:$0x75316420]  ;;  %v898_v29 = vpack.c.bf16 %v897_v28, %v896_v27 }
  0x42   : > { %v714_v49 = vpack.c.bf16 %v706_v47, %v706_v47  ;;  %v715_v50 = vpack.c.bf16 %v707_v48, %v707_v48  ;;  %804 = vst [vmem:[#allocation1 + $0x10] ss:$2 sm:$0xff] %v799_v42  ;;  %v720_v51 = vsel %vm554_vm0, %v712_v45, 0  ;;  %v723_v52 = vsel %vm554_vm0, %v713_v46, 0  ;;  %988 = vperm.xlu0 %1270, %v980_v25  }
  0x43   : > { %738 = vmatpush.bf16.msra.mxu0 %v720_v51  ;;  %752 = vmatpush.bf16.msra.mxu1 %v723_v52 }
  0x44   : > { %v726_v53 = vsel %vm554_vm0, %v714_v49, 0  ;;  %v729_v54 = vsel %vm554_vm0, %v715_v50, 0 }
  0x45   : > { %766 = vmatpush.bf16.msra.mxu2 %v726_v53  ;;  %780 = vmatpush.bf16.msra.mxu3 %v729_v54 }
  0x47   : > { %v805_v57 = vld.sshfl [vmem:[#allocation1] sm:$0xff pattern:$0x75316420]  ;;  %v806_v58 = vld.sshfl [vmem:[#allocation1 + $0x8] sm:$0xff pattern:$0x75316420] }
  0x48   : > { %v813_v59 = vpack.c.bf16 %v805_v57, %v805_v57  ;;  %v814_v60 = vpack.c.bf16 %v806_v58, %v806_v58 }
  0x49   : > { %v807_v61 = vld.sshfl [vmem:[#allocation1 + $0x10] sm:$0xff pattern:$0x75316420]  ;;  %v808_v62 = vld.sshfl [vmem:[#allocation1 + $0x18] sm:$0xff pattern:$0x75316420] }
  0x4a   : > { %v815_v0 = vpack.c.bf16 %v807_v61, %v807_v61  ;;  %v816_v1 = vpack.c.bf16 %v808_v62, %v808_v62  ;;  %v821_v2 = vsel %vm554_vm0, %v813_v59, 0  ;;  %v824_v3 = vsel %vm554_vm0, %v814_v60, 0 }
  0x4c   : > { %v827_v4 = vsel %vm554_vm0, %v815_v0, 0  ;;  %v830_v5 = vsel %vm554_vm0, %v816_v1, 0 }
  0x4e   : > { %1222 = vmatmul.msk.bf16.vlgmr.msrb.gmra.mxu0 %vm550_vm1, %v508_v63  ;;  %1223 = vmatmul.msk.bf16.vlgmr.msrb.gmra.mxu1 %vm550_vm1, %v508_v63 }
  0x4f   : > { %839 = vmatpush.bf16.msrb.mxu0 %v821_v2  ;;  %853 = vmatpush.bf16.msrb.mxu1 %v824_v3 }
  0x50   : > { %1224 = vmatmul.msk.bf16.vlgmr.msrb.gmra.mxu2 %vm550_vm1, %v508_v63  ;;  %1225 = vmatmul.msk.bf16.vlgmr.msrb.gmra.mxu3 %vm550_vm1, %v508_v63 }
  0x51   : > { %867 = vmatpush.bf16.msrb.mxu2 %v827_v4  ;;  %881 = vmatpush.bf16.msrb.mxu3 %v830_v5 }
  0x5e   : > { %1226 = vmatmul.msk.bf16.vlgmr.msra.gmra.mxu0 %vm550_vm1, %v696_v13  ;;  %1227 = vmatmul.msk.bf16.vlgmr.msra.gmra.mxu1 %vm550_vm1, %v696_v13 }
  0x5f   : > { %922 = vmatpush.bf16.msra.mxu0 %v907_v17  ;;  %936 = vmatpush.bf16.msra.mxu1 %v908_v18 }
  0x60   : > { %1228 = vmatmul.msk.bf16.vlgmr.msra.gmra.mxu2 %vm550_vm1, %v696_v13  ;;  %1229 = vmatmul.msk.bf16.vlgmr.msra.gmra.mxu3 %vm550_vm1, %v696_v13 }
  0x61   : > { %950 = vmatpush.bf16.msra.mxu2 %v909_v19  ;;  %964 = vmatpush.bf16.msra.mxu3 %v910_v20 }
  0x6e   : > { %1230 = vmatmul.msk.bf16.vlgmr.msrb.gmra.mxu0 %vm550_vm1, %v797_v26  ;;  %1231 = vmatmul.msk.bf16.vlgmr.msrb.gmra.mxu1 %vm550_vm1, %v797_v26 }
  0x70   : > { %1232 = vmatmul.msk.bf16.vlgmr.msrb.gmra.mxu2 %vm550_vm1, %v797_v26  ;;  %1233 = vmatmul.msk.bf16.vlgmr.msrb.gmra.mxu3 %vm550_vm1, %v797_v26 }
  0x7e   : > { %1234 = vmatmul.msk.bf16.vlgmr.msra.gmra.mxu0 %vm911_vm2, %v898_v29  ;;  %1235 = vmatmul.msk.bf16.vlgmr.msra.gmra.mxu1 %vm911_vm2, %v898_v29 }
  0x80   : > { %1236 = vmatmul.msk.bf16.vlgmr.msra.gmra.mxu2 %vm911_vm2, %v898_v29  ;;  %1237 = vmatmul.msk.bf16.vlgmr.msra.gmra.mxu3 %vm911_vm2, %v898_v29 }
  0xac   : > { %v984_v0 = vpop.permute.xlu0 %983 }
  0xbb   : > { %v576_v30 = vpop.f32.mrf.mxu0  ;;  %v590_v31 = vpop.f32.mrf.mxu1 }
  0xc3   : > { %v604_v32 = vpop.f32.mrf.mxu2  ;;  %v618_v33 = vpop.f32.mrf.mxu3 }
  0xc4   : > { %v578_v34 = vpop.f32.mrf.mxu0  ;;  %v592_v35 = vpop.f32.mrf.mxu1 }
  0xcb   : > { %v1490_v36 = vpop.f32.mrf.mxu2  ;;  %v1492_v37 = vpop.f32.mrf.mxu3 }
  0xcc   : > { %v647_v38 = vpop.f32.mrf.mxu0  ;;  %v661_v39 = vpop.f32.mrf.mxu1 }
  0xcd   : > { %v648_v60 = vadd.f32 %v647_v38, %v576_v30  ;;  %v662_v61 = vadd.f32 %v661_v39, %v590_v31 }
  0xd3   : > { %v675_v40 = vpop.f32.mrf.mxu2  ;;  %v689_v41 = vpop.f32.mrf.mxu3 }
  0xd4   : > { %v649_v42 = vpop.f32.mrf.mxu0  ;;  %v663_v43 = vpop.f32.mrf.mxu1  ;;  %v676_v9 = vadd.f32 %v675_v40, %v604_v32  ;;  %v690_v10 = vadd.f32 %v689_v41, %v618_v33 }
  0xd5   : > { %v650_v11 = vadd.f32 %v649_v42, %v578_v34  ;;  %v664_v12 = vadd.f32 %v663_v43, %v592_v35  ;;  %v989_v43 = vpop.permute.xlu0 %988 }
  0xdb   : > { %v677_v44 = vpop.f32.mrf.mxu2  ;;  %v691_v45 = vpop.f32.mrf.mxu3 }
  0xdc   : > { %v740_v46 = vpop.f32.mrf.mxu0  ;;  %v754_v47 = vpop.f32.mrf.mxu1  ;;  %v678_v39 = vadd.f32 %v677_v44, %v1490_v36  ;;  %v692_v40 = vadd.f32 %v691_v45, %v1492_v37 }
  0xdd   : > { %v787_v62 = vadd.f32 %v740_v46, %v648_v60  ;;  %v788_v63 = vadd.f32 %v754_v47, %v662_v61 }
  0xe3   : > { %v768_v48 = vpop.f32.mrf.mxu2  ;;  %v782_v49 = vpop.f32.mrf.mxu3 }
  0xe4   : > { %v742_v50 = vpop.f32.mrf.mxu0  ;;  %v756_v51 = vpop.f32.mrf.mxu1  ;;  %v789_v15 = vadd.f32 %v768_v48, %v676_v9  ;;  %v790_v16 = vadd.f32 %v782_v49, %v690_v10 }
  0xe5   : > { %v791_v17 = vadd.f32 %v742_v50, %v650_v11  ;;  %v792_v18 = vadd.f32 %v756_v51, %v664_v12 }
  0xeb   : > { %v1494_v52 = vpop.f32.mrf.mxu2  ;;  %v1496_v53 = vpop.f32.mrf.mxu3 }
  0xec   : > { %v841_v54 = vpop.f32.mrf.mxu0  ;;  %v855_v55 = vpop.f32.mrf.mxu1  ;;  %v793_v50 = vadd.f32 %v1494_v52, %v678_v39  ;;  %v794_v51 = vadd.f32 %v1496_v53, %v692_v40 }
  0xed   : > { %v888_v1 = vadd.f32 %v841_v54, %v787_v62  ;;  %v889_v2 = vadd.f32 %v855_v55, %v788_v63 }
  0xf3   : > { %v869_v56 = vpop.f32.mrf.mxu2  ;;  %v883_v57 = vpop.f32.mrf.mxu3 }
  0xf4   : > { %v843_v58 = vpop.f32.mrf.mxu0  ;;  %v857_v59 = vpop.f32.mrf.mxu1  ;;  %v890_v21 = vadd.f32 %v869_v56, %v789_v15  ;;  %v891_v22 = vadd.f32 %v883_v57, %v790_v16 }
  0xf5   : > { %v892_v23 = vadd.f32 %v843_v58, %v791_v17  ;;  %v893_v24 = vadd.f32 %v857_v59, %v792_v18 }
  0xfb   : > { %v871_v3 = vpop.f32.mrf.mxu2  ;;  %v885_v4 = vpop.f32.mrf.mxu3 }
  0xfc   : > { %v924_v5 = vpop.f32.mrf.mxu0  ;;  %v938_v6 = vpop.f32.mrf.mxu1  ;;  %v894_v54 = vadd.f32 %v871_v3, %v793_v50  ;;  %v895_v55 = vadd.f32 %v885_v4, %v794_v51 }
  0xfd   : > { %v971_v7 = vadd.f32 %v924_v5, %v888_v1  ;;  %v972_v8 = vadd.f32 %v938_v6, %v889_v2 }
  0xff   : > { %v991_v13 = vadd.f32 %v984_v0, %v971_v7  ;;  %v992_v14 = vadd.f32 %v984_v0, %v972_v8 }
 0x101   : > { %vm999_vm3 = vcmp.ge.f32.partialorder %v991_v13, 0.0  ;;  %v1007_v19 = vmul.f32 0.2, %v991_v13  ;;  %vm1000_vm4 = vcmp.ge.f32.partialorder %v992_v14, 0.0  ;;  %v1008_v20 = vmul.f32 0.2, %v992_v14 }
 0x103   : > { %v1015_v25 = vsel %vm999_vm3, %v991_v13, %v1007_v19  ;;  %v1016_v26 = vsel %vm1000_vm4, %v992_v14, %v1008_v20  ;;  %v952_v27 = vpop.f32.mrf.mxu2  ;;  %v966_v28 = vpop.f32.mrf.mxu3 }
 0x104   : > { %vm1023_vm5 = vcmp.ge.f32.partialorder %v1015_v25, 0.0  ;;  %v1031_v29 = vmul.f32 0.2, %v1015_v25  ;;  %vm1024_vm6 = vcmp.ge.f32.partialorder %v1016_v26, 0.0  ;;  %v1032_v30 = vmul.f32 0.2, %v1016_v26  ;;  %v926_v31 = vpop.f32.mrf.mxu0  ;;  %v940_v32 = vpop.f32.mrf.mxu1 }
 0x105   : > { %v973_v33 = vadd.f32 %v952_v27, %v890_v21  ;;  %v974_v34 = vadd.f32 %v966_v28, %v891_v22  ;;  %v975_v35 = vadd.f32 %v926_v31, %v892_v23  ;;  %v976_v38 = vadd.f32 %v940_v32, %v893_v24 }
 0x106   : > { %v1039_v41 = vsel %vm1023_vm5, %v1015_v25, %v1031_v29  ;;  %v1040_v42 = vsel %vm1024_vm6, %v1016_v26, %v1032_v30 }
 0x107   : > { %1047 = vst [vmem:[%s1501_s17] sm:$0xff] %v1039_v41  ;;  %v993_v46 = vadd.f32 %v984_v0, %v973_v33  ;;  %v994_v47 = vadd.f32 %v984_v0, %v974_v34  ;;  %v995_v48 = vadd.f32 %v989_v43, %v975_v35  ;;  %v996_v49 = vadd.f32 %v989_v43, %v976_v38 }
 0x108   : > { %1048 = vst [vmem:[%s1501_s17 + $0x8] sm:$0xff] %v1040_v42 }
 0x109   : > { %vm1001_vm7 = vcmp.ge.f32.partialorder %v993_v46, 0.0  ;;  %v1009_v36 = vmul.f32 0.2, %v993_v46  ;;  %vm1002_vm8 = vcmp.ge.f32.partialorder %v994_v47, 0.0  ;;  %v1010_v37 = vmul.f32 0.2, %v994_v47 }
 0x10a   : > { %vm1003_vm9 = vcmp.ge.f32.partialorder %v995_v48, 0.0  ;;  %v1011_v44 = vmul.f32 0.2, %v995_v48  ;;  %vm1004_vm10 = vcmp.ge.f32.partialorder %v996_v49, 0.0  ;;  %v1012_v45 = vmul.f32 0.2, %v996_v49 }
 0x10b   : > { %v1017_v56 = vsel %vm1001_vm7, %v993_v46, %v1009_v36  ;;  %v1018_v57 = vsel %vm1002_vm8, %v994_v47, %v1010_v37  ;;  %v954_v58 = vpop.f32.mrf.mxu2  ;;  %v968_v59 = vpop.f32.mrf.mxu3 }
 0x10c   : > { %vm1025_vm11 = vcmp.ge.f32.partialorder %v1017_v56, 0.0  ;;  %v1033_v52 = vmul.f32 0.2, %v1017_v56  ;;  %vm1026_vm12 = vcmp.ge.f32.partialorder %v1018_v57, 0.0  ;;  %v1034_v53 = vmul.f32 0.2, %v1018_v57 }
 0x10d   : > { %v1019_v60 = vsel %vm1003_vm9, %v995_v48, %v1011_v44  ;;  %v1020_v61 = vsel %vm1004_vm10, %v996_v49, %v1012_v45  ;;  %v977_v62 = vadd.f32 %v954_v58, %v894_v54  ;;  %v978_v63 = vadd.f32 %v968_v59, %v895_v55 }
 0x10e   : > { %v1041_v0 = vsel %vm1025_vm11, %v1017_v56, %v1033_v52  ;;  %v1042_v1 = vsel %vm1026_vm12, %v1018_v57, %v1034_v53  ;;  %vm1027_vm13 = vcmp.ge.f32.partialorder %v1019_v60, 0.0  ;;  %v1035_v2 = vmul.f32 0.2, %v1019_v60  ;;  %v1077_v16 = vld [vmem:[%s1501_s17] sm:$0xff] (%p1387_p5) }
 0x10f   : > { %1049 = vst [vmem:[%s1501_s17 + $0x10] sm:$0xff] %v1041_v0  ;;  %vm1028_vm14 = vcmp.ge.f32.partialorder %v1020_v61, 0.0  ;;  %v1036_v3 = vmul.f32 0.2, %v1020_v61  ;;  %v997_v4 = vadd.f32 %v989_v43, %v977_v62  ;;  %v998_v5 = vadd.f32 %v989_v43, %v978_v63  ;;  %v1079_v17 = vld [vmem:[%s1501_s17 + $0x8] sm:$0xff] (%p1387_p5) }
 0x110   : > { %1050 = vst [vmem:[%s1501_s17 + $0x18] sm:$0xff] %v1042_v1  ;;  %v1043_v6 = vsel %vm1027_vm13, %v1019_v60, %v1035_v2 }
 0x111   : > { %1051 = vst [vmem:[%s1501_s17 + $0x20] sm:$0xff] %v1043_v6  ;;  %v1044_v7 = vsel %vm1028_vm14, %v1020_v61, %v1036_v3  ;;  %vm1005_vm15 = vcmp.ge.f32.partialorder %v997_v4, 0.0  ;;  %v1013_v8 = vmul.f32 0.2, %v997_v4  ;;  %vm1006_vm0 = vcmp.ge.f32.partialorder %v998_v5, 0.0 }
 0x112   : > { %1052 = vst [vmem:[%s1501_s17 + $0x28] sm:$0xff] %v1044_v7  ;;  %v1014_v9 = vmul.f32 0.2, %v998_v5 }
 0x113   : > { %v1021_v10 = vsel %vm1005_vm15, %v997_v4, %v1013_v8  ;;  %1078 = vst [vmem:[%s1064_s19] sm:$0xff] (%p1387_p5), %v1077_v16 }
 0x114   : > { %vm1029_vm1 = vcmp.ge.f32.partialorder %v1021_v10, 0.0  ;;  %v1037_v11 = vmul.f32 0.2, %v1021_v10  ;;  %v1022_v12 = vsel %vm1006_vm0, %v998_v5, %v1014_v9  ;;  %1061 = sbr.rel (!%p1387_p5) target bundleno = 289 (0x121), region = 91  ;;  %1080 = vst [vmem:[%s1064_s19 + $0x8] sm:$0xff] (%p1387_p5), %v1079_v17 }
 0x115   : > { %vm1030_vm2 = vcmp.ge.f32.partialorder %v1022_v12, 0.0  ;;  %v1038_v13 = vmul.f32 0.2, %v1022_v12 }
 0x116   : > { %v1045_v14 = vsel %vm1029_vm1, %v1021_v10, %v1037_v11  ;;  %v1081_v18 = vld [vmem:[%s1501_s17 + $0x10] sm:$0xff] (%p1387_p5) }
 0x117   : > { %1053 = vst [vmem:[%s1501_s17 + $0x30] sm:$0xff] %v1045_v14  ;;  %v1046_v15 = vsel %vm1030_vm2, %v1022_v12, %v1038_v13  ;;  %v1083_v19 = vld [vmem:[%s1501_s17 + $0x18] sm:$0xff] (%p1387_p5) }
 0x118   : > { %1054 = vst [vmem:[%s1501_s17 + $0x38] sm:$0xff] %v1046_v15  ;;  %v1085_v20 = vld [vmem:[%s1501_s17 + $0x20] sm:$0xff] (%p1387_p5) }
 0x119   : > { %1082 = vst [vmem:[%s1064_s19 + $0x10] sm:$0xff] %v1081_v18  ;;  %v1087_v21 = vld [vmem:[%s1501_s17 + $0x28] sm:$0xff] }
 0x11a   : > { %1084 = vst [vmem:[%s1064_s19 + $0x18] sm:$0xff] %v1083_v19 }
 0x11b   : > { %1086 = vst [vmem:[%s1064_s19 + $0x80] sm:$0xff] %v1085_v20 }
 0x11c   : > { %1088 = vst [vmem:[%s1064_s19 + $0x88] sm:$0xff] %v1087_v21 }
 0x11e   : > { %v1089_v22 = vld [vmem:[%s1501_s17 + $0x30] sm:$0xff] }
 0x11f   : > { %v1091_v23 = vld [vmem:[%s1501_s17 + $0x38] sm:$0xff]  ;;  %1090 = vst [vmem:[%s1064_s19 + $0x90] sm:$0xff] %v1089_v22 }
 0x120   : > { %1092 = vst [vmem:[%s1064_s19 + $0x98] sm:$0xff] %v1091_v23 }
 0x121 PF: > { %p18_p11 = scmp.ge.s32.totalorder %s1375_s21, 6   ;;  %s1550_s17 = smov %s1289_s18 }
 0x122   : > { %s1551_s18 = smov %s1385_s24  ;;  %s1552_s19 = smov %s1375_s21 }
 0x123   :  { %20 = sbr.rel (!%p18_p11) target bundleno = 2 (0x2), region = 161 }

</bundles_post_ra>
